<compile_context>
chip_gen: v7x
topology: tpu7x:2x2x1
jax: 0.10.0
libtpu: 0.0.40
codegen_flags: <defaults>
</compile_context>

<pallas_src>
import numpy as np

import jax
import jax.numpy as jnp
from jax.experimental import pallas as pl
from jax.experimental.pallas import tpu as pltpu


# ----------------------------------------------------------------------------
# Pallas kernel: full MobileNetTune forward for one batch sample
# ----------------------------------------------------------------------------
def _mobilenet_kernel(patches_ref, w_stem, s_stem, w0, s0,
                      sel16, w1, s1, w2, s2,
                      sel8, w3, s3, w4, s4,
                      sel4, w5, s5, w6, s6,
                      w_lin, b_lin, o_ref):
    """Whole network for one sample, everything VMEM-resident.

    Activations are (rows = spatial positions, cols = channels).  1x1 convs
    are plain MXU matmuls; 3x3/stride-2 convs are 9 accumulated
    (0/1-selection matmul, weight matmul) pairs.  bf16 MXU inputs, f32
    accumulation / shift / relu.
    """

    def dense(h, w_ref, s_ref, relu=True):
        y = jnp.dot(h.astype(jnp.bfloat16), w_ref[...],
                    preferred_element_type=jnp.float32) + s_ref[...]
        return jnp.maximum(y, 0.0) if relu else y

    def conv3x3_s2(h, sel_ref, w_ref, s_ref):
        hb = h.astype(jnp.bfloat16)
        acc = None
        for t in range(9):                              # static unroll over taps
            g = jnp.dot(sel_ref[t], hb, preferred_element_type=jnp.float32)
            y = jnp.dot(g.astype(jnp.bfloat16), w_ref[t],
                        preferred_element_type=jnp.float32)
            acc = y if acc is None else acc + y
        return jnp.maximum(acc + s_ref[...], 0.0)

    h = dense(patches_ref[0], w_stem, s_stem)   # stem conv+bn+relu   (256, 32)
    h = dense(h, w0, s0)                        # block0 1x1          (256, 64)
    h = conv3x3_s2(h, sel16, w1, s1)            # block1 3x3 s2       (64, 64)
    h = dense(h, w2, s2)                        # block2 1x1          (64, 128)
    h = conv3x3_s2(h, sel8, w3, s3)             # block3 3x3 s2       (16, 128)
    h = dense(h, w4, s4)                        # block4 1x1          (16, 256)
    h = conv3x3_s2(h, sel4, w5, s5)             # block5 3x3 s2       (4, 256)
    h = dense(h, w6, s6)                        # block6 1x1          (4, 512)

    # avg_pool2d(2) + flatten + Dropout(eval identity) + Linear.  Linear is
    # affine, so averaging per-position logits == linear(averaged features).
    logits = dense(h, w_lin, b_lin, relu=False)             # (4, 128)
    pooled = jnp.sum(logits, axis=0, keepdims=True) * (1.0 / logits.shape[0])
    o_ref[0] = jnp.broadcast_to(pooled, (o_ref.shape[1], o_ref.shape[2]))


def _const_index_map(ndim):
    zeros = (0,) * ndim
    return lambda b: zeros


# ----------------------------------------------------------------------------
# Host-side glue
# ----------------------------------------------------------------------------
def im2col_3x3_s2p1(x):
    """x: (B, H, W, C) -> (B, Ho*Wo, 9*C), columns ordered (kh, kw, cin)."""
    B, H, W, C = x.shape
    Ho = (H + 2 - 3) // 2 + 1
    Wo = (W + 2 - 3) // 2 + 1
    xp = jnp.pad(x, ((0, 0), (1, 1), (1, 1), (0, 0)))
    cols = []
    for kh in range(3):
        for kw in range(3):
            cols.append(xp[:, kh:kh + 2 * Ho:2, kw:kw + 2 * Wo:2, :])
    patches = jnp.stack(cols, axis=3)                  # (B, Ho, Wo, 9, C)
    return patches.reshape(B, Ho * Wo, 9 * C)


def mobilenet_forward(params, x_nchw, num_classes=100):
    # NCHW (PyTorch convention) -> NHWC
    x = jnp.transpose(x_nchw, (0, 2, 3, 1)).astype(jnp.float32)
    B, H, W, _ = x.shape
    assert (H, W) == (32, 32), "Linear(512, num_classes) implies 32x32 input"

    # Stem im2col depends only on the raw input, so it stays outside the
    # fused kernel as a single small XLA fusion. (B, 256, 27) bf16.
    patches = im2col_3x3_s2p1(x).astype(jnp.bfloat16)

    args = [
        patches,
        params["w_stem"], params["s_stem"],
        params["w0"], params["s0"],
        params["sel16"], params["w1"], params["s1"],
        params["w2"], params["s2"],
        params["sel8"], params["w3"], params["s3"],
        params["w4"], params["s4"],
        params["sel4"], params["w5"], params["s5"],
        params["w6"], params["s6"],
        params["w_lin"], params["b_lin"],
    ]

    in_specs = [pl.BlockSpec((1,) + patches.shape[1:], lambda b: (b, 0, 0))]
    in_specs += [pl.BlockSpec(a.shape, _const_index_map(a.ndim))
                 for a in args[1:]]

    out = pl.pallas_call(
        _mobilenet_kernel,
        out_shape=jax.ShapeDtypeStruct((B, 8, 128), jnp.float32),
        grid=(B,),
        in_specs=in_specs,
        out_specs=pl.BlockSpec((1, 8, 128), lambda b: (b, 0, 0)),
        compiler_params=pltpu.CompilerParams(
            dimension_semantics=("parallel",)),
    )(*args)

    return out[:, 0, :num_classes]


# ----------------------------------------------------------------------------
# Model definition / parameter construction (MobileNetTune)
# ----------------------------------------------------------------------------
CFG = [64, (64, 2), 128, (128, 2), 256, (256, 2), 512]


def make_block_cfg(in_planes=32):
    """Static Python config (kept OUT of params to stay jit-static)."""
    blocks = []
    for c in CFG:
        out_planes = c if isinstance(c, int) else c[0]
        stride = 1 if isinstance(c, int) else c[1]
        k = 1 if stride == 1 else 3            # stride-1 blocks: 1x1 conv
        blocks.append((in_planes, out_planes, k, stride))
        in_planes = out_planes
    return blocks


def bn_fold(key, c, eps=1e-5):
    k1, k2, k3, k4 = jax.random.split(key, 4)
    gamma = 1.0 + 0.1 * jax.random.normal(k1, (c,), jnp.float32)
    beta = 0.1 * jax.random.normal(k2, (c,), jnp.float32)
    mean = 0.1 * jax.random.normal(k3, (c,), jnp.float32)
    var = 1.0 + 0.1 * jnp.abs(jax.random.normal(k4, (c,), jnp.float32))
    scale = gamma / jnp.sqrt(var + eps)
    shift = beta - mean * scale
    return scale, shift


def make_sel(H, W):
    """0/1 gather matrices for a 3x3 / stride-2 / pad-1 conv on an HxW map.

    sel[t, ho*Wo+wo, hi*W+wi] = 1 with t = kh*3+kw, hi = 2*ho+kh-1,
    wi = 2*wo+kw-1; taps falling in the zero padding stay all-zero rows.
    """
    Ho = (H + 2 - 3) // 2 + 1
    Wo = (W + 2 - 3) // 2 + 1
    sel = np.zeros((9, Ho * Wo, H * W), np.float32)
    for kh in range(3):
        for kw in range(3):
            t = kh * 3 + kw
            for ho in range(Ho):
                hi = 2 * ho + kh - 1
                if not 0 <= hi < H:
                    continue
                for wo in range(Wo):
                    wi = 2 * wo + kw - 1
                    if not 0 <= wi < W:
                        continue
                    sel[t, ho * Wo + wo, hi * W + wi] = 1.0
    return jnp.asarray(sel, dtype=jnp.bfloat16)        # 0/1 exact in bf16


def init_params(key, num_classes=100):
    """Kernel-ready params: BN folded into bf16 weights, classifier padded to
    128 lanes, spatial selection matrices precomputed once."""
    assert num_classes <= 128
    params = {}
    block_cfg = make_block_cfg(in_planes=32)
    keys = iter(jax.random.split(key, 4 + 2 * len(block_cfg)))

    def he(k, shape, fan_in):
        return jax.random.normal(k, shape, jnp.float32) * jnp.sqrt(2.0 / fan_in)

    # Stem: Conv2d(3, 32, k=3, s=2, p=1) + BN, folded.
    w = he(next(keys), (3, 3, 3, 32), 3 * 3 * 3)
    scale, shift = bn_fold(next(keys), 32)
    params["w_stem"] = (w * scale).reshape(27, 32).astype(jnp.bfloat16)
    params["s_stem"] = shift.reshape(1, 32)

    for i, (cin, cout, k, _stride) in enumerate(block_cfg):
        w = he(next(keys), (k, k, cin, cout), cin * k * k)
        scale, shift = bn_fold(next(keys), cout)
        wf = w * scale                                  # fold BN scale into W
        wf = wf.reshape(9, cin, cout) if k == 3 else wf.reshape(cin, cout)
        params[f"w{i}"] = wf.astype(jnp.bfloat16)
        params[f"s{i}"] = shift.reshape(1, cout)

    # Linear(512, num_classes), padded to 128 output lanes (sliced outside).
    ncp = 128
    wl = (jax.random.normal(next(keys), (512, num_classes), jnp.float32)
          / jnp.sqrt(512.0))
    bl = 0.01 * jax.random.normal(next(keys), (num_classes,), jnp.float32)
    params["w_lin"] = jnp.pad(
        wl, ((0, 0), (0, ncp - num_classes))).astype(jnp.bfloat16)
    params["b_lin"] = jnp.pad(bl, (0, ncp - num_classes)).reshape(1, ncp)

    # Gather-as-matmul matrices for the three in-network 3x3/s2 blocks.
    params["sel16"] = make_sel(16, 16)   # block1: 16x16 -> 8x8
    params["sel8"] = make_sel(8, 8)      # block3:  8x8  -> 4x4
    params["sel4"] = make_sel(4, 4)      # block5:  4x4  -> 2x2
    return params


if __name__ == "__main__":
    key = jax.random.PRNGKey(0)
    k_param, k_in = jax.random.split(key)

    params = init_params(k_param, num_classes=100)
    # PyTorch-style NCHW input; 32x32 so the flattened feature dim is exactly
    # 512, as Linear(512, 100) implies.
    x = jax.random.normal(k_in, (2, 3, 32, 32), jnp.float32)

    fwd = jax.jit(mobilenet_forward)
    out = fwd(params, x)
    out = jax.block_until_ready(out)

    assert out.shape == (2, 100), out.shape
    assert jnp.all(jnp.isfinite(out))
    print("KERNEL_OK")
</pallas_src>

<mosaic_0001>
module attributes {stable_mosaic.version = 11 : i64} {
  func.func @_mobilenet_kernel(%arg0: i32, %arg1: memref<1x256x27xbf16, #tpu.memory_space<vmem>>, %arg2: memref<27x32xbf16, #tpu.memory_space<vmem>>, %arg3: memref<1x32xf32, #tpu.memory_space<vmem>>, %arg4: memref<32x64xbf16, #tpu.memory_space<vmem>>, %arg5: memref<1x64xf32, #tpu.memory_space<vmem>>, %arg6: memref<9x64x256xbf16, #tpu.memory_space<vmem>>, %arg7: memref<9x64x64xbf16, #tpu.memory_space<vmem>>, %arg8: memref<1x64xf32, #tpu.memory_space<vmem>>, %arg9: memref<64x128xbf16, #tpu.memory_space<vmem>>, %arg10: memref<1x128xf32, #tpu.memory_space<vmem>>, %arg11: memref<9x16x64xbf16, #tpu.memory_space<vmem>>, %arg12: memref<9x128x128xbf16, #tpu.memory_space<vmem>>, %arg13: memref<1x128xf32, #tpu.memory_space<vmem>>, %arg14: memref<128x256xbf16, #tpu.memory_space<vmem>>, %arg15: memref<1x256xf32, #tpu.memory_space<vmem>>, %arg16: memref<9x4x16xbf16, #tpu.memory_space<vmem>>, %arg17: memref<9x256x256xbf16, #tpu.memory_space<vmem>>, %arg18: memref<1x256xf32, #tpu.memory_space<vmem>>, %arg19: memref<256x512xbf16, #tpu.memory_space<vmem>>, %arg20: memref<1x512xf32, #tpu.memory_space<vmem>>, %arg21: memref<512x128xbf16, #tpu.memory_space<vmem>>, %arg22: memref<1x128xf32, #tpu.memory_space<vmem>>, %arg23: memref<1x8x128xf32, #tpu.memory_space<vmem>>) attributes {dimension_semantics = [#tpu.dimension_semantics<parallel>], iteration_bounds = array<i64: 2>, scalar_prefetch = 0 : i64, scratch_operands = 0 : i64, tpu.core_type = #tpu.core_type<tc>, window_params = [{transform_indices = @transform_0, window_bounds = array<i64: 1, 256, 27>}, {pipeline_mode = #tpu.pipeline_mode<synchronous>, transform_indices = @transform_1, window_bounds = array<i64: 27, 32>}, {pipeline_mode = #tpu.pipeline_mode<synchronous>, transform_indices = @transform_2, window_bounds = array<i64: 1, 32>}, {pipeline_mode = #tpu.pipeline_mode<synchronous>, transform_indices = @transform_3, window_bounds = array<i64: 32, 64>}, {pipeline_mode = #tpu.pipeline_mode<synchronous>, transform_indices = @transform_4, window_bounds = array<i64: 1, 64>}, {pipeline_mode = #tpu.pipeline_mode<synchronous>, transform_indices = @transform_5, window_bounds = array<i64: 9, 64, 256>}, {pipeline_mode = #tpu.pipeline_mode<synchronous>, transform_indices = @transform_6, window_bounds = array<i64: 9, 64, 64>}, {pipeline_mode = #tpu.pipeline_mode<synchronous>, transform_indices = @transform_7, window_bounds = array<i64: 1, 64>}, {pipeline_mode = #tpu.pipeline_mode<synchronous>, transform_indices = @transform_8, window_bounds = array<i64: 64, 128>}, {pipeline_mode = #tpu.pipeline_mode<synchronous>, transform_indices = @transform_9, window_bounds = array<i64: 1, 128>}, {pipeline_mode = #tpu.pipeline_mode<synchronous>, transform_indices = @transform_10, window_bounds = array<i64: 9, 16, 64>}, {pipeline_mode = #tpu.pipeline_mode<synchronous>, transform_indices = @transform_11, window_bounds = array<i64: 9, 128, 128>}, {pipeline_mode = #tpu.pipeline_mode<synchronous>, transform_indices = @transform_12, window_bounds = array<i64: 1, 128>}, {pipeline_mode = #tpu.pipeline_mode<synchronous>, transform_indices = @transform_13, window_bounds = array<i64: 128, 256>}, {pipeline_mode = #tpu.pipeline_mode<synchronous>, transform_indices = @transform_14, window_bounds = array<i64: 1, 256>}, {pipeline_mode = #tpu.pipeline_mode<synchronous>, transform_indices = @transform_15, window_bounds = array<i64: 9, 4, 16>}, {pipeline_mode = #tpu.pipeline_mode<synchronous>, transform_indices = @transform_16, window_bounds = array<i64: 9, 256, 256>}, {pipeline_mode = #tpu.pipeline_mode<synchronous>, transform_indices = @transform_17, window_bounds = array<i64: 1, 256>}, {pipeline_mode = #tpu.pipeline_mode<synchronous>, transform_indices = @transform_18, window_bounds = array<i64: 256, 512>}, {pipeline_mode = #tpu.pipeline_mode<synchronous>, transform_indices = @transform_19, window_bounds = array<i64: 1, 512>}, {pipeline_mode = #tpu.pipeline_mode<synchronous>, transform_indices = @transform_20, window_bounds = array<i64: 512, 128>}, {pipeline_mode = #tpu.pipeline_mode<synchronous>, transform_indices = @transform_21, window_bounds = array<i64: 1, 128>}, {transform_indices = @transform_22, window_bounds = array<i64: 1, 8, 128>}]} {
    %c0 = arith.constant 0 : index
    %c0_0 = arith.constant 0 : index
    %c0_1 = arith.constant 0 : index
    %0 = vector.load %arg1[%c0, %c0_0, %c0_1] : memref<1x256x27xbf16, #tpu.memory_space<vmem>>, vector<1x256x27xbf16>
    %1 = vector.shape_cast %0 : vector<1x256x27xbf16> to vector<256x27xbf16>
    %c0_2 = arith.constant 0 : index
    %c0_3 = arith.constant 0 : index
    %2 = vector.load %arg2[%c0_2, %c0_3] : memref<27x32xbf16, #tpu.memory_space<vmem>>, vector<27x32xbf16>
    %cst = arith.constant dense<0.000000e+00> : vector<256x32xf32>
    %3 = tpu.matmul %1, %2, %cst {dimension_numbers = #tpu.dot_dimension_numbers<[1], [0], [0], [1], [0, 0, 1, 1], [], []>} : vector<256x27xbf16>, vector<27x32xbf16>, vector<256x32xf32> -> vector<256x32xf32>
    %c0_4 = arith.constant 0 : index
    %c0_5 = arith.constant 0 : index
    %4 = vector.load %arg3[%c0_4, %c0_5] : memref<1x32xf32, #tpu.memory_space<vmem>>, vector<1x32xf32>
    %5 = vector.broadcast %4 : vector<1x32xf32> to vector<256x32xf32>
    %6 = arith.addf %3, %5 : vector<256x32xf32>
    %cst_6 = arith.constant 0.000000e+00 : f32
    %7 = vector.broadcast %cst_6 : f32 to vector<256x32xf32>
    %8 = arith.maximumf %6, %7 : vector<256x32xf32>
    %9 = arith.truncf %8 : vector<256x32xf32> to vector<256x32xbf16>
    %c0_7 = arith.constant 0 : index
    %c0_8 = arith.constant 0 : index
    %10 = vector.load %arg4[%c0_7, %c0_8] : memref<32x64xbf16, #tpu.memory_space<vmem>>, vector<32x64xbf16>
    %cst_9 = arith.constant dense<0.000000e+00> : vector<256x64xf32>
    %11 = tpu.matmul %9, %10, %cst_9 {dimension_numbers = #tpu.dot_dimension_numbers<[1], [0], [0], [1], [0, 0, 1, 1], [], []>} : vector<256x32xbf16>, vector<32x64xbf16>, vector<256x64xf32> -> vector<256x64xf32>
    %c0_10 = arith.constant 0 : index
    %c0_11 = arith.constant 0 : index
    %12 = vector.load %arg5[%c0_10, %c0_11] : memref<1x64xf32, #tpu.memory_space<vmem>>, vector<1x64xf32>
    %13 = vector.broadcast %12 : vector<1x64xf32> to vector<256x64xf32>
    %14 = arith.addf %11, %13 : vector<256x64xf32>
    %cst_12 = arith.constant 0.000000e+00 : f32
    %15 = vector.broadcast %cst_12 : f32 to vector<256x64xf32>
    %16 = arith.maximumf %14, %15 : vector<256x64xf32>
    %17 = arith.truncf %16 : vector<256x64xf32> to vector<256x64xbf16>
    %c0_13 = arith.constant 0 : index
    %c0_14 = arith.constant 0 : index
    %c0_15 = arith.constant 0 : index
    %18 = vector.load %arg6[%c0_13, %c0_14, %c0_15] : memref<9x64x256xbf16, #tpu.memory_space<vmem>>, vector<1x64x256xbf16>
    %19 = vector.shape_cast %18 : vector<1x64x256xbf16> to vector<64x256xbf16>
    %cst_16 = arith.constant dense<0.000000e+00> : vector<64x64xf32>
    %20 = tpu.matmul %19, %17, %cst_16 {dimension_numbers = #tpu.dot_dimension_numbers<[1], [0], [0], [1], [0, 0, 1, 1], [], []>} : vector<64x256xbf16>, vector<256x64xbf16>, vector<64x64xf32> -> vector<64x64xf32>
    %21 = arith.truncf %20 : vector<64x64xf32> to vector<64x64xbf16>
    %c0_17 = arith.constant 0 : index
    %c0_18 = arith.constant 0 : index
    %c0_19 = arith.constant 0 : index
    %22 = vector.load %arg7[%c0_17, %c0_18, %c0_19] : memref<9x64x64xbf16, #tpu.memory_space<vmem>>, vector<1x64x64xbf16>
    %23 = vector.shape_cast %22 : vector<1x64x64xbf16> to vector<64x64xbf16>
    %cst_20 = arith.constant dense<0.000000e+00> : vector<64x64xf32>
    %24 = tpu.matmul %21, %23, %cst_20 {dimension_numbers = #tpu.dot_dimension_numbers<[1], [0], [0], [1], [0, 0, 1, 1], [], []>} : vector<64x64xbf16>, vector<64x64xbf16>, vector<64x64xf32> -> vector<64x64xf32>
    %c1 = arith.constant 1 : index
    %c0_21 = arith.constant 0 : index
    %c0_22 = arith.constant 0 : index
    %25 = vector.load %arg6[%c1, %c0_21, %c0_22] : memref<9x64x256xbf16, #tpu.memory_space<vmem>>, vector<1x64x256xbf16>
    %26 = vector.shape_cast %25 : vector<1x64x256xbf16> to vector<64x256xbf16>
    %cst_23 = arith.constant dense<0.000000e+00> : vector<64x64xf32>
    %27 = tpu.matmul %26, %17, %cst_23 {dimension_numbers = #tpu.dot_dimension_numbers<[1], [0], [0], [1], [0, 0, 1, 1], [], []>} : vector<64x256xbf16>, vector<256x64xbf16>, vector<64x64xf32> -> vector<64x64xf32>
    %28 = arith.truncf %27 : vector<64x64xf32> to vector<64x64xbf16>
    %c1_24 = arith.constant 1 : index
    %c0_25 = arith.constant 0 : index
    %c0_26 = arith.constant 0 : index
    %29 = vector.load %arg7[%c1_24, %c0_25, %c0_26] : memref<9x64x64xbf16, #tpu.memory_space<vmem>>, vector<1x64x64xbf16>
    %30 = vector.shape_cast %29 : vector<1x64x64xbf16> to vector<64x64xbf16>
    %cst_27 = arith.constant dense<0.000000e+00> : vector<64x64xf32>
    %31 = tpu.matmul %28, %30, %cst_27 {dimension_numbers = #tpu.dot_dimension_numbers<[1], [0], [0], [1], [0, 0, 1, 1], [], []>} : vector<64x64xbf16>, vector<64x64xbf16>, vector<64x64xf32> -> vector<64x64xf32>
    %32 = arith.addf %24, %31 : vector<64x64xf32>
    %c2 = arith.constant 2 : index
    %c0_28 = arith.constant 0 : index
    %c0_29 = arith.constant 0 : index
    %33 = vector.load %arg6[%c2, %c0_28, %c0_29] : memref<9x64x256xbf16, #tpu.memory_space<vmem>>, vector<1x64x256xbf16>
    %34 = vector.shape_cast %33 : vector<1x64x256xbf16> to vector<64x256xbf16>
    %cst_30 = arith.constant dense<0.000000e+00> : vector<64x64xf32>
    %35 = tpu.matmul %34, %17, %cst_30 {dimension_numbers = #tpu.dot_dimension_numbers<[1], [0], [0], [1], [0, 0, 1, 1], [], []>} : vector<64x256xbf16>, vector<256x64xbf16>, vector<64x64xf32> -> vector<64x64xf32>
    %36 = arith.truncf %35 : vector<64x64xf32> to vector<64x64xbf16>
    %c2_31 = arith.constant 2 : index
    %c0_32 = arith.constant 0 : index
    %c0_33 = arith.constant 0 : index
    %37 = vector.load %arg7[%c2_31, %c0_32, %c0_33] : memref<9x64x64xbf16, #tpu.memory_space<vmem>>, vector<1x64x64xbf16>
    %38 = vector.shape_cast %37 : vector<1x64x64xbf16> to vector<64x64xbf16>
    %cst_34 = arith.constant dense<0.000000e+00> : vector<64x64xf32>
    %39 = tpu.matmul %36, %38, %cst_34 {dimension_numbers = #tpu.dot_dimension_numbers<[1], [0], [0], [1], [0, 0, 1, 1], [], []>} : vector<64x64xbf16>, vector<64x64xbf16>, vector<64x64xf32> -> vector<64x64xf32>
    %40 = arith.addf %32, %39 : vector<64x64xf32>
    %c3 = arith.constant 3 : index
    %c0_35 = arith.constant 0 : index
    %c0_36 = arith.constant 0 : index
    %41 = vector.load %arg6[%c3, %c0_35, %c0_36] : memref<9x64x256xbf16, #tpu.memory_space<vmem>>, vector<1x64x256xbf16>
    %42 = vector.shape_cast %41 : vector<1x64x256xbf16> to vector<64x256xbf16>
    %cst_37 = arith.constant dense<0.000000e+00> : vector<64x64xf32>
    %43 = tpu.matmul %42, %17, %cst_37 {dimension_numbers = #tpu.dot_dimension_numbers<[1], [0], [0], [1], [0, 0, 1, 1], [], []>} : vector<64x256xbf16>, vector<256x64xbf16>, vector<64x64xf32> -> vector<64x64xf32>
    %44 = arith.truncf %43 : vector<64x64xf32> to vector<64x64xbf16>
    %c3_38 = arith.constant 3 : index
    %c0_39 = arith.constant 0 : index
    %c0_40 = arith.constant 0 : index
    %45 = vector.load %arg7[%c3_38, %c0_39, %c0_40] : memref<9x64x64xbf16, #tpu.memory_space<vmem>>, vector<1x64x64xbf16>
    %46 = vector.shape_cast %45 : vector<1x64x64xbf16> to vector<64x64xbf16>
    %cst_41 = arith.constant dense<0.000000e+00> : vector<64x64xf32>
    %47 = tpu.matmul %44, %46, %cst_41 {dimension_numbers = #tpu.dot_dimension_numbers<[1], [0], [0], [1], [0, 0, 1, 1], [], []>} : vector<64x64xbf16>, vector<64x64xbf16>, vector<64x64xf32> -> vector<64x64xf32>
    %48 = arith.addf %40, %47 : vector<64x64xf32>
    %c4 = arith.constant 4 : index
    %c0_42 = arith.constant 0 : index
    %c0_43 = arith.constant 0 : index
    %49 = vector.load %arg6[%c4, %c0_42, %c0_43] : memref<9x64x256xbf16, #tpu.memory_space<vmem>>, vector<1x64x256xbf16>
    %50 = vector.shape_cast %49 : vector<1x64x256xbf16> to vector<64x256xbf16>
    %cst_44 = arith.constant dense<0.000000e+00> : vector<64x64xf32>
    %51 = tpu.matmul %50, %17, %cst_44 {dimension_numbers = #tpu.dot_dimension_numbers<[1], [0], [0], [1], [0, 0, 1, 1], [], []>} : vector<64x256xbf16>, vector<256x64xbf16>, vector<64x64xf32> -> vector<64x64xf32>
    %52 = arith.truncf %51 : vector<64x64xf32> to vector<64x64xbf16>
    %c4_45 = arith.constant 4 : index
    %c0_46 = arith.constant 0 : index
    %c0_47 = arith.constant 0 : index
    %53 = vector.load %arg7[%c4_45, %c0_46, %c0_47] : memref<9x64x64xbf16, #tpu.memory_space<vmem>>, vector<1x64x64xbf16>
    %54 = vector.shape_cast %53 : vector<1x64x64xbf16> to vector<64x64xbf16>
    %cst_48 = arith.constant dense<0.000000e+00> : vector<64x64xf32>
    %55 = tpu.matmul %52, %54, %cst_48 {dimension_numbers = #tpu.dot_dimension_numbers<[1], [0], [0], [1], [0, 0, 1, 1], [], []>} : vector<64x64xbf16>, vector<64x64xbf16>, vector<64x64xf32> -> vector<64x64xf32>
    %56 = arith.addf %48, %55 : vector<64x64xf32>
    %c5 = arith.constant 5 : index
    %c0_49 = arith.constant 0 : index
    %c0_50 = arith.constant 0 : index
    %57 = vector.load %arg6[%c5, %c0_49, %c0_50] : memref<9x64x256xbf16, #tpu.memory_space<vmem>>, vector<1x64x256xbf16>
    %58 = vector.shape_cast %57 : vector<1x64x256xbf16> to vector<64x256xbf16>
    %cst_51 = arith.constant dense<0.000000e+00> : vector<64x64xf32>
    %59 = tpu.matmul %58, %17, %cst_51 {dimension_numbers = #tpu.dot_dimension_numbers<[1], [0], [0], [1], [0, 0, 1, 1], [], []>} : vector<64x256xbf16>, vector<256x64xbf16>, vector<64x64xf32> -> vector<64x64xf32>
    %60 = arith.truncf %59 : vector<64x64xf32> to vector<64x64xbf16>
    %c5_52 = arith.constant 5 : index
    %c0_53 = arith.constant 0 : index
    %c0_54 = arith.constant 0 : index
    %61 = vector.load %arg7[%c5_52, %c0_53, %c0_54] : memref<9x64x64xbf16, #tpu.memory_space<vmem>>, vector<1x64x64xbf16>
    %62 = vector.shape_cast %61 : vector<1x64x64xbf16> to vector<64x64xbf16>
    %cst_55 = arith.constant dense<0.000000e+00> : vector<64x64xf32>
    %63 = tpu.matmul %60, %62, %cst_55 {dimension_numbers = #tpu.dot_dimension_numbers<[1], [0], [0], [1], [0, 0, 1, 1], [], []>} : vector<64x64xbf16>, vector<64x64xbf16>, vector<64x64xf32> -> vector<64x64xf32>
    %64 = arith.addf %56, %63 : vector<64x64xf32>
    %c6 = arith.constant 6 : index
    %c0_56 = arith.constant 0 : index
    %c0_57 = arith.constant 0 : index
    %65 = vector.load %arg6[%c6, %c0_56, %c0_57] : memref<9x64x256xbf16, #tpu.memory_space<vmem>>, vector<1x64x256xbf16>
    %66 = vector.shape_cast %65 : vector<1x64x256xbf16> to vector<64x256xbf16>
    %cst_58 = arith.constant dense<0.000000e+00> : vector<64x64xf32>
    %67 = tpu.matmul %66, %17, %cst_58 {dimension_numbers = #tpu.dot_dimension_numbers<[1], [0], [0], [1], [0, 0, 1, 1], [], []>} : vector<64x256xbf16>, vector<256x64xbf16>, vector<64x64xf32> -> vector<64x64xf32>
    %68 = arith.truncf %67 : vector<64x64xf32> to vector<64x64xbf16>
    %c6_59 = arith.constant 6 : index
    %c0_60 = arith.constant 0 : index
    %c0_61 = arith.constant 0 : index
    %69 = vector.load %arg7[%c6_59, %c0_60, %c0_61] : memref<9x64x64xbf16, #tpu.memory_space<vmem>>, vector<1x64x64xbf16>
    %70 = vector.shape_cast %69 : vector<1x64x64xbf16> to vector<64x64xbf16>
    %cst_62 = arith.constant dense<0.000000e+00> : vector<64x64xf32>
    %71 = tpu.matmul %68, %70, %cst_62 {dimension_numbers = #tpu.dot_dimension_numbers<[1], [0], [0], [1], [0, 0, 1, 1], [], []>} : vector<64x64xbf16>, vector<64x64xbf16>, vector<64x64xf32> -> vector<64x64xf32>
    %72 = arith.addf %64, %71 : vector<64x64xf32>
    %c7 = arith.constant 7 : index
    %c0_63 = arith.constant 0 : index
    %c0_64 = arith.constant 0 : index
    %73 = vector.load %arg6[%c7, %c0_63, %c0_64] : memref<9x64x256xbf16, #tpu.memory_space<vmem>>, vector<1x64x256xbf16>
    %74 = vector.shape_cast %73 : vector<1x64x256xbf16> to vector<64x256xbf16>
    %cst_65 = arith.constant dense<0.000000e+00> : vector<64x64xf32>
    %75 = tpu.matmul %74, %17, %cst_65 {dimension_numbers = #tpu.dot_dimension_numbers<[1], [0], [0], [1], [0, 0, 1, 1], [], []>} : vector<64x256xbf16>, vector<256x64xbf16>, vector<64x64xf32> -> vector<64x64xf32>
    %76 = arith.truncf %75 : vector<64x64xf32> to vector<64x64xbf16>
    %c7_66 = arith.constant 7 : index
    %c0_67 = arith.constant 0 : index
    %c0_68 = arith.constant 0 : index
    %77 = vector.load %arg7[%c7_66, %c0_67, %c0_68] : memref<9x64x64xbf16, #tpu.memory_space<vmem>>, vector<1x64x64xbf16>
    %78 = vector.shape_cast %77 : vector<1x64x64xbf16> to vector<64x64xbf16>
    %cst_69 = arith.constant dense<0.000000e+00> : vector<64x64xf32>
    %79 = tpu.matmul %76, %78, %cst_69 {dimension_numbers = #tpu.dot_dimension_numbers<[1], [0], [0], [1], [0, 0, 1, 1], [], []>} : vector<64x64xbf16>, vector<64x64xbf16>, vector<64x64xf32> -> vector<64x64xf32>
    %80 = arith.addf %72, %79 : vector<64x64xf32>
    %c8 = arith.constant 8 : index
    %c0_70 = arith.constant 0 : index
    %c0_71 = arith.constant 0 : index
    %81 = vector.load %arg6[%c8, %c0_70, %c0_71] : memref<9x64x256xbf16, #tpu.memory_space<vmem>>, vector<1x64x256xbf16>
    %82 = vector.shape_cast %81 : vector<1x64x256xbf16> to vector<64x256xbf16>
    %cst_72 = arith.constant dense<0.000000e+00> : vector<64x64xf32>
    %83 = tpu.matmul %82, %17, %cst_72 {dimension_numbers = #tpu.dot_dimension_numbers<[1], [0], [0], [1], [0, 0, 1, 1], [], []>} : vector<64x256xbf16>, vector<256x64xbf16>, vector<64x64xf32> -> vector<64x64xf32>
    %84 = arith.truncf %83 : vector<64x64xf32> to vector<64x64xbf16>
    %c8_73 = arith.constant 8 : index
    %c0_74 = arith.constant 0 : index
    %c0_75 = arith.constant 0 : index
    %85 = vector.load %arg7[%c8_73, %c0_74, %c0_75] : memref<9x64x64xbf16, #tpu.memory_space<vmem>>, vector<1x64x64xbf16>
    %86 = vector.shape_cast %85 : vector<1x64x64xbf16> to vector<64x64xbf16>
    %cst_76 = arith.constant dense<0.000000e+00> : vector<64x64xf32>
    %87 = tpu.matmul %84, %86, %cst_76 {dimension_numbers = #tpu.dot_dimension_numbers<[1], [0], [0], [1], [0, 0, 1, 1], [], []>} : vector<64x64xbf16>, vector<64x64xbf16>, vector<64x64xf32> -> vector<64x64xf32>
    %88 = arith.addf %80, %87 : vector<64x64xf32>
    %c0_77 = arith.constant 0 : index
    %c0_78 = arith.constant 0 : index
    %89 = vector.load %arg8[%c0_77, %c0_78] : memref<1x64xf32, #tpu.memory_space<vmem>>, vector<1x64xf32>
    %90 = vector.broadcast %89 : vector<1x64xf32> to vector<64x64xf32>
    %91 = arith.addf %88, %90 : vector<64x64xf32>
    %cst_79 = arith.constant 0.000000e+00 : f32
    %92 = vector.broadcast %cst_79 : f32 to vector<64x64xf32>
    %93 = arith.maximumf %91, %92 : vector<64x64xf32>
    %94 = arith.truncf %93 : vector<64x64xf32> to vector<64x64xbf16>
    %c0_80 = arith.constant 0 : index
    %c0_81 = arith.constant 0 : index
    %95 = vector.load %arg9[%c0_80, %c0_81] : memref<64x128xbf16, #tpu.memory_space<vmem>>, vector<64x128xbf16>
    %cst_82 = arith.constant dense<0.000000e+00> : vector<64x128xf32>
    %96 = tpu.matmul %94, %95, %cst_82 {dimension_numbers = #tpu.dot_dimension_numbers<[1], [0], [0], [1], [0, 0, 1, 1], [], []>} : vector<64x64xbf16>, vector<64x128xbf16>, vector<64x128xf32> -> vector<64x128xf32>
    %c0_83 = arith.constant 0 : index
    %c0_84 = arith.constant 0 : index
    %97 = vector.load %arg10[%c0_83, %c0_84] : memref<1x128xf32, #tpu.memory_space<vmem>>, vector<1x128xf32>
    %98 = vector.broadcast %97 : vector<1x128xf32> to vector<64x128xf32>
    %99 = arith.addf %96, %98 : vector<64x128xf32>
    %cst_85 = arith.constant 0.000000e+00 : f32
    %100 = vector.broadcast %cst_85 : f32 to vector<64x128xf32>
    %101 = arith.maximumf %99, %100 : vector<64x128xf32>
    %102 = arith.truncf %101 : vector<64x128xf32> to vector<64x128xbf16>
    %c0_86 = arith.constant 0 : index
    %c0_87 = arith.constant 0 : index
    %c0_88 = arith.constant 0 : index
    %103 = vector.load %arg11[%c0_86, %c0_87, %c0_88] : memref<9x16x64xbf16, #tpu.memory_space<vmem>>, vector<1x16x64xbf16>
    %104 = vector.shape_cast %103 : vector<1x16x64xbf16> to vector<16x64xbf16>
    %cst_89 = arith.constant dense<0.000000e+00> : vector<16x128xf32>
    %105 = tpu.matmul %104, %102, %cst_89 {dimension_numbers = #tpu.dot_dimension_numbers<[1], [0], [0], [1], [0, 0, 1, 1], [], []>} : vector<16x64xbf16>, vector<64x128xbf16>, vector<16x128xf32> -> vector<16x128xf32>
    %106 = arith.truncf %105 : vector<16x128xf32> to vector<16x128xbf16>
    %c0_90 = arith.constant 0 : index
    %c0_91 = arith.constant 0 : index
    %c0_92 = arith.constant 0 : index
    %107 = vector.load %arg12[%c0_90, %c0_91, %c0_92] : memref<9x128x128xbf16, #tpu.memory_space<vmem>>, vector<1x128x128xbf16>
    %108 = vector.shape_cast %107 : vector<1x128x128xbf16> to vector<128x128xbf16>
    %cst_93 = arith.constant dense<0.000000e+00> : vector<16x128xf32>
    %109 = tpu.matmul %106, %108, %cst_93 {dimension_numbers = #tpu.dot_dimension_numbers<[1], [0], [0], [1], [0, 0, 1, 1], [], []>} : vector<16x128xbf16>, vector<128x128xbf16>, vector<16x128xf32> -> vector<16x128xf32>
    %c1_94 = arith.constant 1 : index
    %c0_95 = arith.constant 0 : index
    %c0_96 = arith.constant 0 : index
    %110 = vector.load %arg11[%c1_94, %c0_95, %c0_96] : memref<9x16x64xbf16, #tpu.memory_space<vmem>>, vector<1x16x64xbf16>
    %111 = vector.shape_cast %110 : vector<1x16x64xbf16> to vector<16x64xbf16>
    %cst_97 = arith.constant dense<0.000000e+00> : vector<16x128xf32>
    %112 = tpu.matmul %111, %102, %cst_97 {dimension_numbers = #tpu.dot_dimension_numbers<[1], [0], [0], [1], [0, 0, 1, 1], [], []>} : vector<16x64xbf16>, vector<64x128xbf16>, vector<16x128xf32> -> vector<16x128xf32>
    %113 = arith.truncf %112 : vector<16x128xf32> to vector<16x128xbf16>
    %c1_98 = arith.constant 1 : index
    %c0_99 = arith.constant 0 : index
    %c0_100 = arith.constant 0 : index
    %114 = vector.load %arg12[%c1_98, %c0_99, %c0_100] : memref<9x128x128xbf16, #tpu.memory_space<vmem>>, vector<1x128x128xbf16>
    %115 = vector.shape_cast %114 : vector<1x128x128xbf16> to vector<128x128xbf16>
    %cst_101 = arith.constant dense<0.000000e+00> : vector<16x128xf32>
    %116 = tpu.matmul %113, %115, %cst_101 {dimension_numbers = #tpu.dot_dimension_numbers<[1], [0], [0], [1], [0, 0, 1, 1], [], []>} : vector<16x128xbf16>, vector<128x128xbf16>, vector<16x128xf32> -> vector<16x128xf32>
    %117 = arith.addf %109, %116 : vector<16x128xf32>
    %c2_102 = arith.constant 2 : index
    %c0_103 = arith.constant 0 : index
    %c0_104 = arith.constant 0 : index
    %118 = vector.load %arg11[%c2_102, %c0_103, %c0_104] : memref<9x16x64xbf16, #tpu.memory_space<vmem>>, vector<1x16x64xbf16>
    %119 = vector.shape_cast %118 : vector<1x16x64xbf16> to vector<16x64xbf16>
    %cst_105 = arith.constant dense<0.000000e+00> : vector<16x128xf32>
    %120 = tpu.matmul %119, %102, %cst_105 {dimension_numbers = #tpu.dot_dimension_numbers<[1], [0], [0], [1], [0, 0, 1, 1], [], []>} : vector<16x64xbf16>, vector<64x128xbf16>, vector<16x128xf32> -> vector<16x128xf32>
    %121 = arith.truncf %120 : vector<16x128xf32> to vector<16x128xbf16>
    %c2_106 = arith.constant 2 : index
    %c0_107 = arith.constant 0 : index
    %c0_108 = arith.constant 0 : index
    %122 = vector.load %arg12[%c2_106, %c0_107, %c0_108] : memref<9x128x128xbf16, #tpu.memory_space<vmem>>, vector<1x128x128xbf16>
    %123 = vector.shape_cast %122 : vector<1x128x128xbf16> to vector<128x128xbf16>
    %cst_109 = arith.constant dense<0.000000e+00> : vector<16x128xf32>
    %124 = tpu.matmul %121, %123, %cst_109 {dimension_numbers = #tpu.dot_dimension_numbers<[1], [0], [0], [1], [0, 0, 1, 1], [], []>} : vector<16x128xbf16>, vector<128x128xbf16>, vector<16x128xf32> -> vector<16x128xf32>
    %125 = arith.addf %117, %124 : vector<16x128xf32>
    %c3_110 = arith.constant 3 : index
    %c0_111 = arith.constant 0 : index
    %c0_112 = arith.constant 0 : index
    %126 = vector.load %arg11[%c3_110, %c0_111, %c0_112] : memref<9x16x64xbf16, #tpu.memory_space<vmem>>, vector<1x16x64xbf16>
    %127 = vector.shape_cast %126 : vector<1x16x64xbf16> to vector<16x64xbf16>
    %cst_113 = arith.constant dense<0.000000e+00> : vector<16x128xf32>
    %128 = tpu.matmul %127, %102, %cst_113 {dimension_numbers = #tpu.dot_dimension_numbers<[1], [0], [0], [1], [0, 0, 1, 1], [], []>} : vector<16x64xbf16>, vector<64x128xbf16>, vector<16x128xf32> -> vector<16x128xf32>
    %129 = arith.truncf %128 : vector<16x128xf32> to vector<16x128xbf16>
    %c3_114 = arith.constant 3 : index
    %c0_115 = arith.constant 0 : index
    %c0_116 = arith.constant 0 : index
    %130 = vector.load %arg12[%c3_114, %c0_115, %c0_116] : memref<9x128x128xbf16, #tpu.memory_space<vmem>>, vector<1x128x128xbf16>
    %131 = vector.shape_cast %130 : vector<1x128x128xbf16> to vector<128x128xbf16>
    %cst_117 = arith.constant dense<0.000000e+00> : vector<16x128xf32>
    %132 = tpu.matmul %129, %131, %cst_117 {dimension_numbers = #tpu.dot_dimension_numbers<[1], [0], [0], [1], [0, 0, 1, 1], [], []>} : vector<16x128xbf16>, vector<128x128xbf16>, vector<16x128xf32> -> vector<16x128xf32>
    %133 = arith.addf %125, %132 : vector<16x128xf32>
    %c4_118 = arith.constant 4 : index
    %c0_119 = arith.constant 0 : index
    %c0_120 = arith.constant 0 : index
    %134 = vector.load %arg11[%c4_118, %c0_119, %c0_120] : memref<9x16x64xbf16, #tpu.memory_space<vmem>>, vector<1x16x64xbf16>
    %135 = vector.shape_cast %134 : vector<1x16x64xbf16> to vector<16x64xbf16>
    %cst_121 = arith.constant dense<0.000000e+00> : vector<16x128xf32>
    %136 = tpu.matmul %135, %102, %cst_121 {dimension_numbers = #tpu.dot_dimension_numbers<[1], [0], [0], [1], [0, 0, 1, 1], [], []>} : vector<16x64xbf16>, vector<64x128xbf16>, vector<16x128xf32> -> vector<16x128xf32>
    %137 = arith.truncf %136 : vector<16x128xf32> to vector<16x128xbf16>
    %c4_122 = arith.constant 4 : index
    %c0_123 = arith.constant 0 : index
    %c0_124 = arith.constant 0 : index
    %138 = vector.load %arg12[%c4_122, %c0_123, %c0_124] : memref<9x128x128xbf16, #tpu.memory_space<vmem>>, vector<1x128x128xbf16>
    %139 = vector.shape_cast %138 : vector<1x128x128xbf16> to vector<128x128xbf16>
    %cst_125 = arith.constant dense<0.000000e+00> : vector<16x128xf32>
    %140 = tpu.matmul %137, %139, %cst_125 {dimension_numbers = #tpu.dot_dimension_numbers<[1], [0], [0], [1], [0, 0, 1, 1], [], []>} : vector<16x128xbf16>, vector<128x128xbf16>, vector<16x128xf32> -> vector<16x128xf32>
    %141 = arith.addf %133, %140 : vector<16x128xf32>
    %c5_126 = arith.constant 5 : index
    %c0_127 = arith.constant 0 : index
    %c0_128 = arith.constant 0 : index
    %142 = vector.load %arg11[%c5_126, %c0_127, %c0_128] : memref<9x16x64xbf16, #tpu.memory_space<vmem>>, vector<1x16x64xbf16>
    %143 = vector.shape_cast %142 : vector<1x16x64xbf16> to vector<16x64xbf16>
    %cst_129 = arith.constant dense<0.000000e+00> : vector<16x128xf32>
    %144 = tpu.matmul %143, %102, %cst_129 {dimension_numbers = #tpu.dot_dimension_numbers<[1], [0], [0], [1], [0, 0, 1, 1], [], []>} : vector<16x64xbf16>, vector<64x128xbf16>, vector<16x128xf32> -> vector<16x128xf32>
    %145 = arith.truncf %144 : vector<16x128xf32> to vector<16x128xbf16>
    %c5_130 = arith.constant 5 : index
    %c0_131 = arith.constant 0 : index
    %c0_132 = arith.constant 0 : index
    %146 = vector.load %arg12[%c5_130, %c0_131, %c0_132] : memref<9x128x128xbf16, #tpu.memory_space<vmem>>, vector<1x128x128xbf16>
    %147 = vector.shape_cast %146 : vector<1x128x128xbf16> to vector<128x128xbf16>
    %cst_133 = arith.constant dense<0.000000e+00> : vector<16x128xf32>
    %148 = tpu.matmul %145, %147, %cst_133 {dimension_numbers = #tpu.dot_dimension_numbers<[1], [0], [0], [1], [0, 0, 1, 1], [], []>} : vector<16x128xbf16>, vector<128x128xbf16>, vector<16x128xf32> -> vector<16x128xf32>
    %149 = arith.addf %141, %148 : vector<16x128xf32>
    %c6_134 = arith.constant 6 : index
    %c0_135 = arith.constant 0 : index
    %c0_136 = arith.constant 0 : index
    %150 = vector.load %arg11[%c6_134, %c0_135, %c0_136] : memref<9x16x64xbf16, #tpu.memory_space<vmem>>, vector<1x16x64xbf16>
    %151 = vector.shape_cast %150 : vector<1x16x64xbf16> to vector<16x64xbf16>
    %cst_137 = arith.constant dense<0.000000e+00> : vector<16x128xf32>
    %152 = tpu.matmul %151, %102, %cst_137 {dimension_numbers = #tpu.dot_dimension_numbers<[1], [0], [0], [1], [0, 0, 1, 1], [], []>} : vector<16x64xbf16>, vector<64x128xbf16>, vector<16x128xf32> -> vector<16x128xf32>
    %153 = arith.truncf %152 : vector<16x128xf32> to vector<16x128xbf16>
    %c6_138 = arith.constant 6 : index
    %c0_139 = arith.constant 0 : index
    %c0_140 = arith.constant 0 : index
    %154 = vector.load %arg12[%c6_138, %c0_139, %c0_140] : memref<9x128x128xbf16, #tpu.memory_space<vmem>>, vector<1x128x128xbf16>
    %155 = vector.shape_cast %154 : vector<1x128x128xbf16> to vector<128x128xbf16>
    %cst_141 = arith.constant dense<0.000000e+00> : vector<16x128xf32>
    %156 = tpu.matmul %153, %155, %cst_141 {dimension_numbers = #tpu.dot_dimension_numbers<[1], [0], [0], [1], [0, 0, 1, 1], [], []>} : vector<16x128xbf16>, vector<128x128xbf16>, vector<16x128xf32> -> vector<16x128xf32>
    %157 = arith.addf %149, %156 : vector<16x128xf32>
    %c7_142 = arith.constant 7 : index
    %c0_143 = arith.constant 0 : index
    %c0_144 = arith.constant 0 : index
    %158 = vector.load %arg11[%c7_142, %c0_143, %c0_144] : memref<9x16x64xbf16, #tpu.memory_space<vmem>>, vector<1x16x64xbf16>
    %159 = vector.shape_cast %158 : vector<1x16x64xbf16> to vector<16x64xbf16>
    %cst_145 = arith.constant dense<0.000000e+00> : vector<16x128xf32>
    %160 = tpu.matmul %159, %102, %cst_145 {dimension_numbers = #tpu.dot_dimension_numbers<[1], [0], [0], [1], [0, 0, 1, 1], [], []>} : vector<16x64xbf16>, vector<64x128xbf16>, vector<16x128xf32> -> vector<16x128xf32>
    %161 = arith.truncf %160 : vector<16x128xf32> to vector<16x128xbf16>
    %c7_146 = arith.constant 7 : index
    %c0_147 = arith.constant 0 : index
    %c0_148 = arith.constant 0 : index
    %162 = vector.load %arg12[%c7_146, %c0_147, %c0_148] : memref<9x128x128xbf16, #tpu.memory_space<vmem>>, vector<1x128x128xbf16>
    %163 = vector.shape_cast %162 : vector<1x128x128xbf16> to vector<128x128xbf16>
    %cst_149 = arith.constant dense<0.000000e+00> : vector<16x128xf32>
    %164 = tpu.matmul %161, %163, %cst_149 {dimension_numbers = #tpu.dot_dimension_numbers<[1], [0], [0], [1], [0, 0, 1, 1], [], []>} : vector<16x128xbf16>, vector<128x128xbf16>, vector<16x128xf32> -> vector<16x128xf32>
    %165 = arith.addf %157, %164 : vector<16x128xf32>
    %c8_150 = arith.constant 8 : index
    %c0_151 = arith.constant 0 : index
    %c0_152 = arith.constant 0 : index
    %166 = vector.load %arg11[%c8_150, %c0_151, %c0_152] : memref<9x16x64xbf16, #tpu.memory_space<vmem>>, vector<1x16x64xbf16>
    %167 = vector.shape_cast %166 : vector<1x16x64xbf16> to vector<16x64xbf16>
    %cst_153 = arith.constant dense<0.000000e+00> : vector<16x128xf32>
    %168 = tpu.matmul %167, %102, %cst_153 {dimension_numbers = #tpu.dot_dimension_numbers<[1], [0], [0], [1], [0, 0, 1, 1], [], []>} : vector<16x64xbf16>, vector<64x128xbf16>, vector<16x128xf32> -> vector<16x128xf32>
    %169 = arith.truncf %168 : vector<16x128xf32> to vector<16x128xbf16>
    %c8_154 = arith.constant 8 : index
    %c0_155 = arith.constant 0 : index
    %c0_156 = arith.constant 0 : index
    %170 = vector.load %arg12[%c8_154, %c0_155, %c0_156] : memref<9x128x128xbf16, #tpu.memory_space<vmem>>, vector<1x128x128xbf16>
    %171 = vector.shape_cast %170 : vector<1x128x128xbf16> to vector<128x128xbf16>
    %cst_157 = arith.constant dense<0.000000e+00> : vector<16x128xf32>
    %172 = tpu.matmul %169, %171, %cst_157 {dimension_numbers = #tpu.dot_dimension_numbers<[1], [0], [0], [1], [0, 0, 1, 1], [], []>} : vector<16x128xbf16>, vector<128x128xbf16>, vector<16x128xf32> -> vector<16x128xf32>
    %173 = arith.addf %165, %172 : vector<16x128xf32>
    %c0_158 = arith.constant 0 : index
    %c0_159 = arith.constant 0 : index
    %174 = vector.load %arg13[%c0_158, %c0_159] : memref<1x128xf32, #tpu.memory_space<vmem>>, vector<1x128xf32>
    %175 = vector.broadcast %174 : vector<1x128xf32> to vector<16x128xf32>
    %176 = arith.addf %173, %175 : vector<16x128xf32>
    %cst_160 = arith.constant 0.000000e+00 : f32
    %177 = vector.broadcast %cst_160 : f32 to vector<16x128xf32>
    %178 = arith.maximumf %176, %177 : vector<16x128xf32>
    %179 = arith.truncf %178 : vector<16x128xf32> to vector<16x128xbf16>
    %c0_161 = arith.constant 0 : index
    %c0_162 = arith.constant 0 : index
    %180 = vector.load %arg14[%c0_161, %c0_162] : memref<128x256xbf16, #tpu.memory_space<vmem>>, vector<128x256xbf16>
    %cst_163 = arith.constant dense<0.000000e+00> : vector<16x256xf32>
    %181 = tpu.matmul %179, %180, %cst_163 {dimension_numbers = #tpu.dot_dimension_numbers<[1], [0], [0], [1], [0, 0, 1, 1], [], []>} : vector<16x128xbf16>, vector<128x256xbf16>, vector<16x256xf32> -> vector<16x256xf32>
    %c0_164 = arith.constant 0 : index
    %c0_165 = arith.constant 0 : index
    %182 = vector.load %arg15[%c0_164, %c0_165] : memref<1x256xf32, #tpu.memory_space<vmem>>, vector<1x256xf32>
    %183 = vector.broadcast %182 : vector<1x256xf32> to vector<16x256xf32>
    %184 = arith.addf %181, %183 : vector<16x256xf32>
    %cst_166 = arith.constant 0.000000e+00 : f32
    %185 = vector.broadcast %cst_166 : f32 to vector<16x256xf32>
    %186 = arith.maximumf %184, %185 : vector<16x256xf32>
    %187 = arith.truncf %186 : vector<16x256xf32> to vector<16x256xbf16>
    %c0_167 = arith.constant 0 : index
    %c0_168 = arith.constant 0 : index
    %c0_169 = arith.constant 0 : index
    %188 = vector.load %arg16[%c0_167, %c0_168, %c0_169] : memref<9x4x16xbf16, #tpu.memory_space<vmem>>, vector<1x4x16xbf16>
    %189 = vector.shape_cast %188 : vector<1x4x16xbf16> to vector<4x16xbf16>
    %cst_170 = arith.constant dense<0.000000e+00> : vector<4x256xf32>
    %190 = tpu.matmul %189, %187, %cst_170 {dimension_numbers = #tpu.dot_dimension_numbers<[1], [0], [0], [1], [0, 0, 1, 1], [], []>} : vector<4x16xbf16>, vector<16x256xbf16>, vector<4x256xf32> -> vector<4x256xf32>
    %191 = arith.truncf %190 : vector<4x256xf32> to vector<4x256xbf16>
    %c0_171 = arith.constant 0 : index
    %c0_172 = arith.constant 0 : index
    %c0_173 = arith.constant 0 : index
    %192 = vector.load %arg17[%c0_171, %c0_172, %c0_173] : memref<9x256x256xbf16, #tpu.memory_space<vmem>>, vector<1x256x256xbf16>
    %193 = vector.shape_cast %192 : vector<1x256x256xbf16> to vector<256x256xbf16>
    %cst_174 = arith.constant dense<0.000000e+00> : vector<4x256xf32>
    %194 = tpu.matmul %191, %193, %cst_174 {dimension_numbers = #tpu.dot_dimension_numbers<[1], [0], [0], [1], [0, 0, 1, 1], [], []>} : vector<4x256xbf16>, vector<256x256xbf16>, vector<4x256xf32> -> vector<4x256xf32>
    %c1_175 = arith.constant 1 : index
    %c0_176 = arith.constant 0 : index
    %c0_177 = arith.constant 0 : index
    %195 = vector.load %arg16[%c1_175, %c0_176, %c0_177] : memref<9x4x16xbf16, #tpu.memory_space<vmem>>, vector<1x4x16xbf16>
    %196 = vector.shape_cast %195 : vector<1x4x16xbf16> to vector<4x16xbf16>
    %cst_178 = arith.constant dense<0.000000e+00> : vector<4x256xf32>
    %197 = tpu.matmul %196, %187, %cst_178 {dimension_numbers = #tpu.dot_dimension_numbers<[1], [0], [0], [1], [0, 0, 1, 1], [], []>} : vector<4x16xbf16>, vector<16x256xbf16>, vector<4x256xf32> -> vector<4x256xf32>
    %198 = arith.truncf %197 : vector<4x256xf32> to vector<4x256xbf16>
    %c1_179 = arith.constant 1 : index
    %c0_180 = arith.constant 0 : index
    %c0_181 = arith.constant 0 : index
    %199 = vector.load %arg17[%c1_179, %c0_180, %c0_181] : memref<9x256x256xbf16, #tpu.memory_space<vmem>>, vector<1x256x256xbf16>
    %200 = vector.shape_cast %199 : vector<1x256x256xbf16> to vector<256x256xbf16>
    %cst_182 = arith.constant dense<0.000000e+00> : vector<4x256xf32>
    %201 = tpu.matmul %198, %200, %cst_182 {dimension_numbers = #tpu.dot_dimension_numbers<[1], [0], [0], [1], [0, 0, 1, 1], [], []>} : vector<4x256xbf16>, vector<256x256xbf16>, vector<4x256xf32> -> vector<4x256xf32>
    %202 = arith.addf %194, %201 : vector<4x256xf32>
    %c2_183 = arith.constant 2 : index
    %c0_184 = arith.constant 0 : index
    %c0_185 = arith.constant 0 : index
    %203 = vector.load %arg16[%c2_183, %c0_184, %c0_185] : memref<9x4x16xbf16, #tpu.memory_space<vmem>>, vector<1x4x16xbf16>
    %204 = vector.shape_cast %203 : vector<1x4x16xbf16> to vector<4x16xbf16>
    %cst_186 = arith.constant dense<0.000000e+00> : vector<4x256xf32>
    %205 = tpu.matmul %204, %187, %cst_186 {dimension_numbers = #tpu.dot_dimension_numbers<[1], [0], [0], [1], [0, 0, 1, 1], [], []>} : vector<4x16xbf16>, vector<16x256xbf16>, vector<4x256xf32> -> vector<4x256xf32>
    %206 = arith.truncf %205 : vector<4x256xf32> to vector<4x256xbf16>
    %c2_187 = arith.constant 2 : index
    %c0_188 = arith.constant 0 : index
    %c0_189 = arith.constant 0 : index
    %207 = vector.load %arg17[%c2_187, %c0_188, %c0_189] : memref<9x256x256xbf16, #tpu.memory_space<vmem>>, vector<1x256x256xbf16>
    %208 = vector.shape_cast %207 : vector<1x256x256xbf16> to vector<256x256xbf16>
    %cst_190 = arith.constant dense<0.000000e+00> : vector<4x256xf32>
    %209 = tpu.matmul %206, %208, %cst_190 {dimension_numbers = #tpu.dot_dimension_numbers<[1], [0], [0], [1], [0, 0, 1, 1], [], []>} : vector<4x256xbf16>, vector<256x256xbf16>, vector<4x256xf32> -> vector<4x256xf32>
    %210 = arith.addf %202, %209 : vector<4x256xf32>
    %c3_191 = arith.constant 3 : index
    %c0_192 = arith.constant 0 : index
    %c0_193 = arith.constant 0 : index
    %211 = vector.load %arg16[%c3_191, %c0_192, %c0_193] : memref<9x4x16xbf16, #tpu.memory_space<vmem>>, vector<1x4x16xbf16>
    %212 = vector.shape_cast %211 : vector<1x4x16xbf16> to vector<4x16xbf16>
    %cst_194 = arith.constant dense<0.000000e+00> : vector<4x256xf32>
    %213 = tpu.matmul %212, %187, %cst_194 {dimension_numbers = #tpu.dot_dimension_numbers<[1], [0], [0], [1], [0, 0, 1, 1], [], []>} : vector<4x16xbf16>, vector<16x256xbf16>, vector<4x256xf32> -> vector<4x256xf32>
    %214 = arith.truncf %213 : vector<4x256xf32> to vector<4x256xbf16>
    %c3_195 = arith.constant 3 : index
    %c0_196 = arith.constant 0 : index
    %c0_197 = arith.constant 0 : index
    %215 = vector.load %arg17[%c3_195, %c0_196, %c0_197] : memref<9x256x256xbf16, #tpu.memory_space<vmem>>, vector<1x256x256xbf16>
    %216 = vector.shape_cast %215 : vector<1x256x256xbf16> to vector<256x256xbf16>
    %cst_198 = arith.constant dense<0.000000e+00> : vector<4x256xf32>
    %217 = tpu.matmul %214, %216, %cst_198 {dimension_numbers = #tpu.dot_dimension_numbers<[1], [0], [0], [1], [0, 0, 1, 1], [], []>} : vector<4x256xbf16>, vector<256x256xbf16>, vector<4x256xf32> -> vector<4x256xf32>
    %218 = arith.addf %210, %217 : vector<4x256xf32>
    %c4_199 = arith.constant 4 : index
    %c0_200 = arith.constant 0 : index
    %c0_201 = arith.constant 0 : index
    %219 = vector.load %arg16[%c4_199, %c0_200, %c0_201] : memref<9x4x16xbf16, #tpu.memory_space<vmem>>, vector<1x4x16xbf16>
    %220 = vector.shape_cast %219 : vector<1x4x16xbf16> to vector<4x16xbf16>
    %cst_202 = arith.constant dense<0.000000e+00> : vector<4x256xf32>
    %221 = tpu.matmul %220, %187, %cst_202 {dimension_numbers = #tpu.dot_dimension_numbers<[1], [0], [0], [1], [0, 0, 1, 1], [], []>} : vector<4x16xbf16>, vector<16x256xbf16>, vector<4x256xf32> -> vector<4x256xf32>
    %222 = arith.truncf %221 : vector<4x256xf32> to vector<4x256xbf16>
    %c4_203 = arith.constant 4 : index
    %c0_204 = arith.constant 0 : index
    %c0_205 = arith.constant 0 : index
    %223 = vector.load %arg17[%c4_203, %c0_204, %c0_205] : memref<9x256x256xbf16, #tpu.memory_space<vmem>>, vector<1x256x256xbf16>
    %224 = vector.shape_cast %223 : vector<1x256x256xbf16> to vector<256x256xbf16>
    %cst_206 = arith.constant dense<0.000000e+00> : vector<4x256xf32>
    %225 = tpu.matmul %222, %224, %cst_206 {dimension_numbers = #tpu.dot_dimension_numbers<[1], [0], [0], [1], [0, 0, 1, 1], [], []>} : vector<4x256xbf16>, vector<256x256xbf16>, vector<4x256xf32> -> vector<4x256xf32>
    %226 = arith.addf %218, %225 : vector<4x256xf32>
    %c5_207 = arith.constant 5 : index
    %c0_208 = arith.constant 0 : index
    %c0_209 = arith.constant 0 : index
    %227 = vector.load %arg16[%c5_207, %c0_208, %c0_209] : memref<9x4x16xbf16, #tpu.memory_space<vmem>>, vector<1x4x16xbf16>
    %228 = vector.shape_cast %227 : vector<1x4x16xbf16> to vector<4x16xbf16>
    %cst_210 = arith.constant dense<0.000000e+00> : vector<4x256xf32>
    %229 = tpu.matmul %228, %187, %cst_210 {dimension_numbers = #tpu.dot_dimension_numbers<[1], [0], [0], [1], [0, 0, 1, 1], [], []>} : vector<4x16xbf16>, vector<16x256xbf16>, vector<4x256xf32> -> vector<4x256xf32>
    %230 = arith.truncf %229 : vector<4x256xf32> to vector<4x256xbf16>
    %c5_211 = arith.constant 5 : index
    %c0_212 = arith.constant 0 : index
    %c0_213 = arith.constant 0 : index
    %231 = vector.load %arg17[%c5_211, %c0_212, %c0_213] : memref<9x256x256xbf16, #tpu.memory_space<vmem>>, vector<1x256x256xbf16>
    %232 = vector.shape_cast %231 : vector<1x256x256xbf16> to vector<256x256xbf16>
    %cst_214 = arith.constant dense<0.000000e+00> : vector<4x256xf32>
    %233 = tpu.matmul %230, %232, %cst_214 {dimension_numbers = #tpu.dot_dimension_numbers<[1], [0], [0], [1], [0, 0, 1, 1], [], []>} : vector<4x256xbf16>, vector<256x256xbf16>, vector<4x256xf32> -> vector<4x256xf32>
    %234 = arith.addf %226, %233 : vector<4x256xf32>
    %c6_215 = arith.constant 6 : index
    %c0_216 = arith.constant 0 : index
    %c0_217 = arith.constant 0 : index
    %235 = vector.load %arg16[%c6_215, %c0_216, %c0_217] : memref<9x4x16xbf16, #tpu.memory_space<vmem>>, vector<1x4x16xbf16>
    %236 = vector.shape_cast %235 : vector<1x4x16xbf16> to vector<4x16xbf16>
    %cst_218 = arith.constant dense<0.000000e+00> : vector<4x256xf32>
    %237 = tpu.matmul %236, %187, %cst_218 {dimension_numbers = #tpu.dot_dimension_numbers<[1], [0], [0], [1], [0, 0, 1, 1], [], []>} : vector<4x16xbf16>, vector<16x256xbf16>, vector<4x256xf32> -> vector<4x256xf32>
    %238 = arith.truncf %237 : vector<4x256xf32> to vector<4x256xbf16>
    %c6_219 = arith.constant 6 : index
    %c0_220 = arith.constant 0 : index
    %c0_221 = arith.constant 0 : index
    %239 = vector.load %arg17[%c6_219, %c0_220, %c0_221] : memref<9x256x256xbf16, #tpu.memory_space<vmem>>, vector<1x256x256xbf16>
    %240 = vector.shape_cast %239 : vector<1x256x256xbf16> to vector<256x256xbf16>
    %cst_222 = arith.constant dense<0.000000e+00> : vector<4x256xf32>
    %241 = tpu.matmul %238, %240, %cst_222 {dimension_numbers = #tpu.dot_dimension_numbers<[1], [0], [0], [1], [0, 0, 1, 1], [], []>} : vector<4x256xbf16>, vector<256x256xbf16>, vector<4x256xf32> -> vector<4x256xf32>
    %242 = arith.addf %234, %241 : vector<4x256xf32>
    %c7_223 = arith.constant 7 : index
    %c0_224 = arith.constant 0 : index
    %c0_225 = arith.constant 0 : index
    %243 = vector.load %arg16[%c7_223, %c0_224, %c0_225] : memref<9x4x16xbf16, #tpu.memory_space<vmem>>, vector<1x4x16xbf16>
    %244 = vector.shape_cast %243 : vector<1x4x16xbf16> to vector<4x16xbf16>
    %cst_226 = arith.constant dense<0.000000e+00> : vector<4x256xf32>
    %245 = tpu.matmul %244, %187, %cst_226 {dimension_numbers = #tpu.dot_dimension_numbers<[1], [0], [0], [1], [0, 0, 1, 1], [], []>} : vector<4x16xbf16>, vector<16x256xbf16>, vector<4x256xf32> -> vector<4x256xf32>
    %246 = arith.truncf %245 : vector<4x256xf32> to vector<4x256xbf16>
    %c7_227 = arith.constant 7 : index
    %c0_228 = arith.constant 0 : index
    %c0_229 = arith.constant 0 : index
    %247 = vector.load %arg17[%c7_227, %c0_228, %c0_229] : memref<9x256x256xbf16, #tpu.memory_space<vmem>>, vector<1x256x256xbf16>
    %248 = vector.shape_cast %247 : vector<1x256x256xbf16> to vector<256x256xbf16>
    %cst_230 = arith.constant dense<0.000000e+00> : vector<4x256xf32>
    %249 = tpu.matmul %246, %248, %cst_230 {dimension_numbers = #tpu.dot_dimension_numbers<[1], [0], [0], [1], [0, 0, 1, 1], [], []>} : vector<4x256xbf16>, vector<256x256xbf16>, vector<4x256xf32> -> vector<4x256xf32>
    %250 = arith.addf %242, %249 : vector<4x256xf32>
    %c8_231 = arith.constant 8 : index
    %c0_232 = arith.constant 0 : index
    %c0_233 = arith.constant 0 : index
    %251 = vector.load %arg16[%c8_231, %c0_232, %c0_233] : memref<9x4x16xbf16, #tpu.memory_space<vmem>>, vector<1x4x16xbf16>
    %252 = vector.shape_cast %251 : vector<1x4x16xbf16> to vector<4x16xbf16>
    %cst_234 = arith.constant dense<0.000000e+00> : vector<4x256xf32>
    %253 = tpu.matmul %252, %187, %cst_234 {dimension_numbers = #tpu.dot_dimension_numbers<[1], [0], [0], [1], [0, 0, 1, 1], [], []>} : vector<4x16xbf16>, vector<16x256xbf16>, vector<4x256xf32> -> vector<4x256xf32>
    %254 = arith.truncf %253 : vector<4x256xf32> to vector<4x256xbf16>
    %c8_235 = arith.constant 8 : index
    %c0_236 = arith.constant 0 : index
    %c0_237 = arith.constant 0 : index
    %255 = vector.load %arg17[%c8_235, %c0_236, %c0_237] : memref<9x256x256xbf16, #tpu.memory_space<vmem>>, vector<1x256x256xbf16>
    %256 = vector.shape_cast %255 : vector<1x256x256xbf16> to vector<256x256xbf16>
    %cst_238 = arith.constant dense<0.000000e+00> : vector<4x256xf32>
    %257 = tpu.matmul %254, %256, %cst_238 {dimension_numbers = #tpu.dot_dimension_numbers<[1], [0], [0], [1], [0, 0, 1, 1], [], []>} : vector<4x256xbf16>, vector<256x256xbf16>, vector<4x256xf32> -> vector<4x256xf32>
    %258 = arith.addf %250, %257 : vector<4x256xf32>
    %c0_239 = arith.constant 0 : index
    %c0_240 = arith.constant 0 : index
    %259 = vector.load %arg18[%c0_239, %c0_240] : memref<1x256xf32, #tpu.memory_space<vmem>>, vector<1x256xf32>
    %260 = vector.broadcast %259 : vector<1x256xf32> to vector<4x256xf32>
    %261 = arith.addf %258, %260 : vector<4x256xf32>
    %cst_241 = arith.constant 0.000000e+00 : f32
    %262 = vector.broadcast %cst_241 : f32 to vector<4x256xf32>
    %263 = arith.maximumf %261, %262 : vector<4x256xf32>
    %264 = arith.truncf %263 : vector<4x256xf32> to vector<4x256xbf16>
    %c0_242 = arith.constant 0 : index
    %c0_243 = arith.constant 0 : index
    %265 = vector.load %arg19[%c0_242, %c0_243] : memref<256x512xbf16, #tpu.memory_space<vmem>>, vector<256x512xbf16>
    %cst_244 = arith.constant dense<0.000000e+00> : vector<4x512xf32>
    %266 = tpu.matmul %264, %265, %cst_244 {dimension_numbers = #tpu.dot_dimension_numbers<[1], [0], [0], [1], [0, 0, 1, 1], [], []>} : vector<4x256xbf16>, vector<256x512xbf16>, vector<4x512xf32> -> vector<4x512xf32>
    %c0_245 = arith.constant 0 : index
    %c0_246 = arith.constant 0 : index
    %267 = vector.load %arg20[%c0_245, %c0_246] : memref<1x512xf32, #tpu.memory_space<vmem>>, vector<1x512xf32>
    %268 = vector.broadcast %267 : vector<1x512xf32> to vector<4x512xf32>
    %269 = arith.addf %266, %268 : vector<4x512xf32>
    %cst_247 = arith.constant 0.000000e+00 : f32
    %270 = vector.broadcast %cst_247 : f32 to vector<4x512xf32>
    %271 = arith.maximumf %269, %270 : vector<4x512xf32>
    %272 = arith.truncf %271 : vector<4x512xf32> to vector<4x512xbf16>
    %c0_248 = arith.constant 0 : index
    %c0_249 = arith.constant 0 : index
    %273 = vector.load %arg21[%c0_248, %c0_249] : memref<512x128xbf16, #tpu.memory_space<vmem>>, vector<512x128xbf16>
    %cst_250 = arith.constant dense<0.000000e+00> : vector<4x128xf32>
    %274 = tpu.matmul %272, %273, %cst_250 {dimension_numbers = #tpu.dot_dimension_numbers<[1], [0], [0], [1], [0, 0, 1, 1], [], []>} : vector<4x512xbf16>, vector<512x128xbf16>, vector<4x128xf32> -> vector<4x128xf32>
    %c0_251 = arith.constant 0 : index
    %c0_252 = arith.constant 0 : index
    %275 = vector.load %arg22[%c0_251, %c0_252] : memref<1x128xf32, #tpu.memory_space<vmem>>, vector<1x128xf32>
    %276 = vector.broadcast %275 : vector<1x128xf32> to vector<4x128xf32>
    %277 = arith.addf %274, %276 : vector<4x128xf32>
    %cst_253 = arith.constant dense<0.000000e+00> : vector<128xf32>
    %278 = vector.multi_reduction <add>, %277, %cst_253 [0] : vector<4x128xf32> to vector<128xf32>
    %279 = vector.shape_cast %278 : vector<128xf32> to vector<1x128xf32>
    %cst_254 = arith.constant 2.500000e-01 : f32
    %280 = vector.broadcast %cst_254 : f32 to vector<1x128xf32>
    %281 = arith.mulf %279, %280 : vector<1x128xf32>
    %282 = vector.shape_cast %281 : vector<1x128xf32> to vector<1x128xf32>
    %283 = vector.broadcast %282 : vector<1x128xf32> to vector<8x128xf32>
    %c0_255 = arith.constant 0 : index
    %c0_256 = arith.constant 0 : index
    %c0_257 = arith.constant 0 : index
    %284 = vector.load %arg23[%c0_255, %c0_256, %c0_257] : memref<1x8x128xf32, #tpu.memory_space<vmem>>, vector<1x8x128xf32>
    %285 = vector.shape_cast %284 : vector<1x8x128xf32> to vector<8x128xf32>
    %286 = vector.shape_cast %283 : vector<8x128xf32> to vector<1x8x128xf32>
    tpu.vector_store %arg23[%c0_255, %c0_256, %c0_257], %286 {strides = array<i32>} : memref<1x8x128xf32, #tpu.memory_space<vmem>>, vector<1x8x128xf32>,
    return
  }
  func.func @transform_0(%arg0: i32) -> (i32, i32, i32) {
    %c0_i32 = arith.constant 0 : i32
    %c0_i32_0 = arith.constant 0 : i32
    %c0_i32_1 = arith.constant 0 : i32
    return %arg0, %c0_i32, %c0_i32_0 : i32, i32, i32
  }
  func.func @transform_1(%arg0: i32) -> (i32, i32) {
    %c0_i32 = arith.constant 0 : i32
    %c0_i32_0 = arith.constant 0 : i32
    %c0_i32_1 = arith.constant 0 : i32
    return %c0_i32, %c0_i32_0 : i32, i32
  }
  func.func @transform_2(%arg0: i32) -> (i32, i32) {
    %c0_i32 = arith.constant 0 : i32
    %c0_i32_0 = arith.constant 0 : i32
    %c0_i32_1 = arith.constant 0 : i32
    return %c0_i32, %c0_i32_0 : i32, i32
  }
  func.func @transform_3(%arg0: i32) -> (i32, i32) {
    %c0_i32 = arith.constant 0 : i32
    %c0_i32_0 = arith.constant 0 : i32
    %c0_i32_1 = arith.constant 0 : i32
    return %c0_i32, %c0_i32_0 : i32, i32
  }
  func.func @transform_4(%arg0: i32) -> (i32, i32) {
    %c0_i32 = arith.constant 0 : i32
    %c0_i32_0 = arith.constant 0 : i32
    %c0_i32_1 = arith.constant 0 : i32
    return %c0_i32, %c0_i32_0 : i32, i32
  }
  func.func @transform_5(%arg0: i32) -> (i32, i32, i32) {
    %c0_i32 = arith.constant 0 : i32
    %c0_i32_0 = arith.constant 0 : i32
    %c0_i32_1 = arith.constant 0 : i32
    %c0_i32_2 = arith.constant 0 : i32
    return %c0_i32, %c0_i32_0, %c0_i32_1 : i32, i32, i32
  }
  func.func @transform_6(%arg0: i32) -> (i32, i32, i32) {
    %c0_i32 = arith.constant 0 : i32
    %c0_i32_0 = arith.constant 0 : i32
    %c0_i32_1 = arith.constant 0 : i32
    %c0_i32_2 = arith.constant 0 : i32
    return %c0_i32, %c0_i32_0, %c0_i32_1 : i32, i32, i32
  }
  func.func @transform_7(%arg0: i32) -> (i32, i32) {
    %c0_i32 = arith.constant 0 : i32
    %c0_i32_0 = arith.constant 0 : i32
    %c0_i32_1 = arith.constant 0 : i32
    return %c0_i32, %c0_i32_0 : i32, i32
  }
  func.func @transform_8(%arg0: i32) -> (i32, i32) {
    %c0_i32 = arith.constant 0 : i32
    %c0_i32_0 = arith.constant 0 : i32
    %c0_i32_1 = arith.constant 0 : i32
    return %c0_i32, %c0_i32_0 : i32, i32
  }
  func.func @transform_9(%arg0: i32) -> (i32, i32) {
    %c0_i32 = arith.constant 0 : i32
    %c0_i32_0 = arith.constant 0 : i32
    %c0_i32_1 = arith.constant 0 : i32
    return %c0_i32, %c0_i32_0 : i32, i32
  }
  func.func @transform_10(%arg0: i32) -> (i32, i32, i32) {
    %c0_i32 = arith.constant 0 : i32
    %c0_i32_0 = arith.constant 0 : i32
    %c0_i32_1 = arith.constant 0 : i32
    %c0_i32_2 = arith.constant 0 : i32
    return %c0_i32, %c0_i32_0, %c0_i32_1 : i32, i32, i32
  }
  func.func @transform_11(%arg0: i32) -> (i32, i32, i32) {
    %c0_i32 = arith.constant 0 : i32
    %c0_i32_0 = arith.constant 0 : i32
    %c0_i32_1 = arith.constant 0 : i32
    %c0_i32_2 = arith.constant 0 : i32
    return %c0_i32, %c0_i32_0, %c0_i32_1 : i32, i32, i32
  }
  func.func @transform_12(%arg0: i32) -> (i32, i32) {
    %c0_i32 = arith.constant 0 : i32
    %c0_i32_0 = arith.constant 0 : i32
    %c0_i32_1 = arith.constant 0 : i32
    return %c0_i32, %c0_i32_0 : i32, i32
  }
  func.func @transform_13(%arg0: i32) -> (i32, i32) {
    %c0_i32 = arith.constant 0 : i32
    %c0_i32_0 = arith.constant 0 : i32
    %c0_i32_1 = arith.constant 0 : i32
    return %c0_i32, %c0_i32_0 : i32, i32
  }
  func.func @transform_14(%arg0: i32) -> (i32, i32) {
    %c0_i32 = arith.constant 0 : i32
    %c0_i32_0 = arith.constant 0 : i32
    %c0_i32_1 = arith.constant 0 : i32
    return %c0_i32, %c0_i32_0 : i32, i32
  }
  func.func @transform_15(%arg0: i32) -> (i32, i32, i32) {
    %c0_i32 = arith.constant 0 : i32
    %c0_i32_0 = arith.constant 0 : i32
    %c0_i32_1 = arith.constant 0 : i32
    %c0_i32_2 = arith.constant 0 : i32
    return %c0_i32, %c0_i32_0, %c0_i32_1 : i32, i32, i32
  }
  func.func @transform_16(%arg0: i32) -> (i32, i32, i32) {
    %c0_i32 = arith.constant 0 : i32
    %c0_i32_0 = arith.constant 0 : i32
    %c0_i32_1 = arith.constant 0 : i32
    %c0_i32_2 = arith.constant 0 : i32
    return %c0_i32, %c0_i32_0, %c0_i32_1 : i32, i32, i32
  }
  func.func @transform_17(%arg0: i32) -> (i32, i32) {
    %c0_i32 = arith.constant 0 : i32
    %c0_i32_0 = arith.constant 0 : i32
    %c0_i32_1 = arith.constant 0 : i32
    return %c0_i32, %c0_i32_0 : i32, i32
  }
  func.func @transform_18(%arg0: i32) -> (i32, i32) {
    %c0_i32 = arith.constant 0 : i32
    %c0_i32_0 = arith.constant 0 : i32
    %c0_i32_1 = arith.constant 0 : i32
    return %c0_i32, %c0_i32_0 : i32, i32
  }
  func.func @transform_19(%arg0: i32) -> (i32, i32) {
    %c0_i32 = arith.constant 0 : i32
    %c0_i32_0 = arith.constant 0 : i32
    %c0_i32_1 = arith.constant 0 : i32
    return %c0_i32, %c0_i32_0 : i32, i32
  }
  func.func @transform_20(%arg0: i32) -> (i32, i32) {
    %c0_i32 = arith.constant 0 : i32
    %c0_i32_0 = arith.constant 0 : i32
    %c0_i32_1 = arith.constant 0 : i32
    return %c0_i32, %c0_i32_0 : i32, i32
  }
  func.func @transform_21(%arg0: i32) -> (i32, i32) {
    %c0_i32 = arith.constant 0 : i32
    %c0_i32_0 = arith.constant 0 : i32
    %c0_i32_1 = arith.constant 0 : i32
    return %c0_i32, %c0_i32_0 : i32, i32
  }
  func.func @transform_22(%arg0: i32) -> (i32, i32, i32) {
    %c0_i32 = arith.constant 0 : i32
    %c0_i32_0 = arith.constant 0 : i32
    %c0_i32_1 = arith.constant 0 : i32
    return %arg0, %c0_i32, %c0_i32_0 : i32, i32, i32
  }
}

</mosaic_0001>

<bundles_post_ra>
// kernel: mobilenet_forward.1
= control target key start
LH: loop header
LB: loop body
LE: loop exit
PB: predicated region body
PF: predicated region fallthrough
CT: control target
= control target key end

     0   :  { %s15142_s0 = inlined_call_operand.vmem [shape: bf16[2,256,27], index: 0, kind: input, shape index: {}]   ;;  %s15143_s1 = inlined_call_operand.hbm [shape: bf16[27,32], index: 1, kind: input, shape index: {}]   ;;  %s15144_s2 = inlined_call_operand.vmem [shape: f32[1,32], index: 2, kind: input, shape index: {}]   ;;  %s15145_s3 = inlined_call_operand.hbm [shape: bf16[32,64], index: 3, kind: input, shape index: {}]   ;;  %s15146_s4 = inlined_call_operand.vmem [shape: f32[1,64], index: 4, kind: input, shape index: {}]   ;;  %s15147_s5 = inlined_call_operand.vmem [shape: bf16[9,64,256], index: 5, kind: input, shape index: {}]   ;;  %s15148_s6 = inlined_call_operand.vmem [shape: bf16[9,64,64], index: 6, kind: input, shape index: {}]   ;;  %s15149_s7 = inlined_call_operand.vmem [shape: f32[1,64], index: 7, kind: input, shape index: {}]   ;;  %s15150_s8 = inlined_call_operand.hbm [shape: bf16[64,128], index: 8, kind: input, shape index: {}]   ;;  %s15151_s9 = inlined_call_operand.vmem [shape: f32[1,128], index: 9, kind: input, shape index: {}]   ;;  %s15152_s10 = inlined_call_operand.hbm [shape: bf16[9,16,64], index: 10, kind: input, shape index: {}]   ;;  %s15153_s11 = inlined_call_operand.vmem [shape: bf16[9,128,128], index: 11, kind: input, shape index: {}]   ;;  %s15154_s12 = inlined_call_operand.vmem [shape: f32[1,128], index: 12, kind: input, shape index: {}]   ;;  %s15155_s13 = inlined_call_operand.hbm [shape: bf16[128,256], index: 13, kind: input, shape index: {}]   ;;  %s15156_s14 = inlined_call_operand.vmem [shape: f32[1,256], index: 14, kind: input, shape index: {}]   ;;  %s15157_s15 = inlined_call_operand.hbm [shape: bf16[9,4,16], index: 15, kind: input, shape index: {}]   ;;  %s15158_s16 = inlined_call_operand.vmem [shape: bf16[9,256,256], index: 16, kind: input, shape index: {}]   ;;  %s15159_s17 = inlined_call_operand.vmem [shape: f32[1,256], index: 17, kind: input, shape index: {}]   ;;  %s15160_s18 = inlined_call_operand.hbm [shape: bf16[256,512], index: 18, kind: input, shape index: {}]   ;;  %s15161_s19 = inlined_call_operand.vmem [shape: f32[1,512], index: 19, kind: input, shape index: {}]   ;;  %s15162_s20 = inlined_call_operand.hbm [shape: bf16[512,128], index: 20, kind: input, shape index: {}]   ;;  %s15163_s21 = inlined_call_operand.vmem [shape: f32[1,128], index: 21, kind: input, shape index: {}]   ;;  %s15164_s22 = inlined_call_operand.vmem [shape: f32[2,8,128], index: 22, kind: output, shape index: {}]  }
   0x1   :  { %15176 = sst [smem:[#allocation21_spill]] %s15142_s0 }
   0x2   :  { %15177 = sst [smem:[#allocation22_spill]] %s15143_s1 }
   0x3   :  { %15178 = sst [smem:[#allocation23_spill]] %s15144_s2 }
   0x4   :  { %15179 = sst [smem:[#allocation24_spill]] %s15145_s3 }
   0x5   :  { %15180 = sst [smem:[#allocation25_spill]] %s15146_s4 }
   0x6   :  { %15181 = sst [smem:[#allocation26_spill]] %s15147_s5 }
   0x7   :  { %15182 = sst [smem:[#allocation27_spill]] %s15148_s6 }
   0x8   :  { %15183 = sst [smem:[#allocation28_spill]] %s15150_s8 }
   0x9   :  { %15184 = sst [smem:[#allocation29_spill]] %s15152_s10 }
   0xa   :  { %15185 = sst [smem:[#allocation30_spill]] %s15157_s15 }
   0xb   :  { %15186 = sst [smem:[#allocation31_spill]] %s15159_s17 }
   0xc   :  { %15187 = sst [smem:[#allocation32_spill]] %s15161_s19 }
   0xd   :  { %15188 = sst [smem:[#allocation33_spill]] %s15163_s21 }
   0xe   :  { %15189 = sst [smem:[#allocation34_spill]] %s15164_s22 }
   0xf   :  { %27 = vsyncpa [#allocation3], 0 }
  0x10   :  { %28 = vsyncpa [#allocation5], 0 }
  0x11   :  { %29 = vsyncpa [#allocation8], 0 }
  0x12   :  { %30 = vsyncpa [#allocation11], 0 }
  0x13   :  { %31 = vsyncpa [#allocation14], 0  ;;  %s12703_s3 = smov 0  }
  0x14 LB: > { %15190 = sst [smem:[#allocation20_spill]] %s12566_s3  ;;  %s12709_s28 = sadd.s32 4294967295, %s12566_s3   ;;  %s12566_s3 = sphi %s12703_s3, %s37_s3  }
  0x15   : > { %p8906_p0 = scmp.ge.s32.totalorder %s12566_s3, 1  ;;  %p535_p1 = scmp.lt.s32.totalorder %s12566_s3, 3 }
  0x16   : > { %p15174_p2 = scmp.eq.s32.totalorder %s12709_s28, 0  ;;  %s12568_s30 = smov [#allocation4]  }
  0x17   : > { %p12714_p3 = pnand %p8906_p0, %p535_p1  ;;  %s563_s4 = sshll.u32 %s12568_s30, 4  ;;  %s12718_s4 = int_to_ptr.vmem [resolvable:$true] %s563_s4 }
  0x18   : > { %s12569_s0 = smov [#allocation7]   ;;  %s12570_s5 = smov [#allocation10]  }
  0x19   : > { %s15191_s29 = scalar_select %p12714_p3, 1, 0 }
  0x1a   : > { %p11414_p4 = pneg %p12714_p3  ;;  %s604_s23 = sshll.u32 %s12569_s0, 4  ;;  %s12722_s23 = int_to_ptr.vmem [resolvable:$true] %s604_s23 }
  0x1b   : > { %s639_s24 = sshll.u32 %s12570_s5, 4  ;;  %s15193_s26 = sld [smem:[#allocation24_spill]]  ;;  %s12730_s24 = int_to_ptr.vmem [resolvable:$true] %s639_s24 }
  0x1c   : > { %p12726_p5 = pnand %p15174_p2, %p11414_p4 }
  0x1e   : > { %p12740_p7 = pneg %p12726_p5 }
  0x21   : > { %s12316_s2 = scalar_lea.hbm %s15193_s26, 256 }
  0x22   : > { %p12317_p6 = scmp.ne.s32.totalorder %s15193_s26, %s12316_s2  ;;  %p12323_p10 = scmp.lt.u32.totalorder %s12316_s2, %s15193_s26 }
  0x24   : > { %p12319_p8 = pnand %p12740_p7, %p12317_p6 }
  0x26   : > { %p12320_p9 = pneg %p12319_p8 }
  0x28   : > { %p12325_p11 = pnand %p12323_p10, %p12320_p9 }
  0x2a   : > { %12328 = shalt.err (!%p12325_p11)
}
  0x2b   : > { %s12329_s6 = scalar_lea.vmem %s12718_s4, 256  ;;  %p12337_p1 = scmp.lt.s32.totalorder %s12718_s4, %s12718_s4 }
  0x2c   : > { %p12330_p12 = scmp.ne.s32.totalorder %s12718_s4, %s12329_s6  ;;  %p12338_p4 = scmp.lt.s32.totalorder %s12329_s6, %s12329_s6 }
  0x2e   : > { %p12332_p13 = pnand %p12330_p12, %p12740_p7  ;;  %p12339_p6 = por %p12338_p4, %p12337_p1 }
  0x30   : > { %p12333_p0 = pneg %p12332_p13 }
  0x32   : > { %p12340_p8 = pnand %p12339_p6, %p12333_p0 }
  0x34   : > { %12343 = shalt.err (!%p12340_p8)
}
  0x35   : > { %s15170_s25 = smov 64   ;;  %s15172_s3 = smov 4  }
  0x36   : > { %11420 = dma.hbm_to_vmem [thread:$0]  (!%p12726_p5), %s15193_s26, 256, %s12718_s4, [#allocation5], %s15170_s25, %s15170_s25, %s15172_s3  }
  0x37   : > { %s15195_s10 = sld [smem:[#allocation29_spill]] }
  0x3d   : > { %s12344_s6 = scalar_lea.hbm %s15195_s10, 1152 }
  0x3e   : > { %p12345_p9 = scmp.ne.s32.totalorder %s15195_s10, %s12344_s6  ;;  %p12351_p12 = scmp.lt.u32.totalorder %s12344_s6, %s15195_s10 }
  0x40   : > { %p12347_p10 = pnand %p12345_p9, %p12740_p7 }
  0x42   : > { %p12348_p11 = pneg %p12347_p10 }
  0x44   : > { %p12353_p13 = pnand %p12351_p12, %p12348_p11 }
  0x46   : > { %12356 = shalt.err (!%p12353_p13)
}
  0x47   : > { %s12357_s4 = scalar_lea.vmem %s12722_s23, 1152  ;;  %p12365_p6 = scmp.lt.s32.totalorder %s12722_s23, %s12722_s23 }
  0x48   : > { %p12358_p0 = scmp.ne.s32.totalorder %s12722_s23, %s12357_s4  ;;  %p12366_p8 = scmp.lt.s32.totalorder %s12357_s4, %s12357_s4 }
  0x4a   : > { %p12360_p1 = pnand %p12358_p0, %p12740_p7  ;;  %p12367_p9 = por %p12366_p8, %p12365_p6 }
  0x4c   : > { %p12361_p4 = pneg %p12360_p1 }
  0x4e   : > { %p12368_p10 = pnand %p12367_p9, %p12361_p4 }
  0x50   : > { %12371 = shalt.err (!%p12368_p10)
}
  0x51   : > { %11426 = dma.hbm_to_vmem [thread:$0]  (!%p12726_p5), %s15195_s10, 1152, %s12722_s23, [#allocation8], %s15170_s25, %s15170_s25, %s15172_s3  }
  0x52   : > { %s15196_s15 = sld [smem:[#allocation30_spill]] }
  0x58   : > { %s12372_s2 = scalar_lea.hbm %s15196_s15, 288 }
  0x59   : > { %p12373_p11 = scmp.ne.s32.totalorder %s15196_s15, %s12372_s2  ;;  %p12379_p0 = scmp.lt.u32.totalorder %s12372_s2, %s15196_s15 }
  0x5b   : > { %p12375_p12 = pnand %p12373_p11, %p12740_p7 }
  0x5d   : > { %p12376_p13 = pneg %p12375_p12 }
  0x5f   : > { %p12381_p1 = pnand %p12379_p0, %p12376_p13 }
  0x61   : > { %12384 = shalt.err (!%p12381_p1)
}
  0x62   : > { %s12385_s23 = scalar_lea.vmem %s12730_s24, 288  ;;  %p12393_p9 = scmp.lt.s32.totalorder %s12730_s24, %s12730_s24 }
  0x63   : > { %p12386_p4 = scmp.ne.s32.totalorder %s12730_s24, %s12385_s23  ;;  %p12394_p10 = scmp.lt.s32.totalorder %s12385_s23, %s12385_s23 }
  0x65   : > { %p12388_p6 = pnand %p12386_p4, %p12740_p7  ;;  %p12395_p11 = por %p12394_p10, %p12393_p9 }
  0x67   : > { %p12389_p8 = pneg %p12388_p6 }
  0x69   : > { %p12396_p12 = pnand %p12395_p11, %p12389_p8 }
  0x6b   : > { %12399 = shalt.err (!%p12396_p12)
}
  0x6c   : > { %s12573_s4 = smov 32   ;;  %s12574_s17 = smov 2  }
  0x6d   : > { %11432 = dma.hbm_to_vmem [thread:$0]  (!%p12726_p5), %s15196_s15, 288, %s12730_s24, [#allocation11], %s12573_s4, %s12573_s4, %s12574_s17  }
  0x6e   : > { %s12575_s22 = smov [#allocation2]   ;;  %s12576_s27 = smov [#allocation6]  }
  0x6f   : > { %s547_s2 = sshll.u32 %s12575_s22, 4  ;;  %s588_s30 = sshll.u32 %s12576_s27, 4  ;;  %s548_s2 = int_to_ptr.vmem [resolvable:$true] %s547_s2  ;;  %s12813_s30 = int_to_ptr.vmem [resolvable:$true] %s588_s30 }
  0x70   : > { %s15197_s23 = sld [smem:[#allocation22_spill]] }
  0x76   : > { %s12400_s25 = scalar_lea.hbm %s15197_s23, 256 }
  0x77   : > { %p12401_p13 = scmp.ne.s32.totalorder %s15197_s23, %s12400_s25  ;;  %p12407_p4 = scmp.lt.u32.totalorder %s12400_s25, %s15197_s23 }
  0x79   : > { %p12403_p0 = pnand %p12401_p13, %p12740_p7 }
  0x7b   : > { %p12404_p1 = pneg %p12403_p0 }
  0x7d   : > { %p12409_p6 = pnand %p12407_p4, %p12404_p1 }
  0x7f   : > { %12412 = shalt.err (!%p12409_p6)
}
  0x80   : > { %s12413_s4 = scalar_lea.vmem %s548_s2, 256  ;;  %p12421_p11 = scmp.lt.s32.totalorder %s548_s2, %s548_s2 }
  0x81   : > { %p12414_p8 = scmp.ne.s32.totalorder %s548_s2, %s12413_s4  ;;  %p12422_p12 = scmp.lt.s32.totalorder %s12413_s4, %s12413_s4 }
  0x83   : > { %p12416_p9 = pnand %p12414_p8, %p12740_p7  ;;  %p12423_p2 = por %p12422_p12, %p12421_p11 }
  0x85   : > { %p12417_p10 = pneg %p12416_p9 }
  0x87   : > { %p12424_p3 = pnand %p12423_p2, %p12417_p10 }
  0x89   : > { %12427 = shalt.err (!%p12424_p3)
}
  0x8a   : > { %s15198_s10 = smov 4   ;;  %s15199_s3 = smov 64  }
  0x8b   : > { %11417 = dma.hbm_to_vmem [thread:$0]  (!%p12726_p5), %s15197_s23, 256, %s548_s2, [#allocation3], %s15199_s3, %s15199_s3, %s15198_s10  }
  0x8c   : > { %s15200_s8 = sld [smem:[#allocation28_spill]] }
  0x92   : > { %s12428_s27 = scalar_lea.hbm %s15200_s8, 512 }
  0x93   : > { %p12429_p13 = scmp.ne.s32.totalorder %s15200_s8, %s12428_s27  ;;  %p12435_p0 = scmp.lt.u32.totalorder %s12428_s27, %s15200_s8 }
  0x95   : > { %p12431_p2 = pnand %p12429_p13, %p12740_p7 }
  0x97   : > { %p12432_p3 = pneg %p12431_p2 }
  0x99   : > { %p12437_p1 = pnand %p12435_p0, %p12432_p3 }
  0x9b   : > { %12440 = shalt.err (!%p12437_p1)
}
  0x9c   : > { %s12441_s2 = scalar_lea.vmem %s12813_s30, 512  ;;  %p12449_p9 = scmp.lt.s32.totalorder %s12813_s30, %s12813_s30 }
  0x9d   : > { %p12442_p4 = scmp.ne.s32.totalorder %s12813_s30, %s12441_s2  ;;  %p12450_p10 = scmp.lt.s32.totalorder %s12441_s2, %s12441_s2 }
  0x9f   : > { %p12444_p6 = pnand %p12442_p4, %p12740_p7  ;;  %p12451_p11 = por %p12450_p10, %p12449_p9 }
  0xa1   : > { %p12445_p8 = pneg %p12444_p6 }
  0xa3   : > { %p12452_p12 = pnand %p12451_p11, %p12445_p8 }
  0xa5   : > { %12455 = shalt.err (!%p12452_p12)
}
  0xa6   : > { %11423 = dma.hbm_to_vmem [thread:$0]  (!%p12726_p5), %s15200_s8, 512, %s12813_s30, [#allocation5], %s15199_s3, %s15199_s3, %s15198_s10  }
  0xa7   : > { %s12577_s25 = smov [#allocation9]   ;;  %s12456_s5 = scalar_lea.hbm %s15155_s13, 2048 }
  0xa8   : > { %s623_s21 = sshll.u32 %s12577_s25, 4  ;;  %p12457_p13 = scmp.ne.s32.totalorder %s15155_s13, %s12456_s5  ;;  %s624_s21 = int_to_ptr.vmem [resolvable:$true] %s623_s21 }
  0xa9   : > { %p12463_p0 = scmp.lt.u32.totalorder %s12456_s5, %s15155_s13 }
  0xaa   : > { %p12459_p2 = pnand %p12457_p13, %p12740_p7 }
  0xac   : > { %p12460_p3 = pneg %p12459_p2 }
  0xae   : > { %p12465_p1 = pnand %p12463_p0, %p12460_p3 }
  0xb0   : > { %12468 = shalt.err (!%p12465_p1)
}
  0xb1   : > { %s12469_s30 = scalar_lea.vmem %s624_s21, 2048  ;;  %p12477_p9 = scmp.lt.s32.totalorder %s624_s21, %s624_s21 }
  0xb2   : > { %p12470_p4 = scmp.ne.s32.totalorder %s624_s21, %s12469_s30  ;;  %p12478_p10 = scmp.lt.s32.totalorder %s12469_s30, %s12469_s30 }
  0xb4   : > { %p12472_p6 = pnand %p12470_p4, %p12740_p7  ;;  %p12479_p11 = por %p12478_p10, %p12477_p9 }
  0xb6   : > { %p12473_p8 = pneg %p12472_p6 }
  0xb8   : > { %p12480_p12 = pnand %p12479_p11, %p12473_p8 }
  0xba   : > { %12483 = shalt.err (!%p12480_p12)
}
  0xbb   : > { %s12578_s4 = smov 128   ;;  %s12579_s17 = smov 8  }
  0xbc   : > { %11429 = dma.hbm_to_vmem [thread:$0]  (!%p12726_p5), %s15155_s13, 2048, %s624_s21, [#allocation8], %s12578_s4, %s12578_s4, %s12579_s17  }
  0xbd   : > { %s12580_s27 = smov [#allocation12]   ;;  %s12484_s24 = scalar_lea.hbm %s15160_s18, 8192 }
  0xbe   : > { %s658_s5 = sshll.u32 %s12580_s27, 4  ;;  %p12485_p13 = scmp.ne.s32.totalorder %s15160_s18, %s12484_s24  ;;  %s659_s5 = int_to_ptr.vmem [resolvable:$true] %s658_s5 }
  0xbf   : > { %p12491_p0 = scmp.lt.u32.totalorder %s12484_s24, %s15160_s18 }
  0xc0   : > { %p12487_p2 = pnand %p12485_p13, %p12740_p7 }
  0xc2   : > { %p12488_p3 = pneg %p12487_p2 }
  0xc4   : > { %p12493_p1 = pnand %p12491_p0, %p12488_p3 }
  0xc6   : > { %12496 = shalt.err (!%p12493_p1)
}
  0xc7   : > { %s12497_s21 = scalar_lea.vmem %s659_s5, 8192  ;;  %p12505_p9 = scmp.lt.s32.totalorder %s659_s5, %s659_s5 }
  0xc8   : > { %p12498_p4 = scmp.ne.s32.totalorder %s659_s5, %s12497_s21  ;;  %p12506_p10 = scmp.lt.s32.totalorder %s12497_s21, %s12497_s21 }
  0xca   : > { %p12500_p6 = pnand %p12498_p4, %p12740_p7  ;;  %p12507_p11 = por %p12506_p10, %p12505_p9 }
  0xcc   : > { %p12501_p8 = pneg %p12500_p6 }
  0xce   : > { %p12508_p12 = pnand %p12507_p11, %p12501_p8 }
  0xd0   : > { %12511 = shalt.err (!%p12508_p12)
}
  0xd1   : > { %s12581_s4 = smov 256   ;;  %s12582_s17 = smov 16  }
  0xd2   : > { %11435 = dma.hbm_to_vmem [thread:$0]  (!%p12726_p5), %s15160_s18, 8192, %s659_s5, [#allocation11], %s12581_s4, %s12581_s4, %s12582_s17  }
  0xd3   : > { %s12583_s25 = smov [#allocation13]   ;;  %s12512_s19 = scalar_lea.hbm %s15162_s20, 4096 }
  0xd4   : > { %s674_s22 = sshll.u32 %s12583_s25, 4  ;;  %p12513_p13 = scmp.ne.s32.totalorder %s15162_s20, %s12512_s19  ;;  %s675_s22 = int_to_ptr.vmem [resolvable:$true] %s674_s22 }
  0xd5   : > { %p12519_p0 = scmp.lt.u32.totalorder %s12512_s19, %s15162_s20 }
  0xd6   : > { %p12515_p2 = pnand %p12513_p13, %p12740_p7 }
  0xd8   : > { %p12516_p3 = pneg %p12515_p2 }
  0xda   : > { %p12521_p1 = pnand %p12519_p0, %p12516_p3 }
  0xdc   : > { %12524 = shalt.err (!%p12521_p1)
}
  0xdd   : > { %s12525_s5 = scalar_lea.vmem %s675_s22, 4096  ;;  %p12533_p9 = scmp.lt.s32.totalorder %s675_s22, %s675_s22 }
  0xde   : > { %p12526_p4 = scmp.ne.s32.totalorder %s675_s22, %s12525_s5  ;;  %p12534_p10 = scmp.lt.s32.totalorder %s12525_s5, %s12525_s5 }
  0xe0   : > { %p12528_p6 = pnand %p12526_p4, %p12740_p7  ;;  %p12535_p11 = por %p12534_p10, %p12533_p9 }
  0xe2   : > { %p12529_p8 = pneg %p12528_p6 }
  0xe4   : > { %p12536_p12 = pnand %p12535_p11, %p12529_p8 }
  0xe6   : > { %12539 = shalt.err (!%p12536_p12)
}
  0xe7   : > { %11438 = dma.hbm_to_vmem [thread:$0]  (!%p12726_p5), %s15162_s20, 4096, %s675_s22, [#allocation14], %s15199_s3, %s15199_s3, %s15198_s10  }
  0xe8   : > { %p15201_p13 = scmp.ne.s32.totalorder %s15191_s29, 0 }
  0xe9   : > { %p15202_p7 = scmp.eq.s32.totalorder (!%p15201_p13), %s12709_s28, 0 }
  0xea   : > { %701 = sbr.rel (%p15201_p13) target bundleno = 5278 (0x149e), region = 108 }
  0xf1   : > { %12545 = dma.done.wait (%p15202_p7), [#allocation3], 256   ;;  %p15203_p2 = pmov %p15202_p7 }
  0xf3   : > { %12547 = vsyncadd (%p15203_p2), [#allocation3], 4294967040  ;;  %p15204_p3 = pmov %p15203_p2 }
  0xf4   : > { %p15205_p0 = pmov %p15203_p2 }
  0xf5   : > { %12549 = dma.done.wait (%p15204_p3), [#allocation5], 768  }
  0xf6   : > { %12551 = vsyncadd (%p15205_p0), [#allocation5], 4294966528  ;;  %p15206_p1 = pmov %p15205_p0 }
  0xf7   : > { %p15207_p5 = pmov %p15205_p0 }
  0xf8   : > { %12553 = dma.done.wait (%p15206_p1), [#allocation8], 3200  }
  0xf9   : > { %12555 = vsyncadd (%p15207_p5), [#allocation8], 4294964096  ;;  %p15208_p4 = pmov %p15205_p0 }
  0xfa   : > { %p15209_p6 = pmov %p15205_p0 }
  0xfb   : > { %12557 = dma.done.wait (%p15208_p4), [#allocation11], 8480  }
  0xfc   : > { %12559 = vsyncadd (%p15209_p6), [#allocation11], 4294958816  ;;  %p15210_p8 = pmov %p15205_p0 }
  0xfd   : > { %p15211_p9 = pmov %p15205_p0 }
  0xfe   : > { %12561 = dma.done.wait (%p15210_p8), [#allocation14], 4096  }
  0xff   : > { %12563 = vsyncadd (%p15211_p9), [#allocation14], 4294963200  ;;  %p790_p10 = scmp.lt.s32.totalorder %s12709_s28, 1  ;;  %vm983_vm0 = vcmask 1044480   ;;  %vm984_vm1 = vcmask 1045504   ;;  %v12584_v0 = vmov 65535  }
 0x100   : > { %v985_v1 = vsel %vm983_vm0, 4294967295, %v12584_v0  ;;  %s15212_s10 = sld [smem:[#allocation21_spill]]  ;;  %vm934_vm2 = vcmask 220160   ;;  %v11483_v2 = vld [vmem:[#allocation2] sm:$0xff]   ;;  %v11484_v4 = vld [vmem:[#allocation2 + $0x8] sm:$0x3f]  }
 0x101   : > { %s15223_s28 = smov (!%p790_p10, %s12709_s28), 1  ;;  %v986_v3 = vsel %vm984_vm1, %v985_v1, 0  ;;  %10798 = vmatprep.subr.bf16.mxu0 %v11483_v2  ;;  %v11501_v22 = vld [vmem:[#allocation4] sm:$0xff]   ;;  %v11502_v23 = vld [vmem:[#allocation4 + $0x8] sm:$0xff]   ;;  %s15213_s25 = sld [smem:[#allocation23_spill]]  ;;  %vm1222_vm3 = vcmask 261120  }
 0x102   : > { %s10151_s29 = sshll.u32 %s15223_s28, 7  ;;  %10799 = vmatpush3.bf16.msra.mxu0 %v11483_v2  ;;  %v988_v6 = vand.u32 %v11484_v4, %v986_v3  ;;  %10834 = vmatprep.subr.bf16.mxu1 %v11501_v22  ;;  %s15214_s6 = sld [smem:[#allocation26_spill]]  ;;  %vm1756_vm4 = vcmask 523264   ;;  %vm12586_vm5 = vmmov 0   ;;  %vm5355_vm6 = vcmask 130048  }
 0x103   : > { %10835 = vmatpush3.bf16.msra.mxu1 %v11501_v22  ;;  %s15215_s21 = sld [smem:[#allocation25_spill]]  ;;  %s15216_s30 = sld [smem:[#allocation27_spill]]  ;;  %vm8762_vm7 = vcmask 1043456  }
 0x104   : > { %10800 = vmatprep.subr.bf16.mxu0 %v988_v6  ;;  %10836 = vmatprep.subr.bf16.mxu1 %v11502_v23  ;;  %s15217_s0 = sld [smem:[#allocation31_spill]]  ;;  %s15218_s8 = sld [smem:[#allocation32_spill]] }
 0x105   : > { %s15219_s22 = sld [smem:[#allocation33_spill]]  ;;  %s8927_s27 = sshll.u32 %s15223_s28, 3 }
 0x106   : > { %s12949_s3 = scalar_lea.vmem %s15212_s10, %s10151_s29  ;;  %10801 = vmatpush3.bf16.msra.mxu0 %v988_v6  ;;  %s15220_s2 = sld [smem:[#allocation34_spill]] }
 0x107   : > { %v11485_v5 = vld [vmem:[%s12949_s3] sm:$0xff]   ;;  %v11486_v7 = vld [vmem:[%s12949_s3 + $0x8] sm:$0xff]   ;;  %v11487_v8 = vld [vmem:[%s12949_s3 + $0x10] sm:$0xff]   ;;  %10837 = vmatpush3.bf16.msra.mxu1 %v11502_v23 }
 0x108   : > { %10802 = vmatprep.mubr.msk.bf16.mxu0 %vm934_vm2, %v11485_v5  ;;  %v11488_v9 = vld [vmem:[%s12949_s3 + $0x18] sm:$0xff]   ;;  %v11489_v10 = vld [vmem:[%s12949_s3 + $0x20] sm:$0xff]   ;;  %v11490_v11 = vld [vmem:[%s12949_s3 + $0x28] sm:$0xff]  }
 0x109   : > { %10803 = vmatmul.mubr.msk.bf16.vlgmr.msra.gmra.mrb[0].mxu0 %vm934_vm2, %v11486_v7  ;;  %v11491_v12 = vld [vmem:[%s12949_s3 + $0x30] sm:$0xff]   ;;  %v11492_v13 = vld [vmem:[%s12949_s3 + $0x38] sm:$0xff]   ;;  %v11493_v14 = vld [vmem:[%s12949_s3 + $0x40] sm:$0xff]  }
 0x10a   : > { %10806 = vmatprep.mubr.msk.bf16.mxu0 %vm934_vm2, %v11487_v8  ;;  %v11494_v15 = vld [vmem:[%s12949_s3 + $0x48] sm:$0xff]   ;;  %v11495_v16 = vld [vmem:[%s12949_s3 + $0x50] sm:$0xff]   ;;  %v11496_v17 = vld [vmem:[%s12949_s3 + $0x58] sm:$0xff]  }
 0x10b   : > { %v11497_v18 = vld [vmem:[%s12949_s3 + $0x60] sm:$0xff]   ;;  %v11498_v19 = vld [vmem:[%s12949_s3 + $0x68] sm:$0xff]   ;;  %v11499_v20 = vld [vmem:[%s12949_s3 + $0x70] sm:$0xff]  }
 0x10c   : > { %v11500_v21 = vld [vmem:[%s12949_s3 + $0x78] sm:$0xff]   ;;  %v12986_v24 = vld [vmem:[%s15213_s25] ss:$0 sm:$0xff] }
 0x111   : > { %10807 = vmatmul.mubr.msk.bf16.gmra.mrb[4].mxu0 %vm934_vm2, %v11488_v9 }
 0x112   : > { %10810 = vmatprep.mubr.msk.bf16.mxu0 %vm934_vm2, %v11489_v10 }
 0x119   : > { %10811 = vmatmul.mubr.msk.bf16.gmra.mrb[8].mxu0 %vm934_vm2, %v11490_v11 }
 0x11a   : > { %10814 = vmatprep.mubr.msk.bf16.mxu0 %vm934_vm2, %v11491_v12 }
 0x121   : > { %10815 = vmatmul.mubr.msk.bf16.gmra.mrb[12].mxu0 %vm934_vm2, %v11492_v13 }
 0x122   : > { %10818 = vmatprep.mubr.msk.bf16.mxu0 %vm934_vm2, %v11493_v14 }
 0x129   : > { %10819 = vmatmul.mubr.msk.bf16.gmra.mrb[16].mxu0 %vm934_vm2, %v11494_v15 }
 0x12a   : > { %10822 = vmatprep.mubr.msk.bf16.mxu0 %vm934_vm2, %v11495_v16 }
 0x131   : > { %10823 = vmatmul.mubr.msk.bf16.gmra.mrb[20].mxu0 %vm934_vm2, %v11496_v17 }
 0x132   : > { %10826 = vmatprep.mubr.msk.bf16.mxu0 %vm934_vm2, %v11497_v18 }
 0x139   : > { %10827 = vmatmul.mubr.msk.bf16.gmra.mrb[24].mxu0 %vm934_vm2, %v11498_v19 }
 0x13a   : > { %10830 = vmatprep.mubr.msk.bf16.mxu0 %vm934_vm2, %v11499_v20 }
 0x141   : > { %10831 = vmatmul.mubr.msk.bf16.gmra.mrb[28].mxu0 %vm934_vm2, %v11500_v21 }
 0x1dc   : > { %v10804_v25 = vpop.f32.mrb[0].mxu0 }
 0x1dd   : > { %v1033_v26 = vadd.f32 %v10804_v25, %v12986_v24  ;;  %v1024_v27 = vpop.f32.mrb[1].mxu0 }
 0x1de   : > { %v1025_v28 = vadd.f32 %v12986_v24, %v1024_v27  ;;  %v10805_v29 = vpop.f32.mrb[2].mxu0 }
 0x1df   : > { %v1036_v30 = vadd.f32 %v10805_v29, %v12986_v24  ;;  %v1027_v31 = vpop.f32.mrb[3].mxu0  ;;  %v1153_v33 = vmax.f32 %v1033_v26, 0.0 }
 0x1e0   : > { %v1028_v32 = vadd.f32 %v12986_v24, %v1027_v31  ;;  %v1151_v35 = vmax.f32 %v1025_v28, 0.0 }
 0x1e1   : > { %v1154_v34 = vmax.f32 %v1036_v30, 0.0 }
 0x1e2   : > { %v1152_v36 = vmax.f32 %v1028_v32, 0.0 }
 0x1e3   : > { %v1184_v37 = vpack.c.bf16 %v1154_v34, %v1153_v33 }
 0x1e4   : > { %v10808_v38 = vpop.f32.mrb[4].mxu0  ;;  %v1183_v39 = vpack.c.bf16 %v1152_v36, %v1151_v35 }
 0x1e5   : > { %v1049_v40 = vadd.f32 %v10808_v38, %v12986_v24  ;;  %v1040_v41 = vpop.f32.mrb[5].mxu0 }
 0x1e6   : > { %v1041_v42 = vadd.f32 %v12986_v24, %v1040_v41  ;;  %v10809_v43 = vpop.f32.mrb[6].mxu0  ;;  %10838 = vmatprep.mubr.msk.bf16.mxu1 %vm1222_vm3, %v1183_v39 }
 0x1e7   : > { %v1052_v44 = vadd.f32 %v10809_v43, %v12986_v24  ;;  %v1043_v45 = vpop.f32.mrb[7].mxu0  ;;  %10839 = vmatmul.mubr.msk.bf16.vlgmr.msra.gmra.mrb[0].mxu1 %vm1222_vm3, %v1184_v37  ;;  %v1157_v47 = vmax.f32 %v1049_v40, 0.0 }
 0x1e8   : > { %v1044_v46 = vadd.f32 %v12986_v24, %v1043_v45  ;;  %v1155_v49 = vmax.f32 %v1041_v42, 0.0 }
 0x1e9   : > { %v1158_v48 = vmax.f32 %v1052_v44, 0.0 }
 0x1ea   : > { %v1156_v50 = vmax.f32 %v1044_v46, 0.0 }
 0x1eb   : > { %v1186_v51 = vpack.c.bf16 %v1158_v48, %v1157_v47 }
 0x1ec   : > { %v1185_v52 = vpack.c.bf16 %v1156_v50, %v1155_v49  ;;  %v10812_v53 = vpop.f32.mrb[8].mxu0 }
 0x1ed   : > { %v1065_v54 = vadd.f32 %v10812_v53, %v12986_v24  ;;  %v1056_v55 = vpop.f32.mrb[9].mxu0 }
 0x1ee   : > { %v1057_v56 = vadd.f32 %v12986_v24, %v1056_v55  ;;  %v10813_v57 = vpop.f32.mrb[10].mxu0  ;;  %10842 = vmatprep.mubr.msk.bf16.mxu1 %vm1222_vm3, %v1185_v52 }
 0x1ef   : > { %v1068_v58 = vadd.f32 %v10813_v57, %v12986_v24  ;;  %v1059_v59 = vpop.f32.mrb[11].mxu0  ;;  %10843 = vmatmul.mubr.msk.bf16.gmra.mrb[4].mxu1 %vm1222_vm3, %v1186_v51  ;;  %v1161_v61 = vmax.f32 %v1065_v54, 0.0 }
 0x1f0   : > { %v1060_v60 = vadd.f32 %v12986_v24, %v1059_v59  ;;  %v1159_v63 = vmax.f32 %v1057_v56, 0.0 }
 0x1f1   : > { %v1162_v62 = vmax.f32 %v1068_v58, 0.0 }
 0x1f2   : > { %v1160_v0 = vmax.f32 %v1060_v60, 0.0 }
 0x1f3   : > { %v1188_v1 = vpack.c.bf16 %v1162_v62, %v1161_v61 }
 0x1f4   : > { %v1187_v2 = vpack.c.bf16 %v1160_v0, %v1159_v63  ;;  %v10816_v3 = vpop.f32.mrb[12].mxu0 }
 0x1f5   : > { %v1081_v4 = vadd.f32 %v10816_v3, %v12986_v24  ;;  %v1072_v5 = vpop.f32.mrb[13].mxu0 }
 0x1f6   : > { %v1073_v6 = vadd.f32 %v12986_v24, %v1072_v5  ;;  %v10817_v7 = vpop.f32.mrb[14].mxu0  ;;  %10846 = vmatprep.mubr.msk.bf16.mxu1 %vm1222_vm3, %v1187_v2 }
 0x1f7   : > { %v1084_v8 = vadd.f32 %v10817_v7, %v12986_v24  ;;  %v1075_v9 = vpop.f32.mrb[15].mxu0  ;;  %10847 = vmatmul.mubr.msk.bf16.gmra.mrb[8].mxu1 %vm1222_vm3, %v1188_v1  ;;  %v1165_v11 = vmax.f32 %v1081_v4, 0.0 }
 0x1f8   : > { %v1076_v10 = vadd.f32 %v12986_v24, %v1075_v9  ;;  %v1163_v13 = vmax.f32 %v1073_v6, 0.0 }
 0x1f9   : > { %v1166_v12 = vmax.f32 %v1084_v8, 0.0 }
 0x1fa   : > { %v1164_v14 = vmax.f32 %v1076_v10, 0.0  ;;  %v11505_v10 = vld [vmem:[%s15214_s6 + $0x44] ss:$8 sps:$4 sm:$0xff]  }
 0x1fb   : > { %v1190_v15 = vpack.c.bf16 %v1166_v12, %v1165_v11  ;;  %v11514_v11 = vld [vmem:[%s15214_s6 + $0x4] ss:$8 sps:$4 sm:$0xff]  }
 0x1fc   : > { %v1189_v16 = vpack.c.bf16 %v1164_v14, %v1163_v13  ;;  %v10820_v17 = vpop.f32.mrb[16].mxu0  ;;  %1560 = vmatprep.mubr.bf16.mxu0 %v11514_v11 }
 0x1fd   : > { %v1097_v18 = vadd.f32 %v10820_v17, %v12986_v24  ;;  %v1088_v19 = vpop.f32.mrb[17].mxu0 }
 0x1fe   : > { %v1089_v20 = vadd.f32 %v12986_v24, %v1088_v19  ;;  %v10821_v21 = vpop.f32.mrb[18].mxu0  ;;  %10850 = vmatprep.mubr.msk.bf16.mxu1 %vm1222_vm3, %v1189_v16 }
 0x1ff   : > { %v1100_v22 = vadd.f32 %v10821_v21, %v12986_v24  ;;  %v1091_v23 = vpop.f32.mrb[19].mxu0  ;;  %10851 = vmatmul.mubr.msk.bf16.gmra.mrb[12].mxu1 %vm1222_vm3, %v1190_v15  ;;  %v1169_v26 = vmax.f32 %v1097_v18, 0.0 }
 0x200   : > { %v1092_v25 = vadd.f32 %v12986_v24, %v1091_v23  ;;  %v1167_v28 = vmax.f32 %v1089_v20, 0.0 }
 0x201   : > { %v1170_v27 = vmax.f32 %v1100_v22, 0.0 }
 0x202   : > { %v1168_v29 = vmax.f32 %v1092_v25, 0.0 }
 0x203   : > { %v1192_v30 = vpack.c.bf16 %v1170_v27, %v1169_v26 }
 0x204   : > { %v1191_v31 = vpack.c.bf16 %v1168_v29, %v1167_v28  ;;  %v10824_v32 = vpop.f32.mrb[20].mxu0 }
 0x205   : > { %v1113_v33 = vadd.f32 %v10824_v32, %v12986_v24  ;;  %v1104_v34 = vpop.f32.mrb[21].mxu0 }
 0x206   : > { %v1105_v35 = vadd.f32 %v12986_v24, %v1104_v34  ;;  %v10825_v36 = vpop.f32.mrb[22].mxu0  ;;  %10854 = vmatprep.mubr.msk.bf16.mxu1 %vm1222_vm3, %v1191_v31 }
 0x207   : > { %v1116_v37 = vadd.f32 %v10825_v36, %v12986_v24  ;;  %v1107_v38 = vpop.f32.mrb[23].mxu0  ;;  %10855 = vmatmul.mubr.msk.bf16.gmra.mrb[16].mxu1 %vm1222_vm3, %v1192_v30  ;;  %v1173_v40 = vmax.f32 %v1113_v33, 0.0 }
 0x208   : > { %v1108_v39 = vadd.f32 %v12986_v24, %v1107_v38  ;;  %v1171_v42 = vmax.f32 %v1105_v35, 0.0 }
 0x209   : > { %v1174_v41 = vmax.f32 %v1116_v37, 0.0 }
 0x20a   : > { %v1172_v43 = vmax.f32 %v1108_v39, 0.0 }
 0x20b   : > { %v1194_v44 = vpack.c.bf16 %v1174_v41, %v1173_v40 }
 0x20c   : > { %v1193_v45 = vpack.c.bf16 %v1172_v43, %v1171_v42  ;;  %v10828_v46 = vpop.f32.mrb[24].mxu0 }
 0x20d   : > { %v1129_v47 = vadd.f32 %v10828_v46, %v12986_v24  ;;  %v1120_v48 = vpop.f32.mrb[25].mxu0 }
 0x20e   : > { %v1121_v49 = vadd.f32 %v12986_v24, %v1120_v48  ;;  %v10829_v50 = vpop.f32.mrb[26].mxu0  ;;  %10858 = vmatprep.mubr.msk.bf16.mxu1 %vm1222_vm3, %v1193_v45 }
 0x20f   : > { %v1132_v51 = vadd.f32 %v10829_v50, %v12986_v24  ;;  %v1123_v52 = vpop.f32.mrb[27].mxu0  ;;  %10859 = vmatmul.mubr.msk.bf16.gmra.mrb[20].mxu1 %vm1222_vm3, %v1194_v44  ;;  %v1177_v54 = vmax.f32 %v1129_v47, 0.0 }
 0x210   : > { %v1124_v53 = vadd.f32 %v12986_v24, %v1123_v52  ;;  %v1175_v56 = vmax.f32 %v1121_v49, 0.0 }
 0x211   : > { %v1178_v55 = vmax.f32 %v1132_v51, 0.0 }
 0x212   : > { %v1176_v57 = vmax.f32 %v1124_v53, 0.0 }
 0x213   : > { %v1196_v58 = vpack.c.bf16 %v1178_v55, %v1177_v54 }
 0x214   : > { %v1195_v59 = vpack.c.bf16 %v1176_v57, %v1175_v56  ;;  %v10832_v60 = vpop.f32.mrb[28].mxu0 }
 0x215   : > { %v1145_v61 = vadd.f32 %v10832_v60, %v12986_v24  ;;  %v1136_v62 = vpop.f32.mrb[29].mxu0 }
 0x216   : > { %v1137_v63 = vadd.f32 %v12986_v24, %v1136_v62  ;;  %v10833_v0 = vpop.f32.mrb[30].mxu0  ;;  %10862 = vmatprep.mubr.msk.bf16.mxu1 %vm1222_vm3, %v1195_v59 }
 0x217   : > { %v1148_v1 = vadd.f32 %v10833_v0, %v12986_v24  ;;  %v1139_v2 = vpop.f32.mrb[31].mxu0  ;;  %10863 = vmatmul.mubr.msk.bf16.gmra.mrb[24].mxu1 %vm1222_vm3, %v1196_v58  ;;  %v1181_v4 = vmax.f32 %v1145_v61, 0.0 }
 0x218   : > { %v1140_v3 = vadd.f32 %v12986_v24, %v1139_v2  ;;  %v1179_v6 = vmax.f32 %v1137_v63, 0.0  ;;  %v13045_v24 = vld [vmem:[%s15215_s21] ss:$0 sm:$0xff]  ;;  %s798_s21 = scalar_lea.vmem %s15220_s2, %s8927_s27 }
 0x219   : > { %v1182_v5 = vmax.f32 %v1148_v1, 0.0 }
 0x21a   : > { %v1180_v7 = vmax.f32 %v1140_v3, 0.0 }
 0x21b   : > { %v1198_v8 = vpack.c.bf16 %v1182_v5, %v1181_v4 }
 0x21c   : > { %v1197_v9 = vpack.c.bf16 %v1180_v7, %v1179_v6 }
 0x21e   : > { %10866 = vmatprep.mubr.msk.bf16.mxu1 %vm1222_vm3, %v1197_v9 }
 0x21f   : > { %10867 = vmatmul.mubr.msk.bf16.gmra.mrb[28].mxu1 %vm1222_vm3, %v1198_v8 }
 0x220   : > { %1686 = vmatprep.mubr.bf16.mxu1 %v11505_v10 }
 0x2ba   : > { %v10840_v12 = vpop.f32.mrb[0].mxu1 }
 0x2bb   : > { %v1314_v13 = vadd.f32 %v10840_v12, %v13045_v24  ;;  %v1305_v14 = vpop.f32.mrb[1].mxu1 }
 0x2bc   : > { %v1306_v15 = vadd.f32 %v13045_v24, %v1305_v14  ;;  %v10841_v16 = vpop.f32.mrb[2].mxu1 }
 0x2bd   : > { %v1317_v17 = vadd.f32 %v10841_v16, %v13045_v24  ;;  %v1308_v18 = vpop.f32.mrb[3].mxu1  ;;  %v1434_v20 = vmax.f32 %v1314_v13, 0.0 }
 0x2be   : > { %v1309_v19 = vadd.f32 %v13045_v24, %v1308_v18  ;;  %v1432_v22 = vmax.f32 %v1306_v15, 0.0 }
 0x2bf   : > { %v1435_v21 = vmax.f32 %v1317_v17, 0.0 }
 0x2c0   : > { %v1433_v23 = vmax.f32 %v1309_v19, 0.0 }
 0x2c1   : > { %v13051_v25 = vpack.c.bf16 %v1435_v21, %v1434_v20 }
 0x2c2   : > { %v13053_v26 = vpack.c.bf16 %v1433_v23, %v1432_v22  ;;  %v10844_v27 = vpop.f32.mrb[4].mxu1 }
 0x2c3   : > { %v1330_v28 = vadd.f32 %v10844_v27, %v13045_v24  ;;  %v1321_v29 = vpop.f32.mrb[5].mxu1 }
 0x2c4   : > { %v1322_v30 = vadd.f32 %v13045_v24, %v1321_v29  ;;  %v10845_v31 = vpop.f32.mrb[6].mxu1 }
 0x2c5   : > { %v1333_v32 = vadd.f32 %v10845_v31, %v13045_v24  ;;  %v1324_v33 = vpop.f32.mrb[7].mxu1  ;;  %v1438_v35 = vmax.f32 %v1330_v28, 0.0 }
 0x2c6   : > { %v1325_v34 = vadd.f32 %v13045_v24, %v1324_v33  ;;  %v1436_v37 = vmax.f32 %v1322_v30, 0.0 }
 0x2c7   : > { %v1439_v36 = vmax.f32 %v1333_v32, 0.0 }
 0x2c8   : > { %v1437_v38 = vmax.f32 %v1325_v34, 0.0 }
 0x2c9   : > { %v13059_v39 = vpack.c.bf16 %v1439_v36, %v1438_v35 }
 0x2ca   : > { %v13061_v40 = vpack.c.bf16 %v1437_v38, %v1436_v37  ;;  %v10848_v41 = vpop.f32.mrb[8].mxu1 }
 0x2cb   : > { %v1346_v42 = vadd.f32 %v10848_v41, %v13045_v24  ;;  %v1337_v43 = vpop.f32.mrb[9].mxu1 }
 0x2cc   : > { %v1338_v44 = vadd.f32 %v13045_v24, %v1337_v43  ;;  %v10849_v45 = vpop.f32.mrb[10].mxu1 }
 0x2cd   : > { %v1349_v46 = vadd.f32 %v10849_v45, %v13045_v24  ;;  %v1340_v47 = vpop.f32.mrb[11].mxu1  ;;  %v1442_v49 = vmax.f32 %v1346_v42, 0.0 }
 0x2ce   : > { %v1341_v48 = vadd.f32 %v13045_v24, %v1340_v47  ;;  %v1440_v51 = vmax.f32 %v1338_v44, 0.0 }
 0x2cf   : > { %v1443_v50 = vmax.f32 %v1349_v46, 0.0 }
 0x2d0   : > { %v1441_v52 = vmax.f32 %v1341_v48, 0.0 }
 0x2d1   : > { %v13067_v53 = vpack.c.bf16 %v1443_v50, %v1442_v49 }
 0x2d2   : > { %v13069_v54 = vpack.c.bf16 %v1441_v52, %v1440_v51  ;;  %v10852_v55 = vpop.f32.mrb[12].mxu1 }
 0x2d3   : > { %v1362_v56 = vadd.f32 %v10852_v55, %v13045_v24  ;;  %v1353_v57 = vpop.f32.mrb[13].mxu1 }
 0x2d4   : > { %v1354_v58 = vadd.f32 %v13045_v24, %v1353_v57  ;;  %v10853_v59 = vpop.f32.mrb[14].mxu1 }
 0x2d5   : > { %v1365_v60 = vadd.f32 %v10853_v59, %v13045_v24  ;;  %v1356_v61 = vpop.f32.mrb[15].mxu1  ;;  %v1446_v63 = vmax.f32 %v1362_v56, 0.0 }
 0x2d6   : > { %v1357_v62 = vadd.f32 %v13045_v24, %v1356_v61  ;;  %v1444_v1 = vmax.f32 %v1354_v58, 0.0 }
 0x2d7   : > { %v1447_v0 = vmax.f32 %v1365_v60, 0.0 }
 0x2d8   : > { %v1445_v2 = vmax.f32 %v1357_v62, 0.0 }
 0x2d9   : > { %v13075_v3 = vpack.c.bf16 %v1447_v0, %v1446_v63 }
 0x2da   : > { %v13077_v4 = vpack.c.bf16 %v1445_v2, %v1444_v1  ;;  %v10856_v5 = vpop.f32.mrb[16].mxu1 }
 0x2db   : > { %v1378_v6 = vadd.f32 %v10856_v5, %v13045_v24  ;;  %v1369_v7 = vpop.f32.mrb[17].mxu1 }
 0x2dc   : > { %v1370_v8 = vadd.f32 %v13045_v24, %v1369_v7  ;;  %v10857_v9 = vpop.f32.mrb[18].mxu1  ;;  %v11506_v7 = vld [vmem:[%s15214_s6 + $0x54] ss:$8 sps:$4 sm:$0xff]  }
 0x2dd   : > { %v1381_v10 = vadd.f32 %v10857_v9, %v13045_v24  ;;  %v1372_v11 = vpop.f32.mrb[19].mxu1  ;;  %v1450_v13 = vmax.f32 %v1378_v6, 0.0  ;;  %v11512_v6 = vld [vmem:[%s15214_s6] ss:$8 sps:$4 sm:$0xff]   ;;  %v11508_v9 = vld [vmem:[%s15214_s6 + $0x50] ss:$8 sps:$4 sm:$0xff]  }
 0x2de   : > { %v1373_v12 = vadd.f32 %v13045_v24, %v1372_v11  ;;  %v1448_v15 = vmax.f32 %v1370_v8, 0.0  ;;  %v11518_v8 = vld [vmem:[%s15214_s6 + $0x14] ss:$8 sps:$4 sm:$0xff]   ;;  %v11509_v11 = vld [vmem:[%s15214_s6 + $0x64] ss:$8 sps:$4 sm:$0xff]  }
 0x2df   : > { %v1451_v14 = vmax.f32 %v1381_v10, 0.0  ;;  %v11523_v10 = vld [vmem:[%s15214_s6 + $0x10] ss:$8 sps:$4 sm:$0xff]  }
 0x2e0   : > { %v1449_v16 = vmax.f32 %v1373_v12, 0.0  ;;  %v11524_v12 = vld [vmem:[%s15214_s6 + $0x24] ss:$8 sps:$4 sm:$0xff]  }
 0x2e1   : > { %v13083_v17 = vpack.c.bf16 %v1451_v14, %v1450_v13  ;;  %v11511_v13 = vld [vmem:[%s15214_s6 + $0x60] ss:$8 sps:$4 sm:$0xff]  }
 0x2e2   : > { %v13085_v18 = vpack.c.bf16 %v1449_v16, %v1448_v15  ;;  %v10860_v19 = vpop.f32.mrb[20].mxu1  ;;  %v11528_v14 = vld [vmem:[%s15214_s6 + $0x20] ss:$8 sps:$4 sm:$0xff]   ;;  %v11515_v15 = vld [vmem:[%s15214_s6 + $0x74] ss:$8 sps:$4 sm:$0xff]  }
 0x2e3   : > { %v1394_v20 = vadd.f32 %v10860_v19, %v13045_v24  ;;  %v1385_v21 = vpop.f32.mrb[21].mxu1  ;;  %v11530_v16 = vld [vmem:[%s15214_s6 + $0x34] ss:$8 sps:$4 sm:$0xff]   ;;  %v11517_v19 = vld [vmem:[%s15214_s6 + $0x70] ss:$8 sps:$4 sm:$0xff]  }
 0x2e4   : > { %v1386_v22 = vadd.f32 %v13045_v24, %v1385_v21  ;;  %v10861_v23 = vpop.f32.mrb[22].mxu1  ;;  %10188 = vmatprep.subr.bf16.mxu0 %v13085_v18  ;;  %10228 = vmatprep.subr.bf16.mxu1 %v13085_v18  ;;  %v11522_v21 = vld [vmem:[%s15214_s6 + $0x84] ss:$8 sps:$4 sm:$0xff]  }
 0x2e5   : > { %v1397_v27 = vadd.f32 %v10861_v23, %v13045_v24  ;;  %v1388_v28 = vpop.f32.mrb[23].mxu1  ;;  %10189 = vmatpush3.bf16.msra.mxu0 %v13053_v26  ;;  %10229 = vmatpush3.bf16.msra.mxu1 %v13053_v26  ;;  %v1454_v30 = vmax.f32 %v1394_v20, 0.0  ;;  %v11534_v20 = vld [vmem:[%s15214_s6 + $0x30] ss:$8 sps:$4 sm:$0xff]   ;;  %v11526_v23 = vld [vmem:[%s15214_s6 + $0x94] ss:$8 sps:$4 sm:$0xff]  }
 0x2e6   : > { %v1389_v29 = vadd.f32 %v13045_v24, %v1388_v28  ;;  %10190 = vmatprep.subr.bf16.mxu0 %v13083_v17  ;;  %10230 = vmatprep.subr.bf16.mxu1 %v13083_v17  ;;  %v1452_v32 = vmax.f32 %v1386_v22, 0.0  ;;  %v11520_v22 = vld [vmem:[%s15214_s6 + $0x80] ss:$8 sps:$4 sm:$0xff]   ;;  %v11532_v28 = vld [vmem:[%s15214_s6 + $0xa4] ss:$8 sps:$4 sm:$0xff]  }
 0x2e7   : > { %v1455_v31 = vmax.f32 %v1397_v27, 0.0  ;;  %v11529_v27 = vld [vmem:[%s15214_s6 + $0x90] ss:$8 sps:$4 sm:$0xff]  }
 0x2e8   : > { %v1453_v33 = vmax.f32 %v1389_v29, 0.0  ;;  %v11535_v29 = vld [vmem:[%s15214_s6 + $0xa0] ss:$8 sps:$4 sm:$0xff]  }
 0x2e9   : > { %v13097_v34 = vpack.c.bf16 %v1455_v31, %v1454_v30  ;;  %10191 = vmatpush3.bf16.msra.mxu0 %v13051_v25  ;;  %10231 = vmatpush3.bf16.msra.mxu1 %v13051_v25  ;;  %v11536_v30 = vld [vmem:[%s15214_s6 + $0xb4] ss:$8 sps:$4 sm:$0xff]   ;;  %v11538_v31 = vld [vmem:[%s15214_s6 + $0xb0] ss:$8 sps:$4 sm:$0xff]  }
 0x2ea   : > { %v13101_v35 = vpack.c.bf16 %v1453_v33, %v1452_v32  ;;  %v10864_v36 = vpop.f32.mrb[24].mxu1  ;;  %v11541_v32 = vld [vmem:[%s15214_s6 + $0xc4] ss:$8 sps:$4 sm:$0xff]   ;;  %v11539_v33 = vld [vmem:[%s15214_s6 + $0xc0] ss:$8 sps:$4 sm:$0xff]  }
 0x2eb   : > { %v1410_v37 = vadd.f32 %v10864_v36, %v13045_v24  ;;  %v1401_v38 = vpop.f32.mrb[25].mxu1  ;;  %v11542_v36 = vld [vmem:[%s15214_s6 + $0xd4] ss:$8 sps:$4 sm:$0xff]  }
 0x2ec   : > { %v1402_v41 = vadd.f32 %v13045_v24, %v1401_v38  ;;  %v10865_v42 = vpop.f32.mrb[26].mxu1  ;;  %10192 = vmatprep.subr.bf16.mxu0 %v13101_v35  ;;  %10232 = vmatprep.subr.bf16.mxu1 %v13101_v35  ;;  %v11579_v38 = vld [vmem:[%s15216_s30 + $0x28] sm:$0xff]  }
 0x2ed   : > { %v1413_v43 = vadd.f32 %v10865_v42, %v13045_v24  ;;  %v1404_v44 = vpop.f32.mrb[27].mxu1  ;;  %10193 = vmatpush3.bf16.msra.mxu0 %v13061_v40  ;;  %10233 = vmatpush3.bf16.msra.mxu1 %v13061_v40  ;;  %v1458_v46 = vmax.f32 %v1410_v37, 0.0  ;;  %v11578_v37 = vld [vmem:[%s15216_s30 + $0x20] sm:$0xff]  }
 0x2ee   : > { %v1405_v45 = vadd.f32 %v13045_v24, %v1404_v44  ;;  %10194 = vmatprep.subr.bf16.mxu0 %v13097_v34  ;;  %10234 = vmatprep.subr.bf16.mxu1 %v13097_v34  ;;  %v1456_v48 = vmax.f32 %v1402_v41, 0.0  ;;  %v11544_v41 = vld [vmem:[%s15214_s6 + $0xd0] ss:$8 sps:$4 sm:$0xff]   ;;  %v11545_v42 = vld [vmem:[%s15214_s6 + $0xe4] ss:$8 sps:$4 sm:$0xff]  }
 0x2ef   : > { %v1459_v47 = vmax.f32 %v1413_v43, 0.0  ;;  %v11547_v43 = vld [vmem:[%s15214_s6 + $0xe0] ss:$8 sps:$4 sm:$0xff]   ;;  %v11548_v44 = vld [vmem:[%s15214_s6 + $0xf4] ss:$8 sps:$4 sm:$0xff]  }
 0x2f0   : > { %v1457_v49 = vmax.f32 %v1405_v45, 0.0  ;;  %v11550_v45 = vld [vmem:[%s15214_s6 + $0xf0] ss:$8 sps:$4 sm:$0xff]  }
 0x2f1   : > { %v13113_v50 = vpack.c.bf16 %v1459_v47, %v1458_v46  ;;  %10195 = vmatpush3.bf16.msra.mxu0 %v13059_v39  ;;  %10235 = vmatpush3.bf16.msra.mxu1 %v13059_v39  ;;  %v11553_v46 = vld [vmem:[%s15214_s6 + $0x104] ss:$8 sps:$4 sm:$0xff]   ;;  %v11580_v47 = vld [vmem:[%s15216_s30 + $0x30] sm:$0xff]  }
 0x2f2   : > { %v13117_v51 = vpack.c.bf16 %v1457_v49, %v1456_v48  ;;  %v10868_v52 = vpop.f32.mrb[28].mxu1  ;;  %v11551_v48 = vld [vmem:[%s15214_s6 + $0x100] ss:$8 sps:$4 sm:$0xff]   ;;  %v11554_v49 = vld [vmem:[%s15214_s6 + $0x114] ss:$8 sps:$4 sm:$0xff]  }
 0x2f3   : > { %v1426_v55 = vadd.f32 %v10868_v52, %v13045_v24  ;;  %v1417_v56 = vpop.f32.mrb[29].mxu1  ;;  %v11581_v52 = vld [vmem:[%s15216_s30 + $0x38] sm:$0xff]  }
 0x2f4   : > { %v1418_v57 = vadd.f32 %v13045_v24, %v1417_v56  ;;  %v10869_v58 = vpop.f32.mrb[30].mxu1  ;;  %10196 = vmatprep.subr.bf16.mxu0 %v13117_v51  ;;  %10236 = vmatprep.subr.bf16.mxu1 %v13117_v51  ;;  %v11557_v56 = vld [vmem:[%s15214_s6 + $0x124] ss:$8 sps:$4 sm:$0xff]  }
 0x2f5   : > { %v1429_v59 = vadd.f32 %v10869_v58, %v13045_v24  ;;  %v1420_v60 = vpop.f32.mrb[31].mxu1  ;;  %10197 = vmatpush3.bf16.msra.mxu0 %v13069_v54  ;;  %10237 = vmatpush3.bf16.msra.mxu1 %v13069_v54  ;;  %v1462_v62 = vmax.f32 %v1426_v55, 0.0  ;;  %v11556_v55 = vld [vmem:[%s15214_s6 + $0x110] ss:$8 sps:$4 sm:$0xff]   ;;  %v11559_v58 = vld [vmem:[%s15214_s6 + $0x120] ss:$8 sps:$4 sm:$0xff]  }
 0x2f6   : > { %v1421_v61 = vadd.f32 %v13045_v24, %v1420_v60  ;;  %10198 = vmatprep.subr.bf16.mxu0 %v13113_v50  ;;  %10238 = vmatprep.subr.bf16.mxu1 %v13113_v50  ;;  %v1460_v0 = vmax.f32 %v1418_v57, 0.0  ;;  %v11503_v24 = vld [vmem:[%s15214_s6 + $0x40] ss:$8 sps:$4 sm:$0xff]   ;;  %v11562_v60 = vld [vmem:[%s15214_s6 + $0x130] ss:$8 sps:$4 sm:$0xff]  }
 0x2f7   : > { %v1463_v63 = vmax.f32 %v1429_v59, 0.0  ;;  %v13317_v57 = vld [vmem:[%s15216_s30] sm:$0xff]   ;;  %v11560_v59 = vld [vmem:[%s15214_s6 + $0x134] ss:$8 sps:$4 sm:$0xff]  }
 0x2f8   : > { %v1461_v1 = vmax.f32 %v1421_v61, 0.0  ;;  %v11565_v61 = vld [vmem:[%s15214_s6 + $0x184] ss:$8 sps:$4 sm:$0xff]  }
 0x2f9   : > { %v13129_v2 = vpack.c.bf16 %v1463_v63, %v1462_v62  ;;  %10199 = vmatpush3.bf16.msra.mxu0 %v13067_v53  ;;  %10239 = vmatpush3.bf16.msra.mxu1 %v13067_v53  ;;  %v11563_v62 = vld [vmem:[%s15214_s6 + $0x180] ss:$8 sps:$4 sm:$0xff]   ;;  %v11566_v63 = vld [vmem:[%s15214_s6 + $0x194] ss:$8 sps:$4 sm:$0xff]  }
 0x2fa   : > { %v13133_v5 = vpack.c.bf16 %v1461_v1, %v1460_v0  ;;  %v11568_v0 = vld [vmem:[%s15214_s6 + $0x190] ss:$8 sps:$4 sm:$0xff]   ;;  %v11569_v1 = vld [vmem:[%s15214_s6 + $0x1a4] ss:$8 sps:$4 sm:$0xff]  }
 0x2fc   : > { %10200 = vmatprep.subr.bf16.mxu0 %v13133_v5  ;;  %10240 = vmatprep.subr.bf16.mxu1 %v13133_v5 }
 0x2fd   : > { %10201 = vmatpush3.bf16.msra.mxu0 %v13077_v4  ;;  %10241 = vmatpush3.bf16.msra.mxu1 %v13077_v4 }
 0x2fe   : > { %10202 = vmatprep.subr.bf16.mxu0 %v13129_v2  ;;  %10242 = vmatprep.subr.bf16.mxu1 %v13129_v2 }
 0x301   : > { %10203 = vmatpush3.bf16.msra.mxu0 %v13075_v3  ;;  %10243 = vmatpush3.bf16.msra.mxu1 %v13075_v3 }
 0x302   : > { %10284 = vmatprep.subr.bf16.mxu1 %v13085_v18  ;;  %10870 = vmatprep.subr.bf16.mxu0 %v11578_v37 }
 0x304   : > { %1687 = vmatmul.mubr.bf16.vlgmr.msra.gmra.mrb[32].mxu1 %v11503_v24  ;;  %1561 = vmatmul.mubr.bf16.vlgmr.msra.gmra.mrb[32].mxu0 %v11512_v6  ;;  %v11571_v24 = vld [vmem:[%s15214_s6 + $0x1a0] ss:$8 sps:$4 sm:$0xff]   ;;  %v11572_v6 = vld [vmem:[%s15214_s6 + $0x1b4] ss:$8 sps:$4 sm:$0xff]  }
 0x305   : > { %10285 = vmatpush3.bf16.msra.mxu1 %v13053_v26  ;;  %1694 = vmatprep.mubr.bf16.mxu1 %v11506_v7  ;;  %v11574_v7 = vld [vmem:[%s15214_s6 + $0x1b0] ss:$8 sps:$4 sm:$0xff]  }
 0x306   : > { %10286 = vmatprep.subr.bf16.mxu1 %v13083_v17  ;;  %1568 = vmatprep.mubr.bf16.mxu0 %v11518_v8  ;;  %v11577_v8 = vld [vmem:[%s15214_s6 + $0x1c4] ss:$8 sps:$4 sm:$0xff]  }
 0x307   : > { %10871 = vmatpush3.bf16.msra.mxu0 %v11578_v37 }
 0x308   : > { %10872 = vmatprep.subr.bf16.mxu0 %v11579_v38 }
 0x309   : > { %10287 = vmatpush3.bf16.msra.mxu1 %v13051_v25 }
 0x30a   : > { %10288 = vmatprep.subr.bf16.mxu1 %v13101_v35 }
 0x30b   : > { %10873 = vmatpush3.bf16.msra.mxu0 %v11579_v38 }
 0x30c   : > { %1695 = vmatmul.mubr.bf16.gmra.mrb[36].mxu1 %v11508_v9  ;;  %1569 = vmatmul.mubr.bf16.gmra.mrb[36].mxu0 %v11523_v10  ;;  %v11575_v9 = vld [vmem:[%s15214_s6 + $0x1c0] ss:$8 sps:$4 sm:$0xff]  }
 0x30d   : > { %10289 = vmatpush3.bf16.msra.mxu1 %v13061_v40  ;;  %1702 = vmatprep.mubr.bf16.mxu1 %v11509_v11 }
 0x30e   : > { %10290 = vmatprep.subr.bf16.mxu1 %v13097_v34  ;;  %1576 = vmatprep.mubr.bf16.mxu0 %v11524_v12 }
 0x30f   : > { %10874 = vmatprep.subr.bf16.mxu0 %v11580_v47 }
 0x310   : > { %10875 = vmatpush3.bf16.msra.mxu0 %v11580_v47 }
 0x311   : > { %10291 = vmatpush3.bf16.msra.mxu1 %v13059_v39  ;;  %10876 = vmatprep.subr.bf16.mxu0 %v11581_v52 }
 0x312   : > { %10292 = vmatprep.subr.bf16.mxu1 %v13117_v51 }
 0x314   : > { %1703 = vmatmul.mubr.bf16.gmra.mrb[40].mxu1 %v11511_v13  ;;  %1577 = vmatmul.mubr.bf16.gmra.mrb[40].mxu0 %v11528_v14 }
 0x315   : > { %10293 = vmatpush3.bf16.msra.mxu1 %v13069_v54  ;;  %1710 = vmatprep.mubr.bf16.mxu1 %v11515_v15 }
 0x316   : > { %10294 = vmatprep.subr.bf16.mxu1 %v13113_v50  ;;  %1584 = vmatprep.mubr.bf16.mxu0 %v11530_v16 }
 0x317   : > { %10877 = vmatpush3.bf16.msra.mxu0 %v11581_v52 }
 0x318   : > { %10886 = vmatprep.subr.bf16.mxu0 %v13317_v57 }
 0x319   : > { %10295 = vmatpush3.bf16.msra.mxu1 %v13067_v53 }
 0x31a   : > { %10296 = vmatprep.subr.bf16.mxu1 %v13133_v5 }
 0x31c   : > { %1711 = vmatmul.mubr.bf16.gmra.mrb[44].mxu1 %v11517_v19  ;;  %1585 = vmatmul.mubr.bf16.gmra.mrb[44].mxu0 %v11534_v20 }
 0x31d   : > { %10297 = vmatpush3.bf16.msra.mxu1 %v13077_v4  ;;  %2016 = vmatprep.mubr.bf16.mxu1 %v11522_v21 }
 0x31e   : > { %10298 = vmatprep.subr.bf16.mxu1 %v13129_v2 }
 0x321   : > { %10299 = vmatpush3.bf16.msra.mxu1 %v13075_v3 }
 0x322   : > { %10332 = vmatprep.subr.bf16.mxu1 %v13085_v18 }
 0x324   : > { %2017 = vmatmul.mubr.bf16.vlgmr.msra.gmra.mrb[48].mxu1 %v11520_v22 }
 0x325   : > { %10333 = vmatpush3.bf16.msra.mxu1 %v13053_v26  ;;  %2024 = vmatprep.mubr.bf16.mxu1 %v11526_v23 }
 0x326   : > { %10334 = vmatprep.subr.bf16.mxu1 %v13083_v17 }
 0x329   : > { %10335 = vmatpush3.bf16.msra.mxu1 %v13051_v25 }
 0x32a   : > { %10336 = vmatprep.subr.bf16.mxu1 %v13101_v35 }
 0x32c   : > { %2025 = vmatmul.mubr.bf16.gmra.mrb[52].mxu1 %v11529_v27 }
 0x32d   : > { %10337 = vmatpush3.bf16.msra.mxu1 %v13061_v40  ;;  %2032 = vmatprep.mubr.bf16.mxu1 %v11532_v28 }
 0x32e   : > { %10338 = vmatprep.subr.bf16.mxu1 %v13097_v34 }
 0x331   : > { %10339 = vmatpush3.bf16.msra.mxu1 %v13059_v39 }
 0x332   : > { %10340 = vmatprep.subr.bf16.mxu1 %v13117_v51 }
 0x334   : > { %2033 = vmatmul.mubr.bf16.gmra.mrb[56].mxu1 %v11535_v29 }
 0x335   : > { %10341 = vmatpush3.bf16.msra.mxu1 %v13069_v54  ;;  %2040 = vmatprep.mubr.bf16.mxu1 %v11536_v30 }
 0x336   : > { %10342 = vmatprep.subr.bf16.mxu1 %v13113_v50 }
 0x339   : > { %10343 = vmatpush3.bf16.msra.mxu1 %v13067_v53 }
 0x33a   : > { %10344 = vmatprep.subr.bf16.mxu1 %v13133_v5 }
 0x33c   : > { %2041 = vmatmul.mubr.bf16.gmra.mrb[60].mxu1 %v11538_v31 }
 0x33d   : > { %10345 = vmatpush3.bf16.msra.mxu1 %v13077_v4  ;;  %2252 = vmatprep.mubr.bf16.mxu1 %v11541_v32 }
 0x33e   : > { %10346 = vmatprep.subr.bf16.mxu1 %v13129_v2 }
 0x341   : > { %10347 = vmatpush3.bf16.msra.mxu1 %v13075_v3 }
 0x342   : > { %10380 = vmatprep.subr.bf16.mxu1 %v13085_v18 }
 0x344   : > { %2253 = vmatmul.mubr.bf16.vlgmr.msra.gmra.mrb[64].mxu1 %v11539_v33 }
 0x345   : > { %10381 = vmatpush3.bf16.msra.mxu1 %v13053_v26  ;;  %2260 = vmatprep.mubr.bf16.mxu1 %v11542_v36 }
 0x346   : > { %10382 = vmatprep.subr.bf16.mxu1 %v13083_v17 }
 0x349   : > { %10383 = vmatpush3.bf16.msra.mxu1 %v13051_v25 }
 0x34a   : > { %10384 = vmatprep.subr.bf16.mxu1 %v13101_v35 }
 0x34c   : > { %2261 = vmatmul.mubr.bf16.gmra.mrb[68].mxu1 %v11544_v41 }
 0x34d   : > { %10385 = vmatpush3.bf16.msra.mxu1 %v13061_v40  ;;  %2268 = vmatprep.mubr.bf16.mxu1 %v11545_v42 }
 0x34e   : > { %10386 = vmatprep.subr.bf16.mxu1 %v13097_v34 }
 0x351   : > { %10387 = vmatpush3.bf16.msra.mxu1 %v13059_v39 }
 0x352   : > { %10388 = vmatprep.subr.bf16.mxu1 %v13117_v51 }
 0x354   : > { %2269 = vmatmul.mubr.bf16.gmra.mrb[72].mxu1 %v11547_v43 }
 0x355   : > { %10389 = vmatpush3.bf16.msra.mxu1 %v13069_v54  ;;  %2276 = vmatprep.mubr.bf16.mxu1 %v11548_v44 }
 0x356   : > { %10390 = vmatprep.subr.bf16.mxu1 %v13113_v50 }
 0x359   : > { %10391 = vmatpush3.bf16.msra.mxu1 %v13067_v53 }
 0x35a   : > { %10392 = vmatprep.subr.bf16.mxu1 %v13133_v5 }
 0x35c   : > { %2277 = vmatmul.mubr.bf16.gmra.mrb[76].mxu1 %v11550_v45 }
 0x35d   : > { %10393 = vmatpush3.bf16.msra.mxu1 %v13077_v4  ;;  %2488 = vmatprep.mubr.bf16.mxu1 %v11553_v46  ;;  %v11583_v46 = vld [vmem:[%s15216_s30 + $0x8] sm:$0xff]  }
 0x35e   : > { %10394 = vmatprep.subr.bf16.mxu1 %v13129_v2 }
 0x361   : > { %10395 = vmatpush3.bf16.msra.mxu1 %v13075_v3 }
 0x362   : > { %10476 = vmatprep.subr.bf16.mxu1 %v13085_v18 }
 0x364   : > { %2489 = vmatmul.mubr.bf16.vlgmr.msra.gmra.mrb[80].mxu1 %v11551_v48 }
 0x365   : > { %10477 = vmatpush3.bf16.msra.mxu1 %v13053_v26  ;;  %2496 = vmatprep.mubr.bf16.mxu1 %v11554_v49 }
 0x366   : > { %10478 = vmatprep.subr.bf16.mxu1 %v13083_v17 }
 0x369   : > { %10479 = vmatpush3.bf16.msra.mxu1 %v13051_v25 }
 0x36a   : > { %10480 = vmatprep.subr.bf16.mxu1 %v13101_v35 }
 0x36c   : > { %2497 = vmatmul.mubr.bf16.gmra.mrb[84].mxu1 %v11556_v55 }
 0x36d   : > { %10481 = vmatpush3.bf16.msra.mxu1 %v13061_v40  ;;  %2504 = vmatprep.mubr.bf16.mxu1 %v11557_v56 }
 0x36e   : > { %10482 = vmatprep.subr.bf16.mxu1 %v13097_v34 }
 0x371   : > { %10483 = vmatpush3.bf16.msra.mxu1 %v13059_v39 }
 0x372   : > { %10484 = vmatprep.subr.bf16.mxu1 %v13117_v51 }
 0x374   : > { %2505 = vmatmul.mubr.bf16.gmra.mrb[88].mxu1 %v11559_v58 }
 0x375   : > { %10485 = vmatpush3.bf16.msra.mxu1 %v13069_v54  ;;  %2512 = vmatprep.mubr.bf16.mxu1 %v11560_v59  ;;  %v11584_v59 = vld [vmem:[%s15216_s30 + $0x10] sm:$0xff]  }
 0x376   : > { %10486 = vmatprep.subr.bf16.mxu1 %v13113_v50 }
 0x379   : > { %10487 = vmatpush3.bf16.msra.mxu1 %v13067_v53 }
 0x37a   : > { %10488 = vmatprep.subr.bf16.mxu1 %v13133_v5 }
 0x37c   : > { %2513 = vmatmul.mubr.bf16.gmra.mrb[92].mxu1 %v11562_v60 }
 0x37d   : > { %10489 = vmatpush3.bf16.msra.mxu1 %v13077_v4  ;;  %2960 = vmatprep.mubr.bf16.mxu1 %v11565_v61 }
 0x37e   : > { %10490 = vmatprep.subr.bf16.mxu1 %v13129_v2 }
 0x381   : > { %10491 = vmatpush3.bf16.msra.mxu1 %v13075_v3 }
 0x382   : > { %10524 = vmatprep.subr.bf16.mxu1 %v13085_v18 }
 0x384   : > { %2961 = vmatmul.mubr.bf16.vlgmr.msra.gmra.mrb[96].mxu1 %v11563_v62 }
 0x385   : > { %10525 = vmatpush3.bf16.msra.mxu1 %v13053_v26  ;;  %2968 = vmatprep.mubr.bf16.mxu1 %v11566_v63 }
 0x386   : > { %10526 = vmatprep.subr.bf16.mxu1 %v13083_v17 }
 0x389   : > { %10527 = vmatpush3.bf16.msra.mxu1 %v13051_v25 }
 0x38a   : > { %10528 = vmatprep.subr.bf16.mxu1 %v13101_v35 }
 0x38c   : > { %2969 = vmatmul.mubr.bf16.gmra.mrb[100].mxu1 %v11568_v0 }
 0x38d   : > { %10529 = vmatpush3.bf16.msra.mxu1 %v13061_v40  ;;  %2976 = vmatprep.mubr.bf16.mxu1 %v11569_v1 }
 0x38e   : > { %10530 = vmatprep.subr.bf16.mxu1 %v13097_v34 }
 0x391   : > { %10531 = vmatpush3.bf16.msra.mxu1 %v13059_v39 }
 0x392   : > { %10532 = vmatprep.subr.bf16.mxu1 %v13117_v51 }
 0x394   : > { %2977 = vmatmul.mubr.bf16.gmra.mrb[104].mxu1 %v11571_v24 }
 0x395   : > { %10533 = vmatpush3.bf16.msra.mxu1 %v13069_v54  ;;  %2984 = vmatprep.mubr.bf16.mxu1 %v11572_v6 }
 0x396   : > { %10534 = vmatprep.subr.bf16.mxu1 %v13113_v50 }
 0x399   : > { %10535 = vmatpush3.bf16.msra.mxu1 %v13067_v53 }
 0x39a   : > { %10536 = vmatprep.subr.bf16.mxu1 %v13133_v5 }
 0x39c   : > { %2985 = vmatmul.mubr.bf16.gmra.mrb[108].mxu1 %v11574_v7 }
 0x39d   : > { %10537 = vmatpush3.bf16.msra.mxu1 %v13077_v4  ;;  %3196 = vmatprep.mubr.bf16.mxu1 %v11577_v8 }
 0x39e   : > { %10538 = vmatprep.subr.bf16.mxu1 %v13129_v2 }
 0x3a1   : > { %10539 = vmatpush3.bf16.msra.mxu1 %v13075_v3 }
 0x3a2   : > { %10572 = vmatprep.subr.bf16.mxu1 %v13085_v18 }
 0x3a4   : > { %3197 = vmatmul.mubr.bf16.vlgmr.msra.gmra.mrb[112].mxu1 %v11575_v9 }
 0x3a5   : > { %10573 = vmatpush3.bf16.msra.mxu1 %v13053_v26 }
 0x3a6   : > { %10574 = vmatprep.subr.bf16.mxu1 %v13083_v17 }
 0x3a9   : > { %10575 = vmatpush3.bf16.msra.mxu1 %v13051_v25 }
 0x3aa   : > { %10576 = vmatprep.subr.bf16.mxu1 %v13101_v35 }
 0x3ad   : > { %10577 = vmatpush3.bf16.msra.mxu1 %v13061_v40 }
 0x3ae   : > { %10578 = vmatprep.subr.bf16.mxu1 %v13097_v34 }
 0x3b1   : > { %10579 = vmatpush3.bf16.msra.mxu1 %v13059_v39 }
 0x3b2   : > { %10580 = vmatprep.subr.bf16.mxu1 %v13117_v51 }
 0x3b5   : > { %10581 = vmatpush3.bf16.msra.mxu1 %v13069_v54 }
 0x3b6   : > { %10582 = vmatprep.subr.bf16.mxu1 %v13113_v50 }
 0x3b9   : > { %10583 = vmatpush3.bf16.msra.mxu1 %v13067_v53 }
 0x3ba   : > { %10584 = vmatprep.subr.bf16.mxu1 %v13133_v5 }
 0x3bd   : > { %10585 = vmatpush3.bf16.msra.mxu1 %v13077_v4 }
 0x3be   : > { %10586 = vmatprep.subr.bf16.mxu1 %v13129_v2 }
 0x3c1   : > { %10587 = vmatpush3.bf16.msra.mxu1 %v13075_v3 }
 0x3d7   : > { %v10244_v10 = vpop.f32.mrb[32].mxu1  ;;  %v10204_v11 = vpop.f32.mrb[32].mxu0 }
 0x3d8   : > { %v10245_v12 = vpop.f32.mrb[33].mxu1  ;;  %v10205_v13 = vpop.f32.mrb[33].mxu0 }
 0x3d9   : > { %v10246_v14 = vadd.f32 %v10245_v12, %v10244_v10  ;;  %v10247_v15 = vpop.f32.mrb[34].mxu1  ;;  %v13401_v16 = vadd.f32 %v10205_v13, %v10204_v11  ;;  %v10207_v19 = vpop.f32.mrb[34].mxu0  ;;  %v11586_v13 = vld [vmem:[%s15216_s30 + $0x40] sm:$0xff]  }
 0x3da   : > { %v10248_v20 = vpop.f32.mrb[35].mxu1  ;;  %v10208_v21 = vpop.f32.mrb[35].mxu0 }
 0x3db   : > { %v10249_v22 = vadd.f32 %v10248_v20, %v10247_v15  ;;  %v13403_v23 = vadd.f32 %v10208_v21, %v10207_v19 }
 0x3dd   : > { %v1719_v27 = vpack.c.bf16 %v10249_v22, %v10246_v14  ;;  %v1593_v28 = vpack.c.bf16 %v13403_v23, %v13401_v16 }
 0x3df   : > { %v10250_v29 = vpop.f32.mrb[36].mxu1  ;;  %10878 = vmatprep.mubr.msk.bf16.mxu0 %vm1756_vm4, %v1719_v27  ;;  %v10210_v30 = vpop.f32.mrb[36].mxu0 }
 0x3e0   : > { %v10251_v31 = vpop.f32.mrb[37].mxu1  ;;  %v10211_v32 = vpop.f32.mrb[37].mxu0 }
 0x3e1   : > { %v10252_v33 = vadd.f32 %v10251_v31, %v10250_v29  ;;  %v10253_v36 = vpop.f32.mrb[38].mxu1  ;;  %v13408_v37 = vadd.f32 %v10211_v32, %v10210_v30  ;;  %v10213_v38 = vpop.f32.mrb[38].mxu0  ;;  %v11609_v30 = vld [vmem:[%s15214_s6 + $0x1d4] ss:$8 sps:$4 sm:$0xff]  }
 0x3e2   : > { %v10254_v41 = vpop.f32.mrb[39].mxu1  ;;  %v10214_v42 = vpop.f32.mrb[39].mxu0  ;;  %3204 = vmatprep.mubr.bf16.mxu1 %v11609_v30  ;;  %v11625_v30 = vld [vmem:[%s15214_s6 + $0x224] ss:$8 sps:$4 sm:$0xff]  }
 0x3e3   : > { %v10255_v43 = vadd.f32 %v10254_v41, %v10253_v36  ;;  %v10215_v44 = vadd.f32 %v10214_v42, %v10213_v38  ;;  %v11612_v36 = vld [vmem:[%s15214_s6 + $0x1d0] ss:$8 sps:$4 sm:$0xff]   ;;  %v11587_v38 = vld [vmem:[%s15216_s30 + $0x48] sm:$0xff]  }
 0x3e4   : > { %3205 = vmatmul.mubr.bf16.gmra.mrb[116].mxu1 %v11612_v36  ;;  %v11613_v42 = vld [vmem:[%s15214_s6 + $0x1e4] ss:$8 sps:$4 sm:$0xff]  }
 0x3e5   : > { %v1720_v45 = vpack.c.bf16 %v10255_v43, %v10252_v33  ;;  %v1594_v47 = vpack.c.bf16 %v10215_v44, %v13408_v37  ;;  %v11615_v44 = vld [vmem:[%s15214_s6 + $0x1e0] ss:$8 sps:$4 sm:$0xff]   ;;  %3212 = vmatprep.mubr.bf16.mxu1 %v11613_v42  ;;  %v11628_v42 = vld [vmem:[%s15214_s6 + $0x234] ss:$8 sps:$4 sm:$0xff]  }
 0x3e7   : > { %v10256_v48 = vpop.f32.mrb[40].mxu1  ;;  %10879 = vmatmul.mubr.msk.bf16.vlgmr.msra.gmra.mrb[48].mxu0 %vm1756_vm4, %v1720_v45  ;;  %v10216_v49 = vpop.f32.mrb[40].mxu0  ;;  %v11588_v45 = vld [vmem:[%s15216_s30 + $0x50] sm:$0xff]  }
 0x3e8   : > { %v10257_v52 = vpop.f32.mrb[41].mxu1  ;;  %10887 = vmatpush3.bf16.msra.mxu0 %v13317_v57  ;;  %v10217_v55 = vpop.f32.mrb[41].mxu0  ;;  %v11585_v57 = vld [vmem:[%s15216_s30 + $0x18] sm:$0xff]  }
 0x3e9   : > { %v10258_v56 = vadd.f32 %v10257_v52, %v10256_v48  ;;  %v10259_v58 = vpop.f32.mrb[42].mxu1  ;;  %10888 = vmatprep.subr.bf16.mxu0 %v11583_v46  ;;  %v10218_v60 = vadd.f32 %v10217_v55, %v10216_v49  ;;  %v10219_v61 = vpop.f32.mrb[42].mxu0  ;;  %v11616_v48 = vld [vmem:[%s15214_s6 + $0x1f4] ss:$8 sps:$4 sm:$0xff]  }
 0x3ea   : > { %v10260_v62 = vpop.f32.mrb[43].mxu1  ;;  %v10220_v63 = vpop.f32.mrb[43].mxu0 }
 0x3eb   : > { %v10261_v0 = vadd.f32 %v10260_v62, %v10259_v58  ;;  %v10221_v1 = vadd.f32 %v10220_v63, %v10219_v61  ;;  %v11590_v63 = vld [vmem:[%s15216_s30 + $0x60] sm:$0xff]  }
 0x3ec   : > { %10889 = vmatpush3.bf16.msra.mxu0 %v11583_v46  ;;  %3213 = vmatmul.mubr.bf16.gmra.mrb[120].mxu1 %v11615_v44 }
 0x3ed   : > { %v1721_v24 = vpack.c.bf16 %v10261_v0, %v10258_v56  ;;  %10890 = vmatprep.subr.bf16.mxu0 %v11584_v59  ;;  %v1595_v6 = vpack.c.bf16 %v10221_v1, %v10218_v60  ;;  %v11589_v56 = vld [vmem:[%s15216_s30 + $0x58] sm:$0xff]   ;;  %3220 = vmatprep.mubr.bf16.mxu1 %v11616_v48  ;;  %v11621_v0 = vld [vmem:[%s15214_s6 + $0x204] ss:$8 sps:$4 sm:$0xff]  }
 0x3ee   : > { %v11618_v60 = vld [vmem:[%s15214_s6 + $0x1f0] ss:$8 sps:$4 sm:$0xff]  }
 0x3ef   : > { %v10262_v7 = vpop.f32.mrb[44].mxu1  ;;  %10882 = vmatprep.mubr.msk.bf16.mxu0 %vm1756_vm4, %v1721_v24  ;;  %v10222_v8 = vpop.f32.mrb[44].mxu0 }
 0x3f0   : > { %v10263_v9 = vpop.f32.mrb[45].mxu1  ;;  %10891 = vmatpush3.bf16.msra.mxu0 %v11584_v59  ;;  %v10223_v10 = vpop.f32.mrb[45].mxu0 }
 0x3f1   : > { %v10264_v11 = vadd.f32 %v10263_v9, %v10262_v7  ;;  %v10265_v12 = vpop.f32.mrb[46].mxu1  ;;  %10892 = vmatprep.subr.bf16.mxu0 %v11585_v57  ;;  %v10224_v14 = vadd.f32 %v10223_v10, %v10222_v8  ;;  %v10225_v15 = vpop.f32.mrb[46].mxu0  ;;  %v11619_v9 = vld [vmem:[%s15214_s6 + $0x200] ss:$8 sps:$4 sm:$0xff]  }
 0x3f2   : > { %v10266_v16 = vpop.f32.mrb[47].mxu1  ;;  %v10226_v19 = vpop.f32.mrb[47].mxu0 }
 0x3f3   : > { %v10267_v20 = vadd.f32 %v10266_v16, %v10265_v12  ;;  %v10227_v21 = vadd.f32 %v10226_v19, %v10225_v15  ;;  %v11592_v12 = vld [vmem:[%s15216_s30 + $0x70] sm:$0xff]   ;;  %v11593_v19 = vld [vmem:[%s15216_s30 + $0x78] sm:$0xff]  }
 0x3f4   : > { %10893 = vmatpush3.bf16.msra.mxu0 %v11585_v57  ;;  %3221 = vmatmul.mubr.bf16.gmra.mrb[124].mxu1 %v11618_v60  ;;  %v11597_v60 = vld [vmem:[%s15216_s30 + $0x98] sm:$0xff]  }
 0x3f5   : > { %v1722_v22 = vpack.c.bf16 %v10267_v20, %v10264_v11  ;;  %10902 = vmatprep.subr.bf16.mxu0 %v11586_v13  ;;  %v1596_v23 = vpack.c.bf16 %v10227_v21, %v10224_v14  ;;  %3432 = vmatprep.mubr.bf16.mxu1 %v11621_v0 }
 0x3f7   : > { %10883 = vmatmul.mubr.msk.bf16.gmra.mrb[52].mxu0 %vm1756_vm4, %v1722_v22  ;;  %v10300_v27 = vpop.f32.mrb[48].mxu1  ;;  %v11624_v22 = vld [vmem:[%s15214_s6 + $0x210] ss:$8 sps:$4 sm:$0xff]  }
 0x3f8   : > { %10894 = vmatprep.mubr.msk.bf16.mxu0 %vm1756_vm4, %v1593_v28  ;;  %v10301_v29 = vpop.f32.mrb[49].mxu1 }
 0x3f9   : > { %v10302_v31 = vadd.f32 %v10301_v29, %v10300_v27  ;;  %v10303_v32 = vpop.f32.mrb[50].mxu1  ;;  %v11594_v29 = vld [vmem:[%s15216_s30 + $0x80] sm:$0xff]  }
 0x3fa   : > { %v10304_v33 = vpop.f32.mrb[51].mxu1 }
 0x3fb   : > { %v10305_v37 = vadd.f32 %v10304_v33, %v10303_v32 }
 0x3fc   : > { %3433 = vmatmul.mubr.bf16.vlgmr.msra.gmra.mrb[128].mxu1 %v11619_v9 }
 0x3fd   : > { %v2049_v28 = vpack.c.bf16 %v10305_v37, %v10302_v31 }
 0x3ff   : > { %10895 = vmatmul.mubr.msk.bf16.vlgmr.msra.gmra.mrb[48].mxu0 %vm1756_vm4, %v1594_v47  ;;  %v10306_v41 = vpop.f32.mrb[52].mxu1 }
 0x400   : > { %10903 = vmatpush3.bf16.msra.mxu0 %v11586_v13  ;;  %10898 = vmatprep.mubr.msk.bf16.mxu0 %vm1756_vm4, %v1595_v6  ;;  %v10307_v43 = vpop.f32.mrb[53].mxu1  ;;  %v11591_v6 = vld [vmem:[%s15216_s30 + $0x68] sm:$0xff]   ;;  %v11622_v13 = vld [vmem:[%s15214_s6 + $0x214] ss:$8 sps:$4 sm:$0xff]  }
 0x401   : > { %10904 = vmatprep.subr.bf16.mxu0 %v11587_v38  ;;  %v10308_v46 = vadd.f32 %v10307_v43, %v10306_v41  ;;  %v10309_v47 = vpop.f32.mrb[54].mxu1  ;;  %3440 = vmatprep.mubr.bf16.mxu1 %v11622_v13 }
 0x402   : > { %v10310_v49 = vpop.f32.mrb[55].mxu1 }
 0x403   : > { %v10311_v52 = vadd.f32 %v10310_v49, %v10309_v47  ;;  %v11630_v49 = vld [vmem:[%s15214_s6 + $0x230] ss:$8 sps:$4 sm:$0xff]  }
 0x404   : > { %10905 = vmatpush3.bf16.msra.mxu0 %v11587_v38  ;;  %3441 = vmatmul.mubr.bf16.gmra.mrb[132].mxu1 %v11624_v22  ;;  %v11627_v38 = vld [vmem:[%s15214_s6 + $0x220] ss:$8 sps:$4 sm:$0xff]  }
 0x405   : > { %10906 = vmatprep.subr.bf16.mxu0 %v11588_v45  ;;  %v2050_v55 = vpack.c.bf16 %v10311_v52, %v10308_v46  ;;  %3448 = vmatprep.mubr.bf16.mxu1 %v11625_v30  ;;  %v11595_v46 = vld [vmem:[%s15216_s30 + $0x88] sm:$0xff]   ;;  %v11596_v52 = vld [vmem:[%s15216_s30 + $0x90] sm:$0xff]  }
 0x407   : > { %10899 = vmatmul.mubr.msk.bf16.gmra.mrb[52].mxu0 %vm1756_vm4, %v1596_v23  ;;  %v10312_v58 = vpop.f32.mrb[56].mxu1 }
 0x408   : > { %10907 = vmatpush3.bf16.msra.mxu0 %v11588_v45  ;;  %v10313_v59 = vpop.f32.mrb[57].mxu1  ;;  %10910 = vmatprep.mubr.msk.bf16.mxu0 %vm1756_vm4, %v2049_v28 }
 0x409   : > { %10908 = vmatprep.subr.bf16.mxu0 %v11589_v56  ;;  %v10314_v61 = vadd.f32 %v10313_v59, %v10312_v58  ;;  %v10315_v62 = vpop.f32.mrb[58].mxu1 }
 0x40a   : > { %v10316_v1 = vpop.f32.mrb[59].mxu1 }
 0x40b   : > { %v10317_v24 = vadd.f32 %v10316_v1, %v10315_v62 }
 0x40c   : > { %10909 = vmatpush3.bf16.msra.mxu0 %v11589_v56  ;;  %3449 = vmatmul.mubr.bf16.gmra.mrb[136].mxu1 %v11627_v38 }
 0x40d   : > { %v2051_v57 = vpack.c.bf16 %v10317_v24, %v10314_v61  ;;  %10918 = vmatprep.subr.bf16.mxu0 %v11590_v63  ;;  %3456 = vmatprep.mubr.bf16.mxu1 %v11628_v42 }
 0x40f   : > { %v10318_v7 = vpop.f32.mrb[60].mxu1  ;;  %10911 = vmatmul.mubr.msk.bf16.vlgmr.msra.gmra.mrb[48].mxu0 %vm1756_vm4, %v2050_v55 }
 0x410   : > { %10919 = vmatpush3.bf16.msra.mxu0 %v11590_v63  ;;  %v10319_v8 = vpop.f32.mrb[61].mxu1  ;;  %10914 = vmatprep.mubr.msk.bf16.mxu0 %vm1756_vm4, %v2051_v57 }
 0x411   : > { %v10320_v10 = vadd.f32 %v10319_v8, %v10318_v7  ;;  %v10321_v11 = vpop.f32.mrb[62].mxu1  ;;  %10920 = vmatprep.subr.bf16.mxu0 %v11591_v6 }
 0x412   : > { %v10322_v14 = vpop.f32.mrb[63].mxu1 }
 0x413   : > { %v10323_v15 = vadd.f32 %v10322_v14, %v10321_v11 }
 0x414   : > { %10921 = vmatpush3.bf16.msra.mxu0 %v11591_v6  ;;  %3457 = vmatmul.mubr.bf16.gmra.mrb[140].mxu1 %v11630_v49 }
 0x415   : > { %v2052_v16 = vpack.c.bf16 %v10323_v15, %v10320_v10  ;;  %10922 = vmatprep.subr.bf16.mxu0 %v11592_v12 }
 0x417   : > { %v10348_v20 = vpop.f32.mrb[64].mxu1  ;;  %10915 = vmatmul.mubr.msk.bf16.gmra.mrb[52].mxu0 %vm1756_vm4, %v2052_v16 }
 0x418   : > { %v10349_v21 = vpop.f32.mrb[65].mxu1  ;;  %10923 = vmatpush3.bf16.msra.mxu0 %v11592_v12 }
 0x419   : > { %v10350_v23 = vadd.f32 %v10349_v21, %v10348_v20  ;;  %v10351_v27 = vpop.f32.mrb[66].mxu1  ;;  %10924 = vmatprep.subr.bf16.mxu0 %v11593_v19 }
 0x41a   : > { %v10352_v31 = vpop.f32.mrb[67].mxu1 }
 0x41b   : > { %v10353_v32 = vadd.f32 %v10352_v31, %v10351_v27 }
 0x41c   : > { %10925 = vmatpush3.bf16.msra.mxu0 %v11593_v19 }
 0x41d   : > { %v2285_v33 = vpack.c.bf16 %v10353_v32, %v10350_v23  ;;  %10934 = vmatprep.subr.bf16.mxu0 %v11594_v29 }
 0x41f   : > { %v10354_v36 = vpop.f32.mrb[68].mxu1  ;;  %10926 = vmatprep.mubr.msk.bf16.mxu0 %vm1756_vm4, %v2285_v33 }
 0x420   : > { %v10355_v37 = vpop.f32.mrb[69].mxu1 }
 0x421   : > { %v10356_v28 = vadd.f32 %v10355_v37, %v10354_v36  ;;  %v10357_v41 = vpop.f32.mrb[70].mxu1 }
 0x422   : > { %v10358_v43 = vpop.f32.mrb[71].mxu1 }
 0x423   : > { %v10359_v44 = vadd.f32 %v10358_v43, %v10357_v41 }
 0x425   : > { %v2286_v45 = vpack.c.bf16 %v10359_v44, %v10356_v28 }
 0x427   : > { %10927 = vmatmul.mubr.msk.bf16.vlgmr.msra.gmra.mrb[48].mxu0 %vm1756_vm4, %v2286_v45  ;;  %v10360_v47 = vpop.f32.mrb[72].mxu1 }
 0x428   : > { %10935 = vmatpush3.bf16.msra.mxu0 %v11594_v29  ;;  %v10361_v48 = vpop.f32.mrb[73].mxu1 }
 0x429   : > { %10936 = vmatprep.subr.bf16.mxu0 %v11595_v46  ;;  %v10362_v55 = vadd.f32 %v10361_v48, %v10360_v47  ;;  %v10363_v56 = vpop.f32.mrb[74].mxu1 }
 0x42a   : > { %v10364_v58 = vpop.f32.mrb[75].mxu1 }
 0x42b   : > { %v10365_v59 = vadd.f32 %v10364_v58, %v10363_v56 }
 0x42c   : > { %10937 = vmatpush3.bf16.msra.mxu0 %v11595_v46 }
 0x42d   : > { %10938 = vmatprep.subr.bf16.mxu0 %v11596_v52  ;;  %v2287_v61 = vpack.c.bf16 %v10365_v59, %v10362_v55  ;;  %v11632_v59 = vld [vmem:[%s15216_s30 + $0xa8] sm:$0xff]  }
 0x42f   : > { %v10366_v62 = vpop.f32.mrb[76].mxu1  ;;  %10930 = vmatprep.mubr.msk.bf16.mxu0 %vm1756_vm4, %v2287_v61 }
 0x430   : > { %10939 = vmatpush3.bf16.msra.mxu0 %v11596_v52  ;;  %v10367_v63 = vpop.f32.mrb[77].mxu1 }
 0x431   : > { %10940 = vmatprep.subr.bf16.mxu0 %v11597_v60  ;;  %v10368_v0 = vadd.f32 %v10367_v63, %v10366_v62  ;;  %v10369_v1 = vpop.f32.mrb[78].mxu1 }
 0x432   : > { %v10370_v24 = vpop.f32.mrb[79].mxu1 }
 0x433   : > { %v10371_v57 = vadd.f32 %v10370_v24, %v10369_v1  ;;  %v11633_v1 = vld [vmem:[%s15216_s30 + $0xb0] sm:$0xff]  }
 0x434   : > { %10941 = vmatpush3.bf16.msra.mxu0 %v11597_v60 }
 0x435   : > { %10428 = vmatprep.subr.bf16.mxu0 %v13085_v18  ;;  %v2288_v6 = vpack.c.bf16 %v10371_v57, %v10368_v0 }
 0x437   : > { %v10396_v7 = vpop.f32.mrb[80].mxu1  ;;  %10931 = vmatmul.mubr.msk.bf16.gmra.mrb[52].mxu0 %vm1756_vm4, %v2288_v6 }
 0x438   : > { %v10397_v8 = vpop.f32.mrb[81].mxu1 }
 0x439   : > { %v10398_v9 = vadd.f32 %v10397_v8, %v10396_v7  ;;  %v10399_v10 = vpop.f32.mrb[82].mxu1 }
 0x43a   : > { %v10400_v11 = vpop.f32.mrb[83].mxu1 }
 0x43b   : > { %v10401_v12 = vadd.f32 %v10400_v11, %v10399_v10 }
 0x43d   : > { %v2521_v13 = vpack.c.bf16 %v10401_v12, %v10398_v9  ;;  %v11634_v9 = vld [vmem:[%s15216_s30 + $0xb8] sm:$0xff]  }
 0x43f   : > { %v10402_v14 = vpop.f32.mrb[84].mxu1  ;;  %10942 = vmatprep.mubr.msk.bf16.mxu0 %vm1756_vm4, %v2521_v13 }
 0x440   : > { %v10403_v15 = vpop.f32.mrb[85].mxu1 }
 0x441   : > { %v10404_v16 = vadd.f32 %v10403_v15, %v10402_v14  ;;  %v10405_v19 = vpop.f32.mrb[86].mxu1 }
 0x442   : > { %v10406_v20 = vpop.f32.mrb[87].mxu1 }
 0x443   : > { %v10407_v21 = vadd.f32 %v10406_v20, %v10405_v19 }
 0x445   : > { %v2522_v22 = vpack.c.bf16 %v10407_v21, %v10404_v16  ;;  %v13603_v21 = vld [vmem:[%s15216_s30 + $0xc0] sm:$0xff]  }
 0x447   : > { %10943 = vmatmul.mubr.msk.bf16.vlgmr.msra.gmra.mrb[48].mxu0 %vm1756_vm4, %v2522_v22  ;;  %v10408_v18 = vpop.f32.mrb[88].mxu1 }
 0x448   : > { %10429 = vmatpush3.bf16.msra.mxu0 %v13053_v26  ;;  %v10409_v23 = vpop.f32.mrb[89].mxu1 }
 0x449   : > { %10430 = vmatprep.subr.bf16.mxu0 %v13083_v17  ;;  %v10410_v27 = vadd.f32 %v10409_v23, %v10408_v18  ;;  %v10411_v29 = vpop.f32.mrb[90].mxu1 }
 0x44a   : > { %v10412_v30 = vpop.f32.mrb[91].mxu1 }
 0x44b   : > { %v10413_v31 = vadd.f32 %v10412_v30, %v10411_v29 }
 0x44c   : > { %10431 = vmatpush3.bf16.msra.mxu0 %v13051_v25  ;;  %v11600_v25 = vld [vmem:[%s15214_s6 + $0x144] ss:$8 sps:$4 sm:$0xff]  }
 0x44d   : > { %10432 = vmatprep.subr.bf16.mxu0 %v13101_v35  ;;  %v2523_v32 = vpack.c.bf16 %v10413_v31, %v10410_v27 }
 0x44f   : > { %v10414_v33 = vpop.f32.mrb[92].mxu1  ;;  %10946 = vmatprep.mubr.msk.bf16.mxu0 %vm1756_vm4, %v2523_v32 }
 0x450   : > { %10433 = vmatpush3.bf16.msra.mxu0 %v13061_v40  ;;  %v10415_v36 = vpop.f32.mrb[93].mxu1 }
 0x451   : > { %10434 = vmatprep.subr.bf16.mxu0 %v13097_v34  ;;  %v10416_v26 = vadd.f32 %v10415_v36, %v10414_v33  ;;  %v10417_v37 = vpop.f32.mrb[94].mxu1 }
 0x452   : > { %v10418_v17 = vpop.f32.mrb[95].mxu1 }
 0x453   : > { %v10419_v38 = vadd.f32 %v10418_v17, %v10417_v37 }
 0x454   : > { %10435 = vmatpush3.bf16.msra.mxu0 %v13059_v39  ;;  %v11631_v39 = vld [vmem:[%s15216_s30 + $0xa0] sm:$0xff]  }
 0x455   : > { %10436 = vmatprep.subr.bf16.mxu0 %v13117_v51  ;;  %v2524_v35 = vpack.c.bf16 %v10419_v38, %v10416_v26  ;;  %v11607_v51 = vld [vmem:[%s15214_s6 + $0x174] ss:$8 sps:$4 sm:$0xff]  }
 0x457   : > { %10947 = vmatmul.mubr.msk.bf16.gmra.mrb[52].mxu0 %vm1756_vm4, %v2524_v35  ;;  %v10492_v28 = vpop.f32.mrb[96].mxu1 }
 0x458   : > { %10437 = vmatpush3.bf16.msra.mxu0 %v13069_v54  ;;  %2724 = vmatprep.mubr.bf16.mxu0 %v11600_v25  ;;  %v10493_v40 = vpop.f32.mrb[97].mxu1  ;;  %v11598_v54 = vld [vmem:[%s15214_s6 + $0x140] ss:$8 sps:$4 sm:$0xff]  }
 0x459   : > { %10438 = vmatprep.subr.bf16.mxu0 %v13113_v50  ;;  %v13532_v34 = vadd.f32 %v10493_v40, %v10492_v28  ;;  %v10495_v41 = vpop.f32.mrb[98].mxu1  ;;  %v11604_v50 = vld [vmem:[%s15214_s6 + $0x164] ss:$8 sps:$4 sm:$0xff]  }
 0x45c   : > { %10439 = vmatpush3.bf16.msra.mxu0 %v13067_v53  ;;  %v11601_v53 = vld [vmem:[%s15214_s6 + $0x154] ss:$8 sps:$4 sm:$0xff]  }
 0x45d   : > { %10440 = vmatprep.subr.bf16.mxu0 %v13133_v5  ;;  %v10496_v5 = vpop.f32.mrb[99].mxu1 }
 0x45e   : > { %v13563_v42 = vadd.f32 %v10496_v5, %v10495_v41 }
 0x45f   : > { %v10498_v44 = vpop.f32.mrb[100].mxu1 }
 0x460   : > { %10441 = vmatpush3.bf16.msra.mxu0 %v13077_v4  ;;  %v11603_v4 = vld [vmem:[%s15214_s6 + $0x150] ss:$8 sps:$4 sm:$0xff]   ;;  %v2993_v43 = vpack.c.bf16 %v13563_v42, %v13532_v34  ;;  %v10499_v45 = vpop.f32.mrb[101].mxu1 }
 0x461   : > { %10442 = vmatprep.subr.bf16.mxu0 %v13129_v2  ;;  %v11611_v2 = vld [vmem:[%s15214_s6 + $0x170] ss:$8 sps:$4 sm:$0xff]   ;;  %v10501_v46 = vpop.f32.mrb[102].mxu1  ;;  %v13567_v48 = vadd.f32 %v10499_v45, %v10498_v44 }
 0x462   : > { %v10502_v47 = vpop.f32.mrb[103].mxu1  ;;  %v11641_v34 = vld [vmem:[%s15216_s30 + $0xf0] sm:$0xff]   ;;  %v11642_v42 = vld [vmem:[%s15216_s30 + $0xf8] sm:$0xff]  }
 0x463   : > { %v13569_v49 = vadd.f32 %v10502_v47, %v10501_v46 }
 0x464   : > { %10443 = vmatpush3.bf16.msra.mxu0 %v13075_v3  ;;  %v11606_v3 = vld [vmem:[%s15214_s6 + $0x160] ss:$8 sps:$4 sm:$0xff]  }
 0x465   : > { %10950 = vmatprep.subr.bf16.mxu0 %v11631_v39  ;;  %v2994_v52 = vpack.c.bf16 %v13569_v49, %v13567_v48  ;;  %v11644_v48 = vld [vmem:[%s15216_s30 + $0x108] sm:$0xff]   ;;  %v11645_v49 = vld [vmem:[%s15216_s30 + $0x110] sm:$0xff]  }
 0x467   : > { %2725 = vmatmul.mubr.bf16.vlgmr.msra.gmra.mrb[56].mxu0 %v11598_v54  ;;  %v10504_v55 = vpop.f32.mrb[104].mxu1 }
 0x468   : > { %2732 = vmatprep.mubr.bf16.mxu0 %v11601_v53  ;;  %10951 = vmatpush3.bf16.msra.mxu0 %v11631_v39  ;;  %v10505_v56 = vpop.f32.mrb[105].mxu1 }
 0x469   : > { %v10507_v58 = vpop.f32.mrb[106].mxu1  ;;  %v13576_v61 = vadd.f32 %v10505_v56, %v10504_v55  ;;  %10952 = vmatprep.subr.bf16.mxu0 %v11632_v59 }
 0x46a   : > { %v10508_v60 = vpop.f32.mrb[107].mxu1 }
 0x46b   : > { %v13578_v62 = vadd.f32 %v10508_v60, %v10507_v58 }
 0x46c   : > { %10953 = vmatpush3.bf16.msra.mxu0 %v11632_v59 }
 0x46d   : > { %v2995_v63 = vpack.c.bf16 %v13578_v62, %v13576_v61  ;;  %10954 = vmatprep.subr.bf16.mxu0 %v11633_v1  ;;  %v11647_v61 = vld [vmem:[#allocation6] sm:$0xff]   ;;  %v11648_v62 = vld [vmem:[#allocation6 + $0x8] sm:$0xff]  }
 0x46f   : > { %2733 = vmatmul.mubr.bf16.gmra.mrb[60].mxu0 %v11603_v4  ;;  %v10510_v0 = vpop.f32.mrb[108].mxu1 }
 0x470   : > { %2740 = vmatprep.mubr.bf16.mxu0 %v11604_v50  ;;  %v10511_v24 = vpop.f32.mrb[109].mxu1  ;;  %10955 = vmatpush3.bf16.msra.mxu0 %v11633_v1 }
 0x471   : > { %v10513_v57 = vpop.f32.mrb[110].mxu1  ;;  %v13585_v7 = vadd.f32 %v10511_v24, %v10510_v0  ;;  %10956 = vmatprep.subr.bf16.mxu0 %v11634_v9 }
 0x472   : > { %v10514_v6 = vpop.f32.mrb[111].mxu1 }
 0x473   : > { %v13587_v8 = vadd.f32 %v10514_v6, %v10513_v57 }
 0x474   : > { %10957 = vmatpush3.bf16.msra.mxu0 %v11634_v9 }
 0x475   : > { %v2996_v10 = vpack.c.bf16 %v13587_v8, %v13585_v7  ;;  %10966 = vmatprep.subr.bf16.mxu0 %v13603_v21  ;;  %v11650_v7 = vld [vmem:[#allocation6 + $0x18] sm:$0xff]   ;;  %v9254_v8 = vld [vmem:[%s15149_s7] ss:$0 sm:$0xff] }
 0x477   : > { %2741 = vmatmul.mubr.bf16.gmra.mrb[64].mxu0 %v11606_v3  ;;  %v10540_v11 = vpop.f32.mrb[112].mxu1 }
 0x478   : > { %2748 = vmatprep.mubr.bf16.mxu0 %v11607_v51  ;;  %v10541_v12 = vpop.f32.mrb[113].mxu1 }
 0x479   : > { %v10543_v13 = vpop.f32.mrb[114].mxu1  ;;  %v13594_v15 = vadd.f32 %v10541_v12, %v10540_v11 }
 0x47a   : > { %v10544_v14 = vpop.f32.mrb[115].mxu1 }
 0x47b   : > { %v13596_v16 = vadd.f32 %v10544_v14, %v10543_v13 }
 0x47d   : > { %v3229_v19 = vpack.c.bf16 %v13596_v16, %v13594_v15 }
 0x47f   : > { %2749 = vmatmul.mubr.bf16.gmra.mrb[68].mxu0 %v11611_v2 }
 0x4b7   : > { %v10546_v20 = vpop.f32.mrb[116].mxu1 }
 0x4b8   : > { %v10547_v22 = vpop.f32.mrb[117].mxu1 }
 0x4b9   : > { %v10549_v18 = vpop.f32.mrb[118].mxu1  ;;  %v13606_v27 = vadd.f32 %v10547_v22, %v10546_v20 }
 0x4ba   : > { %v10550_v23 = vpop.f32.mrb[119].mxu1 }
 0x4bb   : > { %v13608_v29 = vadd.f32 %v10550_v23, %v10549_v18 }
 0x4bd   : > { %v3230_v30 = vpack.c.bf16 %v13608_v29, %v13606_v27 }
 0x4bf   : > { %v10552_v31 = vpop.f32.mrb[120].mxu1 }
 0x4c0   : > { %v10553_v32 = vpop.f32.mrb[121].mxu1 }
 0x4c1   : > { %v10555_v33 = vpop.f32.mrb[122].mxu1  ;;  %v13612_v26 = vadd.f32 %v10553_v32, %v10552_v31 }
 0x4c2   : > { %v10556_v36 = vpop.f32.mrb[123].mxu1 }
 0x4c3   : > { %v13614_v37 = vadd.f32 %v10556_v36, %v10555_v33 }
 0x4c5   : > { %v3231_v17 = vpack.c.bf16 %v13614_v37, %v13612_v26 }
 0x4c7   : > { %v10558_v38 = vpop.f32.mrb[124].mxu1 }
 0x4c8   : > { %v10559_v25 = vpop.f32.mrb[125].mxu1 }
 0x4c9   : > { %v10561_v35 = vpop.f32.mrb[126].mxu1  ;;  %v13618_v40 = vadd.f32 %v10559_v25, %v10558_v38 }
 0x4ca   : > { %v10562_v28 = vpop.f32.mrb[127].mxu1 }
 0x4cb   : > { %v13620_v41 = vadd.f32 %v10562_v28, %v10561_v35 }
 0x4cd   : > { %v3232_v39 = vpack.c.bf16 %v13620_v41, %v13618_v40 }
 0x4cf   : > { %v10588_v54 = vpop.f32.mrb[128].mxu1 }
 0x4d0   : > { %v10589_v53 = vpop.f32.mrb[129].mxu1 }
 0x4d1   : > { %v10591_v4 = vpop.f32.mrb[130].mxu1  ;;  %v13624_v3 = vadd.f32 %v10589_v53, %v10588_v54 }
 0x4d2   : > { %v10592_v50 = vpop.f32.mrb[131].mxu1 }
 0x4d3   : > { %v13626_v51 = vadd.f32 %v10592_v50, %v10591_v4  ;;  %v11636_v50 = vld [vmem:[%s15216_s30 + $0xc8] sm:$0xff]  }
 0x4d5   : > { %v3465_v2 = vpack.c.bf16 %v13626_v51, %v13624_v3 }
 0x4d7   : > { %v10594_v5 = vpop.f32.mrb[132].mxu1 }
 0x4d8   : > { %v10595_v44 = vpop.f32.mrb[133].mxu1 }
 0x4d9   : > { %v10597_v45 = vpop.f32.mrb[134].mxu1  ;;  %v13630_v47 = vadd.f32 %v10595_v44, %v10594_v5 }
 0x4da   : > { %v10598_v46 = vpop.f32.mrb[135].mxu1 }
 0x4db   : > { %v13632_v55 = vadd.f32 %v10598_v46, %v10597_v45 }
 0x4dd   : > { %v3466_v56 = vpack.c.bf16 %v13632_v55, %v13630_v47 }
 0x4df   : > { %v10600_v58 = vpop.f32.mrb[136].mxu1 }
 0x4e0   : > { %v10601_v59 = vpop.f32.mrb[137].mxu1 }
 0x4e1   : > { %v10603_v60 = vpop.f32.mrb[138].mxu1  ;;  %v13636_v1 = vadd.f32 %v10601_v59, %v10600_v58  ;;  %v11637_v58 = vld [vmem:[%s15216_s30 + $0xd0] sm:$0xff]  }
 0x4e2   : > { %v10604_v0 = vpop.f32.mrb[139].mxu1 }
 0x4e3   : > { %v13638_v24 = vadd.f32 %v10604_v0, %v10603_v60 }
 0x4e5   : > { %v3467_v57 = vpack.c.bf16 %v13638_v24, %v13636_v1 }
 0x4e7   : > { %v10606_v6 = vpop.f32.mrb[140].mxu1 }
 0x4e8   : > { %v10607_v9 = vpop.f32.mrb[141].mxu1 }
 0x4e9   : > { %v10609_v11 = vpop.f32.mrb[142].mxu1  ;;  %v13642_v12 = vadd.f32 %v10607_v9, %v10606_v6  ;;  %v11638_v6 = vld [vmem:[%s15216_s30 + $0xd8] sm:$0xff]  }
 0x4ea   : > { %v10610_v13 = vpop.f32.mrb[143].mxu1 }
 0x4eb   : > { %v13644_v14 = vadd.f32 %v10610_v13, %v10609_v11 }
 0x4ed   : > { %v3468_v20 = vpack.c.bf16 %v13644_v14, %v13642_v12 }
 0x53a   : > { %v10444_v22 = vpop.f32.mrb[56].mxu0 }
 0x53b   : > { %v10445_v18 = vpop.f32.mrb[57].mxu0 }
 0x53c   : > { %v10446_v23 = vadd.f32 %v10445_v18, %v10444_v22  ;;  %v10447_v31 = vpop.f32.mrb[58].mxu0  ;;  %v11639_v22 = vld [vmem:[%s15216_s30 + $0xe0] sm:$0xff]  }
 0x53d   : > { %v10448_v32 = vpop.f32.mrb[59].mxu0 }
 0x53e   : > { %v10449_v33 = vadd.f32 %v10448_v32, %v10447_v31  ;;  %v11640_v32 = vld [vmem:[%s15216_s30 + $0xe8] sm:$0xff]  }
 0x540   : > { %v2757_v36 = vpack.c.bf16 %v10449_v33, %v10446_v23 }
 0x542   : > { %v10450_v38 = vpop.f32.mrb[60].mxu0  ;;  %10958 = vmatprep.mubr.msk.bf16.mxu0 %vm1756_vm4, %v2757_v36 }
 0x543   : > { %v10451_v25 = vpop.f32.mrb[61].mxu0 }
 0x544   : > { %v10452_v35 = vadd.f32 %v10451_v25, %v10450_v38  ;;  %v10453_v28 = vpop.f32.mrb[62].mxu0  ;;  %v12585_v25 = vmov 0.0  }
 0x545   : > { %v10454_v54 = vpop.f32.mrb[63].mxu0  ;;  %11030 = vmatprep.subr.bf16.mxu1 %v12585_v25  ;;  %11038 = vmatprep.mubr.msk.bf16.mxu1 %vm12586_vm5, %v12585_v25 }
 0x546   : > { %v10455_v53 = vadd.f32 %v10454_v54, %v10453_v28 }
 0x548   : > { %v2758_v4 = vpack.c.bf16 %v10455_v53, %v10452_v35  ;;  %v9255_v35 = vld [vmem:[%s15151_s9] ss:$0 sm:$0xff] }
 0x54a   : > { %v10456_v5 = vpop.f32.mrb[64].mxu0  ;;  %10959 = vmatmul.mubr.msk.bf16.vlgmr.msra.gmra.mrb[48].mxu0 %vm1756_vm4, %v2758_v4 }
 0x54b   : > { %v10457_v44 = vpop.f32.mrb[65].mxu0  ;;  %10967 = vmatpush3.bf16.msra.mxu0 %v13603_v21 }
 0x54c   : > { %v10458_v45 = vadd.f32 %v10457_v44, %v10456_v5  ;;  %v10459_v46 = vpop.f32.mrb[66].mxu0  ;;  %10968 = vmatprep.subr.bf16.mxu0 %v11636_v50 }
 0x54d   : > { %v10460_v59 = vpop.f32.mrb[67].mxu0 }
 0x54e   : > { %v10461_v60 = vadd.f32 %v10460_v59, %v10459_v46 }
 0x54f   : > { %10969 = vmatpush3.bf16.msra.mxu0 %v11636_v50 }
 0x550   : > { %v2759_v0 = vpack.c.bf16 %v10461_v60, %v10458_v45  ;;  %10970 = vmatprep.subr.bf16.mxu0 %v11637_v58 }
 0x552   : > { %v10462_v9 = vpop.f32.mrb[68].mxu0  ;;  %10962 = vmatprep.mubr.msk.bf16.mxu0 %vm1756_vm4, %v2759_v0 }
 0x553   : > { %v10463_v21 = vpop.f32.mrb[69].mxu0  ;;  %10971 = vmatpush3.bf16.msra.mxu0 %v11637_v58 }
 0x554   : > { %v10464_v11 = vadd.f32 %v10463_v21, %v10462_v9  ;;  %v10465_v13 = vpop.f32.mrb[70].mxu0  ;;  %10972 = vmatprep.subr.bf16.mxu0 %v11638_v6 }
 0x555   : > { %v10466_v18 = vpop.f32.mrb[71].mxu0 }
 0x556   : > { %v10467_v23 = vadd.f32 %v10466_v18, %v10465_v13 }
 0x557   : > { %10973 = vmatpush3.bf16.msra.mxu0 %v11638_v6 }
 0x558   : > { %v2760_v31 = vpack.c.bf16 %v10467_v23, %v10464_v11  ;;  %10982 = vmatprep.subr.bf16.mxu0 %v11639_v22 }
 0x55a   : > { %10963 = vmatmul.mubr.msk.bf16.gmra.mrb[52].mxu0 %vm1756_vm4, %v2760_v31 }
 0x55b   : > { %10974 = vmatprep.mubr.msk.bf16.mxu0 %vm1756_vm4, %v2993_v43  ;;  %v11643_v43 = vld [vmem:[%s15216_s30 + $0x100] sm:$0xff]  }
 0x562   : > { %10975 = vmatmul.mubr.msk.bf16.vlgmr.msra.gmra.mrb[48].mxu0 %vm1756_vm4, %v2994_v52  ;;  %v11646_v52 = vld [vmem:[%s15216_s30 + $0x118] sm:$0xff]  }
 0x563   : > { %10978 = vmatprep.mubr.msk.bf16.mxu0 %vm1756_vm4, %v2995_v63  ;;  %10983 = vmatpush3.bf16.msra.mxu0 %v11639_v22  ;;  %v11649_v63 = vld [vmem:[#allocation6 + $0x10] sm:$0xff]  }
 0x564   : > { %10984 = vmatprep.subr.bf16.mxu0 %v11640_v32 }
 0x567   : > { %10985 = vmatpush3.bf16.msra.mxu0 %v11640_v32 }
 0x568   : > { %10986 = vmatprep.subr.bf16.mxu0 %v11641_v34 }
 0x56a   : > { %10979 = vmatmul.mubr.msk.bf16.gmra.mrb[52].mxu0 %vm1756_vm4, %v2996_v10 }
 0x56b   : > { %10987 = vmatpush3.bf16.msra.mxu0 %v11641_v34  ;;  %10990 = vmatprep.mubr.msk.bf16.mxu0 %vm1756_vm4, %v3229_v19 }
 0x56c   : > { %10988 = vmatprep.subr.bf16.mxu0 %v11642_v42 }
 0x56f   : > { %10989 = vmatpush3.bf16.msra.mxu0 %v11642_v42 }
 0x570   : > { %10998 = vmatprep.subr.bf16.mxu0 %v11643_v43 }
 0x572   : > { %10991 = vmatmul.mubr.msk.bf16.vlgmr.msra.gmra.mrb[48].mxu0 %vm1756_vm4, %v3230_v30 }
 0x573   : > { %10999 = vmatpush3.bf16.msra.mxu0 %v11643_v43  ;;  %10994 = vmatprep.mubr.msk.bf16.mxu0 %vm1756_vm4, %v3231_v17 }
 0x574   : > { %11000 = vmatprep.subr.bf16.mxu0 %v11644_v48 }
 0x577   : > { %11001 = vmatpush3.bf16.msra.mxu0 %v11644_v48 }
 0x578   : > { %11002 = vmatprep.subr.bf16.mxu0 %v11645_v49 }
 0x57a   : > { %10995 = vmatmul.mubr.msk.bf16.gmra.mrb[52].mxu0 %vm1756_vm4, %v3232_v39 }
 0x57b   : > { %11003 = vmatpush3.bf16.msra.mxu0 %v11645_v49  ;;  %11006 = vmatprep.mubr.msk.bf16.mxu0 %vm1756_vm4, %v3465_v2 }
 0x57c   : > { %11004 = vmatprep.subr.bf16.mxu0 %v11646_v52 }
 0x57f   : > { %11005 = vmatpush3.bf16.msra.mxu0 %v11646_v52  ;;  %v11651_v52 = vld [vmem:[#allocation7 + $0x8] sm:$0xff]  }
 0x580   : > { %11014 = vmatprep.subr.bf16.mxu0 %v11647_v61 }
 0x582   : > { %11007 = vmatmul.mubr.msk.bf16.vlgmr.msra.gmra.mrb[48].mxu0 %vm1756_vm4, %v3466_v56 }
 0x583   : > { %11010 = vmatprep.mubr.msk.bf16.mxu0 %vm1756_vm4, %v3467_v57  ;;  %11015 = vmatpush3.bf16.msra.mxu0 %v11647_v61  ;;  %v11652_v61 = vld [vmem:[#allocation7] sm:$0xff]  }
 0x584   : > { %11016 = vmatprep.subr.bf16.mxu0 %v11648_v62 }
 0x587   : > { %11017 = vmatpush3.bf16.msra.mxu0 %v11648_v62  ;;  %v11653_v62 = vld [vmem:[%s15153_s11 + $0x40] sm:$0xff]  }
 0x588   : > { %11018 = vmatprep.subr.bf16.mxu0 %v11649_v63 }
 0x58a   : > { %11011 = vmatmul.mubr.msk.bf16.gmra.mrb[52].mxu0 %vm1756_vm4, %v3468_v20 }
 0x58b   : > { %11019 = vmatpush3.bf16.msra.mxu0 %v11649_v63  ;;  %v11660_v63 = vld [vmem:[%s15153_s11] sm:$0xff]  }
 0x58c   : > { %11020 = vmatprep.subr.bf16.mxu0 %v11650_v7 }
 0x58f   : > { %11021 = vmatpush3.bf16.msra.mxu0 %v11650_v7  ;;  %v11654_v7 = vld [vmem:[%s15153_s11 + $0x48] sm:$0xff]  }
 0x590   : > { %11042 = vmatprep.subr.bf16.mxu0 %v12585_v25 }
 0x655   : > { %v11008_v10 = vpop.f32.mrb[48].mxu0 }
 0x656   : > { %v3596_v15 = vadd.f32 %v11008_v10, %v9254_v8  ;;  %v3548_v16 = vpop.f32.mrb[49].mxu0  ;;  %v11656_v10 = vld [vmem:[%s15153_s11 + $0x58] sm:$0xff]  }
 0x657   : > { %v3594_v19 = vadd.f32 %v9254_v8, %v3548_v16  ;;  %v11009_v27 = vpop.f32.mrb[50].mxu0  ;;  %v11658_v16 = vld [vmem:[%s15153_s11 + $0x68] sm:$0xff]  }
 0x658   : > { %v3597_v29 = vadd.f32 %v11009_v27, %v9254_v8  ;;  %v3551_v30 = vpop.f32.mrb[51].mxu0  ;;  %v3604_v37 = vmax.f32 %v3596_v15, 0.0  ;;  %v11657_v15 = vld [vmem:[%s15153_s11 + $0x60] sm:$0xff]   ;;  %v11662_v27 = vld [vmem:[%s15153_s11 + $0x8] sm:$0xff]  }
 0x659   : > { %v3595_v26 = vadd.f32 %v9254_v8, %v3551_v30  ;;  %v3602_v40 = vmax.f32 %v3594_v19, 0.0  ;;  %v11659_v19 = vld [vmem:[%s15153_s11 + $0x70] sm:$0xff]   ;;  %v11664_v30 = vld [vmem:[%s15153_s11 + $0x18] sm:$0xff]  }
 0x65a   : > { %v3605_v17 = vmax.f32 %v3597_v29, 0.0  ;;  %v11663_v29 = vld [vmem:[%s15153_s11 + $0x10] sm:$0xff]  }
 0x65b   : > { %v3603_v41 = vmax.f32 %v3595_v26, 0.0  ;;  %v11665_v26 = vld [vmem:[%s15153_s11 + $0x20] sm:$0xff]  }
 0x65c   : > { %v3611_v39 = vpack.c.bf16 %v3605_v17, %v3604_v37  ;;  %v11666_v37 = vld [vmem:[%s15153_s11 + $0x28] sm:$0xff]   ;;  %v11668_v17 = vld [vmem:[%s15153_s11 + $0x30] sm:$0xff]  }
 0x65d   : > { %v3610_v3 = vpack.c.bf16 %v3603_v41, %v3602_v40  ;;  %v11012_v51 = vpop.f32.mrb[52].mxu0  ;;  %v11661_v40 = vld [vmem:[%s15153_s11 + $0x78] sm:$0xff]  }
 0x65e   : > { %v3600_v2 = vadd.f32 %v11012_v51, %v9254_v8  ;;  %v3564_v47 = vpop.f32.mrb[53].mxu0  ;;  %v11669_v41 = vld [vmem:[%s15153_s11 + $0x38] sm:$0xff]  }
 0x65f   : > { %v3598_v55 = vadd.f32 %v9254_v8, %v3564_v47  ;;  %v11013_v56 = vpop.f32.mrb[54].mxu0  ;;  %11022 = vmatprep.mubr.msk.bf16.mxu0 %vm1756_vm4, %v3610_v3 }
 0x660   : > { %v3601_v1 = vadd.f32 %v11013_v56, %v9254_v8  ;;  %v3567_v24 = vpop.f32.mrb[55].mxu0  ;;  %11023 = vmatmul.mubr.msk.bf16.vlgmr.msra.gmra.mrb[72].mxu0 %vm1756_vm4, %v3611_v39  ;;  %v3608_v12 = vmax.f32 %v3600_v2, 0.0 }
 0x661   : > { %v3599_v57 = vadd.f32 %v9254_v8, %v3567_v24  ;;  %v3606_v20 = vmax.f32 %v3598_v55, 0.0  ;;  %v11655_v8 = vld [vmem:[%s15153_s11 + $0x50] sm:$0xff]  }
 0x662   : > { %v3609_v14 = vmax.f32 %v3601_v1, 0.0 }
 0x663   : > { %v3607_v33 = vmax.f32 %v3599_v57, 0.0  ;;  %v11671_v57 = vld [vmem:[%s15153_s11 + $0x80] sm:$0xff]  }
 0x664   : > { %v3613_v36 = vpack.c.bf16 %v3609_v14, %v3608_v12  ;;  %v11672_v14 = vld [vmem:[%s15153_s11 + $0x88] sm:$0xff]  }
 0x665   : > { %v3612_v38 = vpack.c.bf16 %v3607_v33, %v3606_v20  ;;  %v11673_v20 = vld [vmem:[%s15153_s11 + $0x90] sm:$0xff]   ;;  %v11674_v33 = vld [vmem:[%s15153_s11 + $0x98] sm:$0xff]  }
 0x667   : > { %11026 = vmatprep.mubr.msk.bf16.mxu0 %vm1756_vm4, %v3612_v38  ;;  %v11675_v38 = vld [vmem:[%s15153_s11 + $0xa0] sm:$0xff]  }
 0x668   : > { %11027 = vmatmul.mubr.msk.bf16.gmra.mrb[76].mxu0 %vm1756_vm4, %v3613_v36  ;;  %v11667_v36 = vld [vmem:[#allocation7 + $0x10] sm:$0xff]  }
 0x669   : > { %11050 = vmatprep.mubr.msk.bf16.mxu0 %vm12586_vm5, %v12585_v25 }
 0x733   : > { %v11024_v28 = vpop.f32.mrb[72].mxu0 }
 0x734   : > { %v3708_v54 = vadd.f32 %v11024_v28, %v9255_v35  ;;  %v3699_v53 = vpop.f32.mrb[73].mxu0  ;;  %v11670_v28 = vld [vmem:[#allocation7 + $0x18] sm:$0xff]  }
 0x735   : > { %v3700_v4 = vadd.f32 %v9255_v35, %v3699_v53  ;;  %v11025_v50 = vpop.f32.mrb[74].mxu0  ;;  %v11678_v53 = vld [vmem:[%s15153_s11 + $0xc8] sm:$0xff]  }
 0x736   : > { %v3711_v5 = vadd.f32 %v11025_v50, %v9255_v35  ;;  %v3702_v44 = vpop.f32.mrb[75].mxu0  ;;  %v3732_v46 = vmax.f32 %v3708_v54, 0.0  ;;  %v11676_v54 = vld [vmem:[%s15153_s11 + $0xc0] sm:$0xff]   ;;  %v11680_v50 = vld [vmem:[%s15153_s11 + $0xd0] sm:$0xff]  }
 0x737   : > { %v3703_v45 = vadd.f32 %v9255_v35, %v3702_v44  ;;  %v3730_v59 = vmax.f32 %v3700_v4, 0.0  ;;  %v11679_v4 = vld [vmem:[%s15153_s11 + $0xb0] sm:$0xff]   ;;  %v11682_v44 = vld [vmem:[%s15153_s11 + $0xd8] sm:$0xff]  }
 0x738   : > { %v3733_v58 = vmax.f32 %v3711_v5, 0.0  ;;  %v11681_v5 = vld [vmem:[%s15153_s11 + $0xb8] sm:$0xff]  }
 0x739   : > { %v3731_v60 = vmax.f32 %v3703_v45, 0.0  ;;  %v11683_v45 = vld [vmem:[%s15153_s11 + $0xe0] sm:$0xff]  }
 0x73a   : > { %v13750_v0 = vpack.c.bf16 %v3733_v58, %v3732_v46  ;;  %v11684_v46 = vld [vmem:[%s15153_s11 + $0xe8] sm:$0xff]   ;;  %v11685_v58 = vld [vmem:[%s15153_s11 + $0xf0] sm:$0xff]  }
 0x73b   : > { %v13752_v6 = vpack.c.bf16 %v3731_v60, %v3730_v59  ;;  %v11028_v9 = vpop.f32.mrb[76].mxu0  ;;  %v11686_v59 = vld [vmem:[%s15153_s11 + $0xf8] sm:$0xff]  }
 0x73c   : > { %v3724_v21 = vadd.f32 %v11028_v9, %v9255_v35  ;;  %v3715_v11 = vpop.f32.mrb[77].mxu0 }
 0x73d   : > { %v3716_v13 = vadd.f32 %v9255_v35, %v3715_v11  ;;  %v11029_v22 = vpop.f32.mrb[78].mxu0  ;;  %11031 = vmatpush3.bf16.msra.mxu1 %v13752_v6  ;;  %11043 = vmatpush3.bf16.msra.mxu0 %v13752_v6 }
 0x73e   : > { %v3727_v18 = vadd.f32 %v11029_v22, %v9255_v35  ;;  %v3718_v23 = vpop.f32.mrb[79].mxu0  ;;  %11032 = vmatprep.subr.bf16.mxu1 %v12585_v25  ;;  %11044 = vmatprep.subr.bf16.mxu0 %v12585_v25  ;;  %v3736_v32 = vmax.f32 %v3724_v21, 0.0 }
 0x73f   : > { %v3719_v31 = vadd.f32 %v9255_v35, %v3718_v23  ;;  %v3734_v42 = vmax.f32 %v3716_v13, 0.0  ;;  %v11677_v35 = vld [vmem:[%s15153_s11 + $0xa8] sm:$0xff]  }
 0x740   : > { %v3737_v34 = vmax.f32 %v3727_v18, 0.0 }
 0x741   : > { %v3735_v43 = vmax.f32 %v3719_v31, 0.0  ;;  %11033 = vmatpush3.bf16.msra.mxu1 %v13750_v0  ;;  %11045 = vmatpush3.bf16.msra.mxu0 %v13750_v0 }
 0x742   : > { %v13760_v48 = vpack.c.bf16 %v3737_v34, %v3736_v32  ;;  %11034 = vmatprep.subr.bf16.mxu1 %v12585_v25  ;;  %11046 = vmatprep.subr.bf16.mxu0 %v12585_v25 }
 0x743   : > { %v13764_v49 = vpack.c.bf16 %v3735_v43, %v3734_v42 }
 0x745   : > { %11035 = vmatpush3.bf16.msra.mxu1 %v13764_v49  ;;  %11047 = vmatpush3.bf16.msra.mxu0 %v13764_v49 }
 0x746   : > { %11036 = vmatprep.subr.bf16.mxu1 %v12585_v25  ;;  %11048 = vmatprep.subr.bf16.mxu0 %v12585_v25 }
 0x749   : > { %11037 = vmatpush3.bf16.msra.mxu1 %v13760_v48  ;;  %11049 = vmatpush3.bf16.msra.mxu0 %v13760_v48 }
 0x74a   : > { %11054 = vmatprep.subr.bf16.mxu1 %v12585_v25  ;;  %11074 = vmatprep.subr.bf16.mxu0 %v12585_v25 }
 0x74c   : > { %11051 = vmatmul.mubr.msk.bf16.vlgmr.msra.gmra.mrb[80].mxu0 %vm1756_vm4, %v11651_v52  ;;  %11039 = vmatmul.mubr.msk.bf16.vlgmr.msra.gmra.mrb[144].mxu1 %vm1756_vm4, %v11652_v61 }
 0x74d   : > { %11055 = vmatpush3.bf16.msra.mxu1 %v11653_v62  ;;  %11075 = vmatpush3.bf16.msra.mxu0 %v11660_v63 }
 0x74e   : > { %11056 = vmatprep.subr.bf16.mxu1 %v12585_v25  ;;  %11076 = vmatprep.subr.bf16.mxu0 %v12585_v25 }
 0x74f   : > { %11070 = vmatprep.mubr.msk.bf16.mxu1 %vm12586_vm5, %v12585_v25  ;;  %11090 = vmatprep.mubr.msk.bf16.mxu0 %vm12586_vm5, %v12585_v25 }
 0x751   : > { %11057 = vmatpush3.bf16.msra.mxu1 %v11654_v7  ;;  %11077 = vmatpush3.bf16.msra.mxu0 %v11662_v27  ;;  %v11687_v7 = vld [vmem:[#allocation7 + $0x20] sm:$0xff]   ;;  %v11691_v27 = vld [vmem:[%s15153_s11 + $0x110] sm:$0xff]  }
 0x752   : > { %11058 = vmatprep.subr.bf16.mxu1 %v12585_v25  ;;  %11078 = vmatprep.subr.bf16.mxu0 %v12585_v25 }
 0x755   : > { %11059 = vmatpush3.bf16.msra.mxu1 %v11655_v8  ;;  %11079 = vmatpush3.bf16.msra.mxu0 %v11663_v29  ;;  %v11688_v29 = vld [vmem:[#allocation7 + $0x28] sm:$0xff]  }
 0x756   : > { %11060 = vmatprep.subr.bf16.mxu1 %v12585_v25  ;;  %11080 = vmatprep.subr.bf16.mxu0 %v12585_v25 }
 0x759   : > { %11061 = vmatpush3.bf16.msra.mxu1 %v11656_v10  ;;  %11081 = vmatpush3.bf16.msra.mxu0 %v11664_v30  ;;  %v11692_v30 = vld [vmem:[%s15153_s11 + $0x118] sm:$0xff]  }
 0x75a   : > { %11062 = vmatprep.subr.bf16.mxu1 %v12585_v25  ;;  %11082 = vmatprep.subr.bf16.mxu0 %v12585_v25 }
 0x75d   : > { %11063 = vmatpush3.bf16.msra.mxu1 %v11657_v15  ;;  %11083 = vmatpush3.bf16.msra.mxu0 %v11665_v26  ;;  %v11689_v15 = vld [vmem:[%s15153_s11 + $0x100] sm:$0xff]  }
 0x75e   : > { %11064 = vmatprep.subr.bf16.mxu1 %v12585_v25  ;;  %11084 = vmatprep.subr.bf16.mxu0 %v12585_v25  ;;  %v11693_v26 = vld [vmem:[%s15153_s11 + $0x120] sm:$0xff]  }
 0x761   : > { %11065 = vmatpush3.bf16.msra.mxu1 %v11658_v16  ;;  %11085 = vmatpush3.bf16.msra.mxu0 %v11666_v37  ;;  %v11694_v37 = vld [vmem:[%s15153_s11 + $0x140] sm:$0xff]  }
 0x762   : > { %11066 = vmatprep.subr.bf16.mxu1 %v12585_v25  ;;  %11086 = vmatprep.subr.bf16.mxu0 %v12585_v25 }
 0x765   : > { %11067 = vmatpush3.bf16.msra.mxu1 %v11659_v19  ;;  %11087 = vmatpush3.bf16.msra.mxu0 %v11668_v17  ;;  %v11690_v19 = vld [vmem:[%s15153_s11 + $0x108] sm:$0xff]  }
 0x766   : > { %11068 = vmatprep.subr.bf16.mxu1 %v12585_v25  ;;  %11088 = vmatprep.subr.bf16.mxu0 %v12585_v25  ;;  %v11695_v17 = vld [vmem:[%s15153_s11 + $0x128] sm:$0xff]  }
 0x769   : > { %11069 = vmatpush3.bf16.msra.mxu1 %v11661_v40  ;;  %11089 = vmatpush3.bf16.msra.mxu0 %v11669_v41  ;;  %v11696_v40 = vld [vmem:[%s15153_s11 + $0x148] sm:$0xff]   ;;  %v11697_v41 = vld [vmem:[%s15153_s11 + $0x130] sm:$0xff]  }
 0x76a   : > { %11094 = vmatprep.subr.bf16.mxu1 %v12585_v25  ;;  %11106 = vmatprep.subr.bf16.mxu0 %v12585_v25 }
 0x81f   : > { %v3855_v39 = vpop.f32.mrb[80].mxu0  ;;  %v3786_v3 = vpop.f32.mrb[144].mxu1 }
 0x820   : > { %v11052_v51 = vpop.f32.mrb[81].mxu0  ;;  %v11040_v2 = vpop.f32.mrb[145].mxu1 }
 0x821   : > { %v3858_v47 = vpop.f32.mrb[82].mxu0  ;;  %v3789_v55 = vpop.f32.mrb[146].mxu1  ;;  %v11700_v51 = vld [vmem:[%s15153_s11 + $0x158] sm:$0xff]   ;;  %v11701_v2 = vld [vmem:[%s15153_s11 + $0x160] sm:$0xff]  }
 0x822   : > { %v3862_v56 = vpack.c.bf16 %v3858_v47, %v3855_v39  ;;  %v3793_v1 = vpack.c.bf16 %v3789_v55, %v3786_v3  ;;  %v11053_v24 = vpop.f32.mrb[83].mxu0  ;;  %v11041_v12 = vpop.f32.mrb[147].mxu1  ;;  %v11698_v39 = vld [vmem:[%s15153_s11 + $0x150] sm:$0xff]   ;;  %v11699_v3 = vld [vmem:[%s15153_s11 + $0x138] sm:$0xff]   ;;  %v11702_v47 = vld [vmem:[%s15153_s11 + $0x168] sm:$0xff]  }
 0x823   : > { %v11703_v55 = vld [vmem:[%s15153_s11 + $0x170] sm:$0xff]  }
 0x824   : > { %11071 = vmatmul.mubr.bf16.vlgmr.msra.gmra.mrb[148].mxu1 %v3862_v56  ;;  %11091 = vmatmul.mubr.bf16.vlgmr.msra.gmra.mrb[84].mxu0 %v3793_v1  ;;  %v11704_v56 = vld [vmem:[%s15153_s11 + $0x178] sm:$0xff]  }
 0x825   : > { %11095 = vmatpush3.bf16.msra.mxu1 %v13752_v6  ;;  %11102 = vmatprep.mubr.msk.bf16.mxu1 %vm12586_vm5, %v12585_v25 }
 0x826   : > { %11096 = vmatprep.subr.bf16.mxu1 %v12585_v25  ;;  %11107 = vmatpush3.bf16.msra.mxu0 %v11671_v57 }
 0x827   : > { %11108 = vmatprep.subr.bf16.mxu0 %v12585_v25  ;;  %11122 = vmatprep.mubr.msk.bf16.mxu0 %vm12586_vm5, %v12585_v25 }
 0x829   : > { %11097 = vmatpush3.bf16.msra.mxu1 %v13750_v0 }
 0x82a   : > { %11098 = vmatprep.subr.bf16.mxu1 %v12585_v25  ;;  %11109 = vmatpush3.bf16.msra.mxu0 %v11672_v14 }
 0x82b   : > { %11110 = vmatprep.subr.bf16.mxu0 %v12585_v25 }
 0x82d   : > { %11099 = vmatpush3.bf16.msra.mxu1 %v13764_v49 }
 0x82e   : > { %11100 = vmatprep.subr.bf16.mxu1 %v12585_v25  ;;  %11111 = vmatpush3.bf16.msra.mxu0 %v11673_v20 }
 0x82f   : > { %11112 = vmatprep.subr.bf16.mxu0 %v12585_v25 }
 0x831   : > { %11101 = vmatpush3.bf16.msra.mxu1 %v13760_v48 }
 0x832   : > { %11126 = vmatprep.subr.bf16.mxu1 %v12585_v25  ;;  %11113 = vmatpush3.bf16.msra.mxu0 %v11674_v33 }
 0x833   : > { %11114 = vmatprep.subr.bf16.mxu0 %v12585_v25 }
 0x834   : > { %11103 = vmatmul.mubr.msk.bf16.vlgmr.msra.gmra.mrb[152].mxu1 %vm1756_vm4, %v11667_v36 }
 0x835   : > { %11127 = vmatpush3.bf16.msra.mxu1 %v13752_v6  ;;  %11134 = vmatprep.mubr.msk.bf16.mxu1 %vm12586_vm5, %v12585_v25 }
 0x836   : > { %11128 = vmatprep.subr.bf16.mxu1 %v12585_v25  ;;  %11115 = vmatpush3.bf16.msra.mxu0 %v11675_v38 }
 0x837   : > { %11116 = vmatprep.subr.bf16.mxu0 %v12585_v25 }
 0x839   : > { %11129 = vmatpush3.bf16.msra.mxu1 %v13750_v0 }
 0x83a   : > { %11130 = vmatprep.subr.bf16.mxu1 %v12585_v25  ;;  %11117 = vmatpush3.bf16.msra.mxu0 %v11677_v35 }
 0x83b   : > { %11118 = vmatprep.subr.bf16.mxu0 %v12585_v25 }
 0x83d   : > { %11131 = vmatpush3.bf16.msra.mxu1 %v13764_v49 }
 0x83e   : > { %11132 = vmatprep.subr.bf16.mxu1 %v12585_v25  ;;  %11119 = vmatpush3.bf16.msra.mxu0 %v11679_v4 }
 0x83f   : > { %11120 = vmatprep.subr.bf16.mxu0 %v12585_v25 }
 0x841   : > { %11133 = vmatpush3.bf16.msra.mxu1 %v13760_v48 }
 0x842   : > { %11138 = vmatprep.subr.bf16.mxu1 %v12585_v25  ;;  %11121 = vmatpush3.bf16.msra.mxu0 %v11681_v5 }
 0x843   : > { %11158 = vmatprep.subr.bf16.mxu0 %v12585_v25 }
 0x844   : > { %11135 = vmatmul.mubr.msk.bf16.vlgmr.msra.gmra.mrb[156].mxu1 %vm1756_vm4, %v11670_v28 }
 0x845   : > { %11139 = vmatpush3.bf16.msra.mxu1 %v11676_v54  ;;  %11154 = vmatprep.mubr.msk.bf16.mxu1 %vm12586_vm5, %v12585_v25 }
 0x846   : > { %11140 = vmatprep.subr.bf16.mxu1 %v12585_v25 }
 0x849   : > { %11141 = vmatpush3.bf16.msra.mxu1 %v11678_v53 }
 0x84a   : > { %11142 = vmatprep.subr.bf16.mxu1 %v12585_v25 }
 0x84d   : > { %11143 = vmatpush3.bf16.msra.mxu1 %v11680_v50 }
 0x84e   : > { %11144 = vmatprep.subr.bf16.mxu1 %v12585_v25 }
 0x851   : > { %11145 = vmatpush3.bf16.msra.mxu1 %v11682_v44 }
 0x852   : > { %11146 = vmatprep.subr.bf16.mxu1 %v12585_v25 }
 0x855   : > { %11147 = vmatpush3.bf16.msra.mxu1 %v11683_v45 }
 0x856   : > { %11148 = vmatprep.subr.bf16.mxu1 %v12585_v25 }
 0x859   : > { %11149 = vmatpush3.bf16.msra.mxu1 %v11684_v46 }
 0x85a   : > { %11150 = vmatprep.subr.bf16.mxu1 %v12585_v25 }
 0x85d   : > { %11151 = vmatpush3.bf16.msra.mxu1 %v11685_v58  ;;  %v11705_v58 = vld [vmem:[#allocation7 + $0x30] sm:$0xff]  }
 0x85e   : > { %11152 = vmatprep.subr.bf16.mxu1 %v12585_v25 }
 0x861   : > { %11153 = vmatpush3.bf16.msra.mxu1 %v11686_v59 }
 0x862   : > { %11190 = vmatprep.subr.bf16.mxu1 %v12585_v25 }
 0x8f7   : > { %v3962_v60 = vpop.f32.mrb[148].mxu1  ;;  %v4051_v9 = vpop.f32.mrb[84].mxu0 }
 0x8f8   : > { %v11072_v21 = vpop.f32.mrb[149].mxu1  ;;  %v13934_v11 = vadd.f32 %v4051_v9, %v3962_v60  ;;  %v11092_v13 = vpop.f32.mrb[85].mxu0  ;;  %v11707_v9 = vld [vmem:[%s15153_s11 + $0x180] sm:$0xff]  }
 0x8f9   : > { %v3965_v22 = vpop.f32.mrb[150].mxu1  ;;  %v4054_v18 = vpop.f32.mrb[86].mxu0  ;;  %v11709_v13 = vld [vmem:[%s15153_s11 + $0x190] sm:$0xff]  }
 0x8fa   : > { %v11073_v23 = vpop.f32.mrb[151].mxu1  ;;  %v13936_v31 = vadd.f32 %v4054_v18, %v3965_v22  ;;  %v11093_v32 = vpop.f32.mrb[87].mxu0  ;;  %v11706_v22 = vld [vmem:[#allocation7 + $0x38] sm:$0xff]  }
 0x8fb   : > { %v11710_v18 = vld [vmem:[%s15153_s11 + $0x198] sm:$0xff]   ;;  %v11711_v23 = vld [vmem:[%s15153_s11 + $0x1a0] sm:$0xff]   ;;  %v11713_v32 = vld [vmem:[%s15153_s11 + $0x1a8] sm:$0xff]  }
 0x907   : > { %v4103_v34 = vpop.f32.mrb[152].mxu1 }
 0x908   : > { %v11104_v42 = vpop.f32.mrb[153].mxu1 }
 0x909   : > { %v4106_v43 = vpop.f32.mrb[154].mxu1  ;;  %v11715_v42 = vld [vmem:[%s15153_s11 + $0x1b0] sm:$0xff]  }
 0x90a   : > { %v4110_v52 = vpack.c.bf16 %v4106_v43, %v4103_v34  ;;  %v11105_v61 = vpop.f32.mrb[155].mxu1  ;;  %v11714_v34 = vld [vmem:[%s15153_s11 + $0x1c8] sm:$0xff]   ;;  %v11716_v43 = vld [vmem:[%s15153_s11 + $0x1d0] sm:$0xff]  }
 0x90b   : > { %v11718_v61 = vld [vmem:[%s15153_s11 + $0x1d8] sm:$0xff]  }
 0x90c   : > { %11123 = vmatmul.mubr.bf16.vlgmr.msra.gmra.mrb[88].mxu0 %v4110_v52  ;;  %v11717_v52 = vld [vmem:[%s15153_s11 + $0x1b8] sm:$0xff]  }
 0x90d   : > { %11159 = vmatpush3.bf16.msra.mxu0 %v13752_v6  ;;  %11166 = vmatprep.mubr.msk.bf16.mxu0 %vm12586_vm5, %v12585_v25 }
 0x90e   : > { %11160 = vmatprep.subr.bf16.mxu0 %v12585_v25 }
 0x911   : > { %11161 = vmatpush3.bf16.msra.mxu0 %v13750_v0 }
 0x912   : > { %11162 = vmatprep.subr.bf16.mxu0 %v12585_v25 }
 0x915   : > { %11163 = vmatpush3.bf16.msra.mxu0 %v13764_v49 }
 0x916   : > { %11164 = vmatprep.subr.bf16.mxu0 %v12585_v25 }
 0x917   : > { %v4264_v62 = vpop.f32.mrb[156].mxu1 }
 0x918   : > { %v11136_v63 = vpop.f32.mrb[157].mxu1 }
 0x919   : > { %11165 = vmatpush3.bf16.msra.mxu0 %v13760_v48  ;;  %v4267_v8 = vpop.f32.mrb[158].mxu1  ;;  %v11720_v63 = vld [vmem:[%s15153_s11 + $0x1e8] sm:$0xff]  }
 0x91a   : > { %v4271_v10 = vpack.c.bf16 %v4267_v8, %v4264_v62  ;;  %11170 = vmatprep.subr.bf16.mxu0 %v12585_v25  ;;  %v11137_v16 = vpop.f32.mrb[159].mxu1  ;;  %v11719_v62 = vld [vmem:[%s15153_s11 + $0x1e0] sm:$0xff]   ;;  %v11722_v8 = vld [vmem:[%s15153_s11 + $0x1f8] sm:$0xff]  }
 0x91c   : > { %11167 = vmatmul.mubr.msk.bf16.vlgmr.msra.gmra.mrb[92].mxu0 %vm1756_vm4, %v11687_v7  ;;  %11155 = vmatmul.mubr.bf16.vlgmr.msra.gmra.mrb[160].mxu1 %v4271_v10  ;;  %v11721_v7 = vld [vmem:[%s15153_s11 + $0x1f0] sm:$0xff]  }
 0x91d   : > { %11191 = vmatpush3.bf16.msra.mxu1 %v13752_v6  ;;  %11198 = vmatprep.mubr.msk.bf16.mxu1 %vm12586_vm5, %v12585_v25 }
 0x91e   : > { %11192 = vmatprep.subr.bf16.mxu1 %v12585_v25  ;;  %11171 = vmatpush3.bf16.msra.mxu0 %v11689_v15 }
 0x91f   : > { %11172 = vmatprep.subr.bf16.mxu0 %v12585_v25  ;;  %11186 = vmatprep.mubr.msk.bf16.mxu0 %vm12586_vm5, %v12585_v25 }
 0x921   : > { %11193 = vmatpush3.bf16.msra.mxu1 %v13750_v0 }
 0x922   : > { %11194 = vmatprep.subr.bf16.mxu1 %v12585_v25  ;;  %11173 = vmatpush3.bf16.msra.mxu0 %v11690_v19 }
 0x923   : > { %11174 = vmatprep.subr.bf16.mxu0 %v12585_v25 }
 0x925   : > { %11195 = vmatpush3.bf16.msra.mxu1 %v13764_v49 }
 0x926   : > { %11196 = vmatprep.subr.bf16.mxu1 %v12585_v25  ;;  %11175 = vmatpush3.bf16.msra.mxu0 %v11691_v27 }
 0x927   : > { %11176 = vmatprep.subr.bf16.mxu0 %v12585_v25 }
 0x929   : > { %11197 = vmatpush3.bf16.msra.mxu1 %v13760_v48 }
 0x92a   : > { %11202 = vmatprep.subr.bf16.mxu1 %v12585_v25  ;;  %11177 = vmatpush3.bf16.msra.mxu0 %v11692_v30 }
 0x92b   : > { %11178 = vmatprep.subr.bf16.mxu0 %v12585_v25 }
 0x92c   : > { %11199 = vmatmul.mubr.msk.bf16.vlgmr.msra.gmra.mrb[164].mxu1 %vm1756_vm4, %v11688_v29 }
 0x92d   : > { %11218 = vmatprep.mubr.msk.bf16.mxu1 %vm12586_vm5, %v12585_v25  ;;  %11203 = vmatpush3.bf16.msra.mxu1 %v11694_v37 }
 0x92e   : > { %11179 = vmatpush3.bf16.msra.mxu0 %v11693_v26  ;;  %11204 = vmatprep.subr.bf16.mxu1 %v12585_v25 }
 0x92f   : > { %11180 = vmatprep.subr.bf16.mxu0 %v12585_v25 }
 0x931   : > { %11205 = vmatpush3.bf16.msra.mxu1 %v11696_v40 }
 0x932   : > { %11181 = vmatpush3.bf16.msra.mxu0 %v11695_v17  ;;  %11206 = vmatprep.subr.bf16.mxu1 %v12585_v25 }
 0x933   : > { %11182 = vmatprep.subr.bf16.mxu0 %v12585_v25 }
 0x935   : > { %11207 = vmatpush3.bf16.msra.mxu1 %v11698_v39 }
 0x936   : > { %11183 = vmatpush3.bf16.msra.mxu0 %v11697_v41  ;;  %11208 = vmatprep.subr.bf16.mxu1 %v12585_v25 }
 0x937   : > { %11184 = vmatprep.subr.bf16.mxu0 %v12585_v25 }
 0x939   : > { %11209 = vmatpush3.bf16.msra.mxu1 %v11700_v51 }
 0x93a   : > { %11185 = vmatpush3.bf16.msra.mxu0 %v11699_v3  ;;  %11210 = vmatprep.subr.bf16.mxu1 %v12585_v25 }
 0x93b   : > { %11222 = vmatprep.subr.bf16.mxu0 %v12585_v25 }
 0x93d   : > { %11211 = vmatpush3.bf16.msra.mxu1 %v11701_v2 }
 0x93e   : > { %11212 = vmatprep.subr.bf16.mxu1 %v12585_v25 }
 0x941   : > { %11213 = vmatpush3.bf16.msra.mxu1 %v11702_v47 }
 0x942   : > { %11214 = vmatprep.subr.bf16.mxu1 %v12585_v25 }
 0x945   : > { %11215 = vmatpush3.bf16.msra.mxu1 %v11703_v55 }
 0x946   : > { %11216 = vmatprep.subr.bf16.mxu1 %v12585_v25 }
 0x949   : > { %11217 = vmatpush3.bf16.msra.mxu1 %v11704_v56 }
 0x94a   : > { %11254 = vmatprep.subr.bf16.mxu1 %v12585_v25 }
 0x9df   : > { %v4210_v1 = vpop.f32.mrb[88].mxu0 }
 0x9e0   : > { %v4217_v24 = vadd.f32 %v4210_v1, %v13934_v11  ;;  %v11124_v57 = vpop.f32.mrb[89].mxu0  ;;  %v11708_v11 = vld [vmem:[%s15153_s11 + $0x188] sm:$0xff]   ;;  %v11723_v1 = vld [vmem:[#allocation7 + $0x40] sm:$0xff]  }
 0x9e1   : > { %v4213_v12 = vpop.f32.mrb[90].mxu0 }
 0x9e2   : > { %v4218_v14 = vadd.f32 %v4213_v12, %v13936_v31  ;;  %v11125_v20 = vpop.f32.mrb[91].mxu0  ;;  %v11712_v31 = vld [vmem:[%s15153_s11 + $0x1c0] sm:$0xff]   ;;  %v11727_v12 = vld [vmem:[%s15153_s11 + $0x218] sm:$0xff]  }
 0x9e3   : > { %v11729_v20 = vld [vmem:[%s15153_s11 + $0x228] sm:$0xff]  }
 0x9ef   : > { %v4425_v33 = vpop.f32.mrb[92].mxu0  ;;  %v4371_v36 = vpop.f32.mrb[160].mxu1 }
 0x9f0   : > { %v14030_v38 = vadd.f32 %v4371_v36, %v4217_v24  ;;  %v11168_v35 = vpop.f32.mrb[93].mxu0  ;;  %v11156_v28 = vpop.f32.mrb[161].mxu1  ;;  %v11731_v36 = vld [vmem:[%s15153_s11 + $0x238] sm:$0xff]  }
 0x9f1   : > { %v4428_v54 = vpop.f32.mrb[94].mxu0  ;;  %v4374_v53 = vpop.f32.mrb[162].mxu1  ;;  %v11734_v35 = vld [vmem:[#allocation9 + $0x4] ss:$8 sps:$4 sm:$0xff]   ;;  %v11737_v28 = vld [vmem:[#allocation9 + $0x14] ss:$8 sps:$4 sm:$0xff]  }
 0x9f2   : > { %v4432_v4 = vpack.c.bf16 %v4428_v54, %v4425_v33  ;;  %v14032_v50 = vadd.f32 %v4374_v53, %v4218_v14  ;;  %v11157_v5 = vpop.f32.mrb[163].mxu1  ;;  %v11169_v44 = vpop.f32.mrb[95].mxu0  ;;  %v11728_v14 = vld [vmem:[%s15153_s11 + $0x220] sm:$0xff]   ;;  %v11730_v33 = vld [vmem:[%s15153_s11 + $0x230] sm:$0xff]  }
 0x9f3   : > { %v11735_v54 = vld [vmem:[#allocation9 + $0x10] ss:$8 sps:$4 sm:$0xff]   ;;  %v11740_v53 = vld [vmem:[#allocation9 + $0x24] ss:$8 sps:$4 sm:$0xff]   ;;  %v11744_v44 = vld [vmem:[#allocation9 + $0x40] ss:$8 sps:$4 sm:$0xff]  }
 0x9f4   : > { %11187 = vmatmul.mubr.bf16.vlgmr.msra.gmra.mrb[96].mxu0 %v4432_v4  ;;  %v11738_v4 = vld [vmem:[#allocation9 + $0x20] ss:$8 sps:$4 sm:$0xff]   ;;  %v11741_v5 = vld [vmem:[#allocation9 + $0x30] ss:$8 sps:$4 sm:$0xff]  }
 0x9f5   : > { %11223 = vmatpush3.bf16.msra.mxu0 %v13752_v6  ;;  %11230 = vmatprep.mubr.msk.bf16.mxu0 %vm12586_vm5, %v12585_v25 }
 0x9f6   : > { %11224 = vmatprep.subr.bf16.mxu0 %v12585_v25 }
 0x9f9   : > { %11225 = vmatpush3.bf16.msra.mxu0 %v13750_v0 }
 0x9fa   : > { %11226 = vmatprep.subr.bf16.mxu0 %v12585_v25 }
 0x9fd   : > { %11227 = vmatpush3.bf16.msra.mxu0 %v13764_v49 }
 0x9fe   : > { %11228 = vmatprep.subr.bf16.mxu0 %v12585_v25 }
 0x9ff   : > { %v4586_v45 = vpop.f32.mrb[164].mxu1 }
 0xa00   : > { %v11200_v46 = vpop.f32.mrb[165].mxu1 }
 0xa01   : > { %11229 = vmatpush3.bf16.msra.mxu0 %v13760_v48  ;;  %v4589_v59 = vpop.f32.mrb[166].mxu1  ;;  %v11747_v46 = vld [vmem:[#allocation9 + $0x50] ss:$8 sps:$4 sm:$0xff]  }
 0xa02   : > { %v4593_v60 = vpack.c.bf16 %v4589_v59, %v4586_v45  ;;  %11234 = vmatprep.subr.bf16.mxu0 %v12585_v25  ;;  %v11201_v21 = vpop.f32.mrb[167].mxu1  ;;  %v11749_v45 = vld [vmem:[#allocation9 + $0x54] ss:$8 sps:$4 sm:$0xff]  }
 0xa04   : > { %11231 = vmatmul.mubr.msk.bf16.vlgmr.msra.gmra.mrb[100].mxu0 %vm1756_vm4, %v11705_v58  ;;  %11219 = vmatmul.mubr.bf16.vlgmr.msra.gmra.mrb[168].mxu1 %v4593_v60 }
 0xa05   : > { %11255 = vmatpush3.bf16.msra.mxu1 %v13752_v6  ;;  %11262 = vmatprep.mubr.msk.bf16.mxu1 %vm12586_vm5, %v12585_v25 }
 0xa06   : > { %11256 = vmatprep.subr.bf16.mxu1 %v12585_v25  ;;  %11235 = vmatpush3.bf16.msra.mxu0 %v11707_v9 }
 0xa07   : > { %11236 = vmatprep.subr.bf16.mxu0 %v12585_v25  ;;  %11250 = vmatprep.mubr.msk.bf16.mxu0 %vm12586_vm5, %v12585_v25 }
 0xa09   : > { %11257 = vmatpush3.bf16.msra.mxu1 %v13750_v0 }
 0xa0a   : > { %11258 = vmatprep.subr.bf16.mxu1 %v12585_v25  ;;  %11237 = vmatpush3.bf16.msra.mxu0 %v11708_v11 }
 0xa0b   : > { %11238 = vmatprep.subr.bf16.mxu0 %v12585_v25 }
 0xa0d   : > { %11259 = vmatpush3.bf16.msra.mxu1 %v13764_v49 }
 0xa0e   : > { %11260 = vmatprep.subr.bf16.mxu1 %v12585_v25  ;;  %11239 = vmatpush3.bf16.msra.mxu0 %v11709_v13 }
 0xa0f   : > { %11240 = vmatprep.subr.bf16.mxu0 %v12585_v25 }
 0xa11   : > { %11261 = vmatpush3.bf16.msra.mxu1 %v13760_v48 }
 0xa12   : > { %11266 = vmatprep.subr.bf16.mxu1 %v12585_v25  ;;  %11241 = vmatpush3.bf16.msra.mxu0 %v11710_v18 }
 0xa13   : > { %11242 = vmatprep.subr.bf16.mxu0 %v12585_v25 }
 0xa14   : > { %11263 = vmatmul.mubr.msk.bf16.vlgmr.msra.gmra.mrb[172].mxu1 %vm1756_vm4, %v11706_v22 }
 0xa15   : > { %11282 = vmatprep.mubr.msk.bf16.mxu1 %vm12586_vm5, %v12585_v25  ;;  %11267 = vmatpush3.bf16.msra.mxu1 %v11712_v31 }
 0xa16   : > { %11243 = vmatpush3.bf16.msra.mxu0 %v11711_v23  ;;  %11268 = vmatprep.subr.bf16.mxu1 %v12585_v25 }
 0xa17   : > { %11244 = vmatprep.subr.bf16.mxu0 %v12585_v25 }
 0xa19   : > { %11269 = vmatpush3.bf16.msra.mxu1 %v11714_v34 }
 0xa1a   : > { %11245 = vmatpush3.bf16.msra.mxu0 %v11713_v32  ;;  %11270 = vmatprep.subr.bf16.mxu1 %v12585_v25 }
 0xa1b   : > { %11246 = vmatprep.subr.bf16.mxu0 %v12585_v25 }
 0xa1d   : > { %11271 = vmatpush3.bf16.msra.mxu1 %v11716_v43 }
 0xa1e   : > { %11247 = vmatpush3.bf16.msra.mxu0 %v11715_v42  ;;  %11272 = vmatprep.subr.bf16.mxu1 %v12585_v25 }
 0xa1f   : > { %11248 = vmatprep.subr.bf16.mxu0 %v12585_v25 }
 0xa21   : > { %11273 = vmatpush3.bf16.msra.mxu1 %v11718_v61 }
 0xa22   : > { %11249 = vmatpush3.bf16.msra.mxu0 %v11717_v52  ;;  %11274 = vmatprep.subr.bf16.mxu1 %v12585_v25 }
 0xa23   : > { %11286 = vmatprep.subr.bf16.mxu0 %v12585_v25 }
 0xa25   : > { %11275 = vmatpush3.bf16.msra.mxu1 %v11719_v62  ;;  %v11752_v62 = vld [vmem:[#allocation9 + $0x64] ss:$8 sps:$4 sm:$0xff]  }
 0xa26   : > { %11276 = vmatprep.subr.bf16.mxu1 %v12585_v25 }
 0xa29   : > { %11277 = vmatpush3.bf16.msra.mxu1 %v11720_v63  ;;  %v11750_v63 = vld [vmem:[#allocation9 + $0x60] ss:$8 sps:$4 sm:$0xff]  }
 0xa2a   : > { %11278 = vmatprep.subr.bf16.mxu1 %v12585_v25 }
 0xa2d   : > { %11279 = vmatpush3.bf16.msra.mxu1 %v11721_v7  ;;  %v11755_v7 = vld [vmem:[#allocation9 + $0x74] ss:$8 sps:$4 sm:$0xff]  }
 0xa2e   : > { %11280 = vmatprep.subr.bf16.mxu1 %v12585_v25 }
 0xa31   : > { %11281 = vmatpush3.bf16.msra.mxu1 %v11722_v8  ;;  %v11753_v8 = vld [vmem:[#allocation9 + $0x70] ss:$8 sps:$4 sm:$0xff]  }
 0xa32   : > { %5305 = vmatprep.subr.bf16.mxu1 %v11734_v35 }
 0xac7   : > { %v4532_v10 = vpop.f32.mrb[96].mxu0 }
 0xac8   : > { %v4539_v15 = vadd.f32 %v4532_v10, %v14030_v38  ;;  %v11188_v16 = vpop.f32.mrb[97].mxu0  ;;  %v11732_v38 = vld [vmem:[#allocation9] ss:$8 sps:$4 sm:$0xff]   ;;  %v12587_v10 = vmov 0  }
 0xac9   : > { %v4535_v19 = vpop.f32.mrb[98].mxu0  ;;  %v9482_v16 = vld [vmem:[%s15154_s12] ss:$0 sm:$0xff] }
 0xaca   : > { %v4540_v27 = vadd.f32 %v4535_v19, %v14032_v50  ;;  %v11189_v29 = vpop.f32.mrb[99].mxu0  ;;  %v11743_v50 = vld [vmem:[#allocation9 + $0x34] ss:$8 sps:$4 sm:$0xff]  }
 0xad7   : > { %v4747_v30 = vpop.f32.mrb[100].mxu0  ;;  %v4693_v26 = vpop.f32.mrb[168].mxu1 }
 0xad8   : > { %v14125_v37 = vadd.f32 %v4693_v26, %v4539_v15  ;;  %v11232_v17 = vpop.f32.mrb[101].mxu0  ;;  %v11220_v40 = vpop.f32.mrb[169].mxu1 }
 0xad9   : > { %v4750_v41 = vpop.f32.mrb[102].mxu0  ;;  %v4696_v39 = vpop.f32.mrb[170].mxu1 }
 0xada   : > { %v4754_v3 = vpack.c.bf16 %v4750_v41, %v4747_v30  ;;  %v14127_v51 = vadd.f32 %v4696_v39, %v4540_v27  ;;  %v11221_v2 = vpop.f32.mrb[171].mxu1  ;;  %v11233_v47 = vpop.f32.mrb[103].mxu0 }
 0xadb   : > { %v5213_v47 = vld [vmem:[%s15156_s14] sm:$0x3] }
 0xadc   : > { %11251 = vmatmul.mubr.bf16.vlgmr.msra.gmra.mrb[104].mxu0 %v4754_v3  ;;  %v5215_v3 = vlaneseq }
 0xadd   : > { %11287 = vmatpush3.bf16.msra.mxu0 %v13752_v6  ;;  %11294 = vmatprep.mubr.msk.bf16.mxu0 %vm12586_vm5, %v12585_v25  ;;  %v11724_v6 = vld [vmem:[%s15153_s11 + $0x200] sm:$0xff]  }
 0xade   : > { %11288 = vmatprep.subr.bf16.mxu0 %v12585_v25 }
 0xae1   : > { %11289 = vmatpush3.bf16.msra.mxu0 %v13750_v0 }
 0xae2   : > { %11290 = vmatprep.subr.bf16.mxu0 %v12585_v25 }
 0xae5   : > { %11291 = vmatpush3.bf16.msra.mxu0 %v13764_v49  ;;  %v11725_v49 = vld [vmem:[%s15153_s11 + $0x208] sm:$0xff]  }
 0xae6   : > { %11292 = vmatprep.subr.bf16.mxu0 %v12585_v25 }
 0xae7   : > { %v4908_v55 = vpop.f32.mrb[172].mxu1 }
 0xae8   : > { %v11264_v56 = vpop.f32.mrb[173].mxu1 }
 0xae9   : > { %11293 = vmatpush3.bf16.msra.mxu0 %v13760_v48  ;;  %v4911_v24 = vpop.f32.mrb[174].mxu1  ;;  %v11726_v48 = vld [vmem:[%s15153_s11 + $0x210] sm:$0xff]  }
 0xaea   : > { %v4915_v57 = vpack.c.bf16 %v4911_v24, %v4908_v55  ;;  %11298 = vmatprep.subr.bf16.mxu0 %v12585_v25  ;;  %v11265_v0 = vpop.f32.mrb[175].mxu1 }
 0xaec   : > { %11295 = vmatmul.mubr.msk.bf16.vlgmr.msra.gmra.mrb[108].mxu0 %vm1756_vm4, %v11723_v1  ;;  %11283 = vmatmul.mubr.bf16.vlgmr.msra.gmra.mrb[176].mxu1 %v4915_v57 }
 0xaed   : > { %11299 = vmatpush3.bf16.msra.mxu0 %v11724_v6  ;;  %11314 = vmatprep.mubr.msk.bf16.mxu0 %vm12586_vm5, %v12585_v25 }
 0xaee   : > { %11300 = vmatprep.subr.bf16.mxu0 %v12585_v25  ;;  %5306 = vmatpush1.bf16.msra.mxu1 %v11732_v38 }
 0xaef   : > { %5307 = vmatprep.subr.bf16.mxu1 %v11737_v28  ;;  %5337 = vmatprep.mubr.bf16.mxu1 %v12587_v10 }
 0xaf1   : > { %11301 = vmatpush3.bf16.msra.mxu0 %v11725_v49 }
 0xaf2   : > { %11302 = vmatprep.subr.bf16.mxu0 %v12585_v25  ;;  %5308 = vmatpush1.bf16.msra.mxu1 %v11735_v54  ;;  %v11758_v54 = vld [vmem:[%s15158_s16 + $0x104] ss:$8 sps:$4 sm:$0xff]  }
 0xaf3   : > { %5309 = vmatprep.subr.bf16.mxu1 %v11740_v53  ;;  %v11806_v53 = vld [vmem:[%s15158_s16 + $0x4] ss:$8 sps:$4 sm:$0xff]  }
 0xaf5   : > { %11303 = vmatpush3.bf16.msra.mxu0 %v11726_v48 }
 0xaf6   : > { %11304 = vmatprep.subr.bf16.mxu0 %v12585_v25  ;;  %5310 = vmatpush1.bf16.msra.mxu1 %v11738_v4  ;;  %v5354_v4 = vld [vmem:[#allocation10] sm:$0x3] }
 0xaf7   : > { %5311 = vmatprep.subr.bf16.mxu1 %v11743_v50  ;;  %v5435_v50 = vld [vmem:[#allocation10 + $0x2] sm:$0x3] }
 0xaf9   : > { %11305 = vmatpush3.bf16.msra.mxu0 %v11727_v12 }
 0xafa   : > { %11306 = vmatprep.subr.bf16.mxu0 %v12585_v25  ;;  %5312 = vmatpush1.bf16.msra.mxu1 %v11741_v5  ;;  %v11756_v5 = vld [vmem:[%s15158_s16 + $0x100] ss:$8 sps:$4 sm:$0xff]  }
 0xafd   : > { %11307 = vmatpush3.bf16.msra.mxu0 %v11728_v14 }
 0xafe   : > { %11308 = vmatprep.subr.bf16.mxu0 %v12585_v25 }
 0xb01   : > { %11309 = vmatpush3.bf16.msra.mxu0 %v11729_v20 }
 0xb02   : > { %11310 = vmatprep.subr.bf16.mxu0 %v12585_v25 }
 0xb05   : > { %11311 = vmatpush3.bf16.msra.mxu0 %v11730_v33 }
 0xb06   : > { %11312 = vmatprep.subr.bf16.mxu0 %v12585_v25  ;;  %v11746_v25 = vld [vmem:[#allocation9 + $0x44] ss:$8 sps:$4 sm:$0xff]  }
 0xb07   : > { %5313 = vmatprep.subr.bf16.mxu1 %v11746_v25  ;;  %v11804_v25 = vld [vmem:[%s15158_s16] ss:$8 sps:$4 sm:$0xff]  }
 0xb08   : > { %5314 = vmatpush1.bf16.msra.mxu1 %v11744_v44  ;;  %v11761_v44 = vld [vmem:[%s15158_s16 + $0x114] ss:$8 sps:$4 sm:$0xff]  }
 0xb09   : > { %11313 = vmatpush3.bf16.msra.mxu0 %v11731_v36  ;;  %5315 = vmatprep.subr.bf16.mxu1 %v11749_v45  ;;  %v11809_v45 = vld [vmem:[%s15158_s16 + $0x14] ss:$8 sps:$4 sm:$0xff]  }
 0xb0c   : > { %5316 = vmatpush1.bf16.msra.mxu1 %v11747_v46  ;;  %v11759_v46 = vld [vmem:[%s15158_s16 + $0x110] ss:$8 sps:$4 sm:$0xff]  }
 0xb0d   : > { %5317 = vmatprep.subr.bf16.mxu1 %v11752_v62  ;;  %v11776_v62 = vld [vmem:[%s15158_s16 + $0x164] ss:$8 sps:$4 sm:$0xff]  }
 0xb10   : > { %5318 = vmatpush1.bf16.msra.mxu1 %v11750_v63  ;;  %v11824_v63 = vld [vmem:[%s15158_s16 + $0x64] ss:$8 sps:$4 sm:$0xff]  }
 0xb11   : > { %5319 = vmatprep.subr.bf16.mxu1 %v11755_v7  ;;  %v11774_v7 = vld [vmem:[%s15158_s16 + $0x160] ss:$8 sps:$4 sm:$0xff]  }
 0xb14   : > { %5320 = vmatpush1.bf16.msra.mxu1 %v11753_v8  ;;  %v11822_v8 = vld [vmem:[%s15158_s16 + $0x60] ss:$8 sps:$4 sm:$0xff]  }
 0xbaf   : > { %v4854_v58 = vpop.f32.mrb[104].mxu0 }
 0xbb0   : > { %v4861_v59 = vadd.f32 %v4854_v58, %v14125_v37  ;;  %v11252_v60 = vpop.f32.mrb[105].mxu0  ;;  %v11807_v58 = vld [vmem:[%s15158_s16 + $0x10] ss:$8 sps:$4 sm:$0xff]  }
 0xbb1   : > { %v4857_v9 = vpop.f32.mrb[106].mxu0  ;;  %v11812_v60 = vld [vmem:[%s15158_s16 + $0x24] ss:$8 sps:$4 sm:$0xff]  }
 0xbb2   : > { %v4862_v21 = vadd.f32 %v4857_v9, %v14127_v51  ;;  %v11253_v11 = vpop.f32.mrb[107].mxu0  ;;  %v14181_v51 = vshrl.u32 %v5215_v3, 7  ;;  %v11762_v9 = vld [vmem:[%s15158_s16 + $0x120] ss:$8 sps:$4 sm:$0xff]   ;;  %v11788_v3 = vld [vmem:[%s15158_s16 + $0x1a4] ss:$8 sps:$4 sm:$0xff]  }
 0xbb3   : > { %v11767_v11 = vld [vmem:[%s15158_s16 + $0x134] ss:$8 sps:$4 sm:$0xff]  }
 0xbb4   : > { %v14184_v2 = vsub.s32 0, %v14181_v51  ;;  %v14190_v55 = vsub.s32 1, %v14181_v51 }
 0xbb6   : > { %v5218_v56 = vrot.slane %v5213_v47, %v14184_v2  ;;  %v5222_v1 = vrot.slane %v5213_v47, %v14190_v55  ;;  %v11836_v47 = vld [vmem:[%s15158_s16 + $0xa4] ss:$8 sps:$4 sm:$0xff]  }
 0xbbf   : > { %v5069_v13 = vpop.f32.mrb[108].mxu0  ;;  %v5015_v22 = vpop.f32.mrb[176].mxu1 }
 0xbc0   : > { %v5022_v18 = vadd.f32 %v5015_v22, %v4861_v59  ;;  %v11296_v23 = vpop.f32.mrb[109].mxu0  ;;  %v11284_v31 = vpop.f32.mrb[177].mxu1  ;;  %v11764_v59 = vld [vmem:[%s15158_s16 + $0x124] ss:$8 sps:$4 sm:$0xff]   ;;  %v11765_v22 = vld [vmem:[%s15158_s16 + $0x130] ss:$8 sps:$4 sm:$0xff]  }
 0xbc1   : > { %v5072_v32 = vpop.f32.mrb[110].mxu0  ;;  %v5018_v34 = vpop.f32.mrb[178].mxu1  ;;  %v11770_v23 = vld [vmem:[%s15158_s16 + $0x144] ss:$8 sps:$4 sm:$0xff]  }
 0xbc2   : > { %v5076_v42 = vpack.c.bf16 %v5072_v32, %v5069_v13  ;;  %v5023_v43 = vadd.f32 %v5018_v34, %v4862_v21  ;;  %v11297_v52 = vpop.f32.mrb[111].mxu0  ;;  %v11285_v61 = vpop.f32.mrb[179].mxu1  ;;  %v11810_v21 = vld [vmem:[%s15158_s16 + $0x20] ss:$8 sps:$4 sm:$0xff]   ;;  %v11815_v13 = vld [vmem:[%s15158_s16 + $0x34] ss:$8 sps:$4 sm:$0xff]  }
 0xbc3   : > { %v11818_v31 = vld [vmem:[%s15158_s16 + $0x44] ss:$8 sps:$4 sm:$0xff]   ;;  %v11768_v32 = vld [vmem:[%s15158_s16 + $0x140] ss:$8 sps:$4 sm:$0xff]   ;;  %v11771_v52 = vld [vmem:[%s15158_s16 + $0x150] ss:$8 sps:$4 sm:$0xff]  }
 0xbc4   : > { %11315 = vmatmul.mubr.bf16.vlgmr.msra.gmra.mrb[112].mxu0 %v5076_v42  ;;  %v11816_v34 = vld [vmem:[%s15158_s16 + $0x40] ss:$8 sps:$4 sm:$0xff]   ;;  %v11773_v42 = vld [vmem:[%s15158_s16 + $0x154] ss:$8 sps:$4 sm:$0xff]   ;;  %v11819_v61 = vld [vmem:[%s15158_s16 + $0x50] ss:$8 sps:$4 sm:$0xff]  }
 0xbc5   : > { %5391 = vmatprep.mubr.bf16.mxu0 %v12587_v10 }
 0xc97   : > { %v5176_v15 = vpop.f32.mrb[112].mxu0 }
 0xc98   : > { %v5183_v19 = vadd.f32 %v5176_v15, %v5022_v18  ;;  %v11316_v27 = vpop.f32.mrb[113].mxu0  ;;  %v11813_v18 = vld [vmem:[%s15158_s16 + $0x30] ss:$8 sps:$4 sm:$0xff]   ;;  %v11779_v15 = vld [vmem:[%s15158_s16 + $0x174] ss:$8 sps:$4 sm:$0xff]  }
 0xc99   : > { %v5179_v29 = vpop.f32.mrb[114].mxu0  ;;  %v11825_v27 = vld [vmem:[%s15158_s16 + $0x70] ss:$8 sps:$4 sm:$0xff]  }
 0xc9a   : > { %v5192_v30 = vadd.f32 %v9482_v16, %v5183_v19  ;;  %v5184_v26 = vadd.f32 %v5179_v29, %v5023_v43  ;;  %v11317_v37 = vpop.f32.mrb[115].mxu0  ;;  %v11821_v43 = vld [vmem:[%s15158_s16 + $0x54] ss:$8 sps:$4 sm:$0xff]   ;;  %v11777_v19 = vld [vmem:[%s15158_s16 + $0x170] ss:$8 sps:$4 sm:$0xff]  }
 0xc9b   : > { %v11782_v29 = vld [vmem:[%s15158_s16 + $0x184] ss:$8 sps:$4 sm:$0xff]   ;;  %v11828_v37 = vld [vmem:[%s15158_s16 + $0x80] ss:$8 sps:$4 sm:$0xff]  }
 0xc9c   : > { %v5193_v17 = vadd.f32 %v9482_v16, %v5184_v26  ;;  %v5194_v40 = vmax.f32 %v5192_v30, 0.0  ;;  %v11827_v16 = vld [vmem:[%s15158_s16 + $0x74] ss:$8 sps:$4 sm:$0xff]   ;;  %v11830_v30 = vld [vmem:[%s15158_s16 + $0x84] ss:$8 sps:$4 sm:$0xff]  }
 0xc9d   : > { %v11780_v26 = vld [vmem:[%s15158_s16 + $0x180] ss:$8 sps:$4 sm:$0xff]  }
 0xc9e   : > { %v5195_v41 = vmax.f32 %v5193_v17, 0.0  ;;  %v11785_v17 = vld [vmem:[%s15158_s16 + $0x194] ss:$8 sps:$4 sm:$0xff]  }
 0xca0   : > { %v5196_v39 = vpack.c.bf16 %v5195_v41, %v5194_v40  ;;  %v11833_v40 = vld [vmem:[%s15158_s16 + $0x94] ss:$8 sps:$4 sm:$0xff]   ;;  %v11783_v41 = vld [vmem:[%s15158_s16 + $0x190] ss:$8 sps:$4 sm:$0xff]  }
 0xca2   : > { %5338 = vmatmul.mubr.bf16.vlgmr.msra.gmra.mrb[180].mxu1 %v5196_v39  ;;  %v11831_v39 = vld [vmem:[%s15158_s16 + $0x90] ss:$8 sps:$4 sm:$0xff]  }
 0xca3   : > { %5471 = vmatprep.mubr.bf16.mxu1 %v12587_v10 }
 0xd75   : > { %v5339_v24 = vpop.f32.mrb[180].mxu1 }
 0xd76   : > { %v5340_v6 = vadd.f32 %v5339_v24, %v5218_v56  ;;  %v5341_v57 = vpop.f32.mrb[181].mxu1  ;;  %v11791_v24 = vld [vmem:[%s15158_s16 + $0x1b4] ss:$8 sps:$4 sm:$0xff]  }
 0xd77   : > { %v5342_v0 = vadd.f32 %v5341_v57, %v5222_v1  ;;  %v5343_v49 = vpop.f32.mrb[182].mxu1  ;;  %v11789_v57 = vld [vmem:[%s15158_s16 + $0x1b0] ss:$8 sps:$4 sm:$0xff]  }
 0xd78   : > { %v5344_v48 = vadd.f32 %v5343_v49, %v5218_v56  ;;  %v5345_v12 = vpop.f32.mrb[183].mxu1  ;;  %v5348_v20 = vmax.f32 %v5340_v6, 0.0  ;;  %v11786_v56 = vld [vmem:[%s15158_s16 + $0x1a0] ss:$8 sps:$4 sm:$0xff]   ;;  %v11839_v6 = vld [vmem:[%s15158_s16 + $0xb4] ss:$8 sps:$4 sm:$0xff]  }
 0xd79   : > { %v5346_v14 = vadd.f32 %v5345_v12, %v5222_v1  ;;  %v5349_v36 = vmax.f32 %v5342_v0, 0.0  ;;  %v11834_v1 = vld [vmem:[%s15158_s16 + $0xa0] ss:$8 sps:$4 sm:$0xff]   ;;  %v11837_v0 = vld [vmem:[%s15158_s16 + $0xb0] ss:$8 sps:$4 sm:$0xff]  }
 0xd7a   : > { %v5350_v33 = vmax.f32 %v5344_v48, 0.0  ;;  %v11794_v49 = vld [vmem:[%s15158_s16 + $0x1c4] ss:$8 sps:$4 sm:$0xff]   ;;  %v11792_v12 = vld [vmem:[%s15158_s16 + $0x1c0] ss:$8 sps:$4 sm:$0xff]  }
 0xd7b   : > { %v5351_v38 = vmax.f32 %v5346_v14, 0.0  ;;  %v11842_v48 = vld [vmem:[%s15158_s16 + $0xc4] ss:$8 sps:$4 sm:$0xff]   ;;  %v11840_v14 = vld [vmem:[%s15158_s16 + $0xc0] ss:$8 sps:$4 sm:$0xff]  }
 0xd7c   : > { %v14194_v35 = vpack.c.bf16 %v5350_v33, %v5348_v20  ;;  %v11797_v20 = vld [vmem:[%s15158_s16 + $0x1d4] ss:$8 sps:$4 sm:$0xff]  }
 0xd7d   : > { %v14196_v28 = vpack.c.bf16 %v5351_v38, %v5349_v36  ;;  %v11845_v33 = vld [vmem:[%s15158_s16 + $0xd4] ss:$8 sps:$4 sm:$0xff]   ;;  %v11795_v36 = vld [vmem:[%s15158_s16 + $0x1d0] ss:$8 sps:$4 sm:$0xff]  }
 0xd7e   : > { %v11843_v38 = vld [vmem:[%s15158_s16 + $0xd0] ss:$8 sps:$4 sm:$0xff]  }
 0xd7f   : > { %5359 = vmatprep.subr.bf16.mxu0 %v14196_v28  ;;  %5439 = vmatprep.subr.bf16.mxu1 %v14196_v28 }
 0xd80   : > { %5360 = vmatpush1.bf16.msra.mxu0 %v14194_v35  ;;  %5440 = vmatpush1.bf16.msra.mxu1 %v14194_v35 }
 0xd81   : > { %5675 = vmatprep.subr.bf16.mxu0 %v11758_v54  ;;  %5876 = vmatprep.subr.bf16.mxu1 %v11806_v53  ;;  %v11800_v54 = vld [vmem:[%s15158_s16 + $0x1e4] ss:$8 sps:$4 sm:$0xff]  }
 0xd82   : > { %v11848_v53 = vld [vmem:[%s15158_s16 + $0xe4] ss:$8 sps:$4 sm:$0xff]  }
 0xd83   : > { %9499 = vmatmul.mubr.msk.bf16.vlgmr.msra.gmra.mrb[116].mxu0 %vm5355_vm6, %v5354_v4  ;;  %9500 = vmatmul.mubr.msk.bf16.vlgmr.msra.gmra.mrb[184].mxu1 %vm5355_vm6, %v5435_v50  ;;  %v11798_v4 = vld [vmem:[%s15158_s16 + $0x1e0] ss:$8 sps:$4 sm:$0xff]  }
 0xd84   : > { %5676 = vmatpush1.bf16.msra.mxu0 %v11756_v5  ;;  %5877 = vmatpush1.bf16.msra.mxu1 %v11804_v25  ;;  %v11846_v50 = vld [vmem:[%s15158_s16 + $0xe0] ss:$8 sps:$4 sm:$0xff]   ;;  %v11803_v5 = vld [vmem:[%s15158_s16 + $0x1f4] ss:$8 sps:$4 sm:$0xff]   ;;  %v11801_v25 = vld [vmem:[%s15158_s16 + $0x1f0] ss:$8 sps:$4 sm:$0xff]  }
 0xd85   : > { %5677 = vmatprep.subr.bf16.mxu0 %v11761_v44  ;;  %5878 = vmatprep.subr.bf16.mxu1 %v11809_v45  ;;  %v11851_v44 = vld [vmem:[%s15158_s16 + $0xf4] ss:$8 sps:$4 sm:$0xff]   ;;  %v11849_v45 = vld [vmem:[%s15158_s16 + $0xf0] ss:$8 sps:$4 sm:$0xff]  }
 0xd88   : > { %5678 = vmatpush1.bf16.msra.mxu0 %v11759_v46  ;;  %5879 = vmatpush1.bf16.msra.mxu1 %v11807_v58  ;;  %v11854_v46 = vld [vmem:[%s15158_s16 + $0x204] ss:$8 sps:$4 sm:$0xff]  }
 0xd89   : > { %5679 = vmatprep.subr.bf16.mxu0 %v11764_v59  ;;  %5880 = vmatprep.subr.bf16.mxu1 %v11812_v60 }
 0xd8c   : > { %5680 = vmatpush1.bf16.msra.mxu0 %v11762_v9  ;;  %5881 = vmatpush1.bf16.msra.mxu1 %v11810_v21 }
 0xd8d   : > { %5681 = vmatprep.subr.bf16.mxu0 %v11767_v11  ;;  %5882 = vmatprep.subr.bf16.mxu1 %v11815_v13 }
 0xd90   : > { %5682 = vmatpush1.bf16.msra.mxu0 %v11765_v22  ;;  %5883 = vmatpush1.bf16.msra.mxu1 %v11813_v18  ;;  %v11852_v22 = vld [vmem:[%s15158_s16 + $0x200] ss:$8 sps:$4 sm:$0xff]  }
 0xd91   : > { %5683 = vmatprep.subr.bf16.mxu0 %v11770_v23  ;;  %5884 = vmatprep.subr.bf16.mxu1 %v11818_v31 }
 0xd94   : > { %5684 = vmatpush1.bf16.msra.mxu0 %v11768_v32  ;;  %5885 = vmatpush1.bf16.msra.mxu1 %v11816_v34  ;;  %v11857_v32 = vld [vmem:[%s15158_s16 + $0x214] ss:$8 sps:$4 sm:$0xff]  }
 0xd95   : > { %5685 = vmatprep.subr.bf16.mxu0 %v11773_v42  ;;  %5886 = vmatprep.subr.bf16.mxu1 %v11821_v43  ;;  %v11855_v43 = vld [vmem:[%s15158_s16 + $0x210] ss:$8 sps:$4 sm:$0xff]  }
 0xd98   : > { %5686 = vmatpush1.bf16.msra.mxu0 %v11771_v52  ;;  %5887 = vmatpush1.bf16.msra.mxu1 %v11819_v61  ;;  %v11860_v52 = vld [vmem:[%s15158_s16 + $0x224] ss:$8 sps:$4 sm:$0xff]   ;;  %v11858_v61 = vld [vmem:[%s15158_s16 + $0x220] ss:$8 sps:$4 sm:$0xff]  }
 0xd99   : > { %5687 = vmatprep.subr.bf16.mxu0 %v11776_v62  ;;  %5888 = vmatprep.subr.bf16.mxu1 %v11824_v63  ;;  %v5918_v62 = vld [vmem:[#allocation10 + $0x4] sm:$0x3]  ;;  %v11863_v63 = vld [vmem:[%s15158_s16 + $0x234] ss:$8 sps:$4 sm:$0xff]  }
 0xd9c   : > { %5688 = vmatpush1.bf16.msra.mxu0 %v11774_v7  ;;  %5889 = vmatpush1.bf16.msra.mxu1 %v11822_v8  ;;  %v11869_v7 = vld [vmem:[%s15158_s16 + $0x304] ss:$8 sps:$4 sm:$0xff]   ;;  %v11861_v8 = vld [vmem:[%s15158_s16 + $0x230] ss:$8 sps:$4 sm:$0xff]  }
 0xd9d   : > { %5689 = vmatprep.subr.bf16.mxu0 %v11779_v15  ;;  %5890 = vmatprep.subr.bf16.mxu1 %v11827_v16  ;;  %v11866_v15 = vld [vmem:[%s15158_s16 + $0x244] ss:$8 sps:$4 sm:$0xff]   ;;  %v11864_v16 = vld [vmem:[%s15158_s16 + $0x240] ss:$8 sps:$4 sm:$0xff]  }
 0xda0   : > { %5690 = vmatpush1.bf16.msra.mxu0 %v11777_v19  ;;  %5891 = vmatpush1.bf16.msra.mxu1 %v11825_v27  ;;  %v11867_v19 = vld [vmem:[%s15158_s16 + $0x300] ss:$8 sps:$4 sm:$0xff]   ;;  %v6202_v27 = vld [vmem:[#allocation10 + $0x6] sm:$0x3] }
 0xda1   : > { %5691 = vmatprep.subr.bf16.mxu0 %v11782_v29  ;;  %5892 = vmatprep.subr.bf16.mxu1 %v11830_v30  ;;  %v11872_v29 = vld [vmem:[%s15158_s16 + $0x254] ss:$8 sps:$4 sm:$0xff]  }
 0xda2   : > { %v11875_v30 = vld [vmem:[%s15158_s16 + $0x314] ss:$8 sps:$4 sm:$0xff]  }
 0xda4   : > { %5692 = vmatpush1.bf16.msra.mxu0 %v11780_v26  ;;  %5893 = vmatpush1.bf16.msra.mxu1 %v11828_v37  ;;  %v11870_v26 = vld [vmem:[%s15158_s16 + $0x250] ss:$8 sps:$4 sm:$0xff]  }
 0xda5   : > { %5693 = vmatprep.subr.bf16.mxu0 %v11785_v17  ;;  %5894 = vmatprep.subr.bf16.mxu1 %v11833_v40  ;;  %v11873_v37 = vld [vmem:[%s15158_s16 + $0x310] ss:$8 sps:$4 sm:$0xff]   ;;  %v11878_v17 = vld [vmem:[%s15158_s16 + $0x264] ss:$8 sps:$4 sm:$0xff]  }
 0xda6   : > { %v11881_v40 = vld [vmem:[%s15158_s16 + $0x324] ss:$8 sps:$4 sm:$0xff]  }
 0xda8   : > { %5694 = vmatpush1.bf16.msra.mxu0 %v11783_v41  ;;  %5895 = vmatpush1.bf16.msra.mxu1 %v11831_v39  ;;  %v11876_v41 = vld [vmem:[%s15158_s16 + $0x260] ss:$8 sps:$4 sm:$0xff]  }
 0xda9   : > { %5695 = vmatprep.subr.bf16.mxu0 %v11788_v3  ;;  %5896 = vmatprep.subr.bf16.mxu1 %v11836_v47  ;;  %v11879_v39 = vld [vmem:[%s15158_s16 + $0x320] ss:$8 sps:$4 sm:$0xff]   ;;  %v11884_v3 = vld [vmem:[%s15158_s16 + $0x274] ss:$8 sps:$4 sm:$0xff]  }
 0xdaa   : > { %v11887_v47 = vld [vmem:[%s15158_s16 + $0x334] ss:$8 sps:$4 sm:$0xff]  }
 0xdac   : > { %5696 = vmatpush1.bf16.msra.mxu0 %v11786_v56  ;;  %5897 = vmatpush1.bf16.msra.mxu1 %v11834_v1  ;;  %v11882_v56 = vld [vmem:[%s15158_s16 + $0x270] ss:$8 sps:$4 sm:$0xff]  }
 0xdad   : > { %5697 = vmatprep.subr.bf16.mxu0 %v11791_v24  ;;  %5898 = vmatprep.subr.bf16.mxu1 %v11839_v6  ;;  %v11885_v1 = vld [vmem:[%s15158_s16 + $0x330] ss:$8 sps:$4 sm:$0xff]   ;;  %v11890_v24 = vld [vmem:[%s15158_s16 + $0x284] ss:$8 sps:$4 sm:$0xff]  }
 0xdae   : > { %v11893_v6 = vld [vmem:[%s15158_s16 + $0x344] ss:$8 sps:$4 sm:$0xff]  }
 0xdb0   : > { %5698 = vmatpush1.bf16.msra.mxu0 %v11789_v57  ;;  %5899 = vmatpush1.bf16.msra.mxu1 %v11837_v0  ;;  %v11888_v57 = vld [vmem:[%s15158_s16 + $0x280] ss:$8 sps:$4 sm:$0xff]  }
 0xdb1   : > { %5699 = vmatprep.subr.bf16.mxu0 %v11794_v49  ;;  %5900 = vmatprep.subr.bf16.mxu1 %v11842_v48  ;;  %v11891_v0 = vld [vmem:[%s15158_s16 + $0x340] ss:$8 sps:$4 sm:$0xff]   ;;  %v11896_v49 = vld [vmem:[%s15158_s16 + $0x294] ss:$8 sps:$4 sm:$0xff]  }
 0xdb2   : > { %v11899_v48 = vld [vmem:[%s15158_s16 + $0x354] ss:$8 sps:$4 sm:$0xff]  }
 0xdb4   : > { %5700 = vmatpush1.bf16.msra.mxu0 %v11792_v12  ;;  %5901 = vmatpush1.bf16.msra.mxu1 %v11840_v14  ;;  %v11894_v12 = vld [vmem:[%s15158_s16 + $0x290] ss:$8 sps:$4 sm:$0xff]  }
 0xdb5   : > { %5701 = vmatprep.subr.bf16.mxu0 %v11797_v20  ;;  %5902 = vmatprep.subr.bf16.mxu1 %v11845_v33  ;;  %v11897_v14 = vld [vmem:[%s15158_s16 + $0x350] ss:$8 sps:$4 sm:$0xff]   ;;  %v11902_v20 = vld [vmem:[%s15158_s16 + $0x2a4] ss:$8 sps:$4 sm:$0xff]  }
 0xdb6   : > { %v11905_v33 = vld [vmem:[%s15158_s16 + $0x364] ss:$8 sps:$4 sm:$0xff]  }
 0xdb8   : > { %5702 = vmatpush1.bf16.msra.mxu0 %v11795_v36  ;;  %5903 = vmatpush1.bf16.msra.mxu1 %v11843_v38  ;;  %v11900_v36 = vld [vmem:[%s15158_s16 + $0x2a0] ss:$8 sps:$4 sm:$0xff]  }
 0xdb9   : > { %5703 = vmatprep.subr.bf16.mxu0 %v11800_v54  ;;  %5904 = vmatprep.subr.bf16.mxu1 %v11848_v53  ;;  %v11903_v38 = vld [vmem:[%s15158_s16 + $0x360] ss:$8 sps:$4 sm:$0xff]   ;;  %v11908_v54 = vld [vmem:[%s15158_s16 + $0x2b4] ss:$8 sps:$4 sm:$0xff]  }
 0xdba   : > { %v11911_v53 = vld [vmem:[%s15158_s16 + $0x374] ss:$8 sps:$4 sm:$0xff]  }
 0xdbc   : > { %5704 = vmatpush1.bf16.msra.mxu0 %v11798_v4  ;;  %5905 = vmatpush1.bf16.msra.mxu1 %v11846_v50  ;;  %v11906_v4 = vld [vmem:[%s15158_s16 + $0x2b0] ss:$8 sps:$4 sm:$0xff]  }
 0xdbd   : > { %5705 = vmatprep.subr.bf16.mxu0 %v11803_v5  ;;  %5906 = vmatprep.subr.bf16.mxu1 %v11851_v44  ;;  %v11909_v50 = vld [vmem:[%s15158_s16 + $0x370] ss:$8 sps:$4 sm:$0xff]   ;;  %v11914_v5 = vld [vmem:[%s15158_s16 + $0x2c4] ss:$8 sps:$4 sm:$0xff]   ;;  %v11912_v44 = vld [vmem:[%s15158_s16 + $0x2c0] ss:$8 sps:$4 sm:$0xff]  }
 0xdc0   : > { %5706 = vmatpush1.bf16.msra.mxu0 %v11801_v25  ;;  %5907 = vmatpush1.bf16.msra.mxu1 %v11849_v45  ;;  %v11917_v25 = vld [vmem:[%s15158_s16 + $0x384] ss:$8 sps:$4 sm:$0xff]   ;;  %v11915_v45 = vld [vmem:[%s15158_s16 + $0x380] ss:$8 sps:$4 sm:$0xff]  }
 0xdc1   : > { %5922 = vmatprep.subr.bf16.mxu0 %v14196_v28  ;;  %6158 = vmatprep.subr.bf16.mxu1 %v11854_v46  ;;  %v11920_v46 = vld [vmem:[%s15158_s16 + $0x2d4] ss:$8 sps:$4 sm:$0xff]  }
 0xe56   : > { %v5393_v58 = vpop.f32.mrb[116].mxu0  ;;  %v5473_v59 = vpop.f32.mrb[184].mxu1 }
 0xe57   : > { %v5400_v60 = vpack.c.bf16 %v5393_v58, %v5393_v58  ;;  %v5395_v9 = vpop.f32.mrb[117].mxu0  ;;  %v5475_v21 = vpop.f32.mrb[185].mxu1  ;;  %v5480_v31 = vpack.c.bf16 %v5473_v59, %v5473_v59  ;;  %v11923_v58 = vld [vmem:[%s15158_s16 + $0x394] ss:$8 sps:$4 sm:$0xff]   ;;  %v11918_v59 = vld [vmem:[%s15158_s16 + $0x2d0] ss:$8 sps:$4 sm:$0xff]  }
 0xe58   : > { %v5401_v11 = vpack.c.bf16 %v5395_v9, %v5395_v9  ;;  %v5481_v13 = vpack.c.bf16 %v5475_v21, %v5475_v21  ;;  %v5477_v18 = vpop.f32.mrb[186].mxu1  ;;  %v5397_v23 = vpop.f32.mrb[118].mxu0  ;;  %v11926_v9 = vld [vmem:[%s15158_s16 + $0x2e4] ss:$8 sps:$4 sm:$0xff]  }
 0xe59   : > { %v5478_v34 = vpop.f32.mrb[187].mxu1  ;;  %v5398_v42 = vpop.f32.mrb[119].mxu0  ;;  %v11929_v21 = vld [vmem:[%s15158_s16 + $0x3a4] ss:$8 sps:$4 sm:$0xff]   ;;  %v11935_v18 = vld [vmem:[%s15158_s16 + $0x3b4] ss:$8 sps:$4 sm:$0xff]  }
 0xe5a   : > { %5707 = vmatprep.mubr.bf16.mxu0 %v5481_v13  ;;  %5908 = vmatprep.mubr.bf16.mxu1 %v5401_v11  ;;  %v11924_v11 = vld [vmem:[%s15158_s16 + $0x2e0] ss:$8 sps:$4 sm:$0xff]   ;;  %v11930_v23 = vld [vmem:[%s15158_s16 + $0x2f0] ss:$8 sps:$4 sm:$0xff]   ;;  %v11941_v42 = vld [vmem:[%s15158_s16 + $0x3d4] ss:$8 sps:$4 sm:$0xff]  }
 0xe5b   : > { %5708 = vmatmul.mubr.bf16.vlgmr.msra.gmra.mrb[120].mxu0 %v5480_v31  ;;  %5909 = vmatmul.mubr.bf16.vlgmr.msra.gmra.mrb[188].mxu1 %v5400_v60  ;;  %v11921_v60 = vld [vmem:[%s15158_s16 + $0x390] ss:$8 sps:$4 sm:$0xff]   ;;  %v11927_v13 = vld [vmem:[%s15158_s16 + $0x3a0] ss:$8 sps:$4 sm:$0xff]  }
 0xe5c   : > { %5923 = vmatpush1.bf16.msra.mxu0 %v14194_v35  ;;  %6159 = vmatpush1.bf16.msra.mxu1 %v11852_v22  ;;  %v11932_v22 = vld [vmem:[%s15158_s16 + $0x2f4] ss:$8 sps:$4 sm:$0xff]   ;;  %v11933_v31 = vld [vmem:[%s15158_s16 + $0x3b0] ss:$8 sps:$4 sm:$0xff]   ;;  %v11936_v34 = vld [vmem:[%s15158_s16 + $0x3c0] ss:$8 sps:$4 sm:$0xff]  }
 0xe5d   : > { %6206 = vmatprep.subr.bf16.mxu0 %v14196_v28  ;;  %6160 = vmatprep.subr.bf16.mxu1 %v11857_v32  ;;  %v11938_v32 = vld [vmem:[%s15158_s16 + $0x3c4] ss:$8 sps:$4 sm:$0xff]  }
 0xe5e   : > { %5954 = vmatprep.mubr.bf16.mxu0 %v12587_v10 }
 0xe60   : > { %6161 = vmatpush1.bf16.msra.mxu1 %v11855_v43  ;;  %v11939_v43 = vld [vmem:[%s15158_s16 + $0x3d0] ss:$8 sps:$4 sm:$0xff]  }
 0xe61   : > { %6162 = vmatprep.subr.bf16.mxu1 %v11860_v52  ;;  %v11944_v52 = vld [vmem:[%s15158_s16 + $0x3e4] ss:$8 sps:$4 sm:$0xff]  }
 0xe63   : > { %9597 = vmatmul.mubr.msk.bf16.vlgmr.msra.gmra.mrb[124].mxu0 %vm5355_vm6, %v5918_v62  ;;  %v11947_v62 = vld [vmem:[%s15158_s16 + $0x3f4] ss:$8 sps:$4 sm:$0xff]  }
 0xe64   : > { %6163 = vmatpush1.bf16.msra.mxu1 %v11858_v61  ;;  %6207 = vmatpush1.bf16.msra.mxu0 %v14194_v35  ;;  %v11942_v61 = vld [vmem:[%s15158_s16 + $0x3e0] ss:$8 sps:$4 sm:$0xff]  }
 0xe65   : > { %6164 = vmatprep.subr.bf16.mxu1 %v11863_v63  ;;  %6238 = vmatprep.mubr.bf16.mxu0 %v12587_v10  ;;  %v11945_v63 = vld [vmem:[%s15158_s16 + $0x3f0] ss:$8 sps:$4 sm:$0xff]  }
 0xe66   : > { %6442 = vmatprep.subr.bf16.mxu0 %v11869_v7 }
 0xe68   : > { %6165 = vmatpush1.bf16.msra.mxu1 %v11861_v8 }
 0xe69   : > { %6166 = vmatprep.subr.bf16.mxu1 %v11866_v15 }
 0xe6b   : > { %9662 = vmatmul.mubr.msk.bf16.vlgmr.msra.gmra.mrb[128].mxu0 %vm5355_vm6, %v6202_v27 }
 0xe6c   : > { %6167 = vmatpush1.bf16.msra.mxu1 %v11864_v16  ;;  %6443 = vmatpush1.bf16.msra.mxu0 %v11867_v19 }
 0xe6d   : > { %6168 = vmatprep.subr.bf16.mxu1 %v11872_v29  ;;  %6444 = vmatprep.subr.bf16.mxu0 %v11875_v30 }
 0xe70   : > { %6169 = vmatpush1.bf16.msra.mxu1 %v11870_v26  ;;  %6445 = vmatpush1.bf16.msra.mxu0 %v11873_v37 }
 0xe71   : > { %6170 = vmatprep.subr.bf16.mxu1 %v11878_v17  ;;  %6446 = vmatprep.subr.bf16.mxu0 %v11881_v40 }
 0xe74   : > { %6171 = vmatpush1.bf16.msra.mxu1 %v11876_v41  ;;  %6447 = vmatpush1.bf16.msra.mxu0 %v11879_v39 }
 0xe75   : > { %6172 = vmatprep.subr.bf16.mxu1 %v11884_v3  ;;  %6448 = vmatprep.subr.bf16.mxu0 %v11887_v47 }
 0xe78   : > { %6173 = vmatpush1.bf16.msra.mxu1 %v11882_v56  ;;  %6449 = vmatpush1.bf16.msra.mxu0 %v11885_v1  ;;  %v11950_v56 = vld [vmem:[%s15158_s16 + $0x404] ss:$8 sps:$4 sm:$0xff]  }
 0xe79   : > { %6174 = vmatprep.subr.bf16.mxu1 %v11890_v24  ;;  %6450 = vmatprep.subr.bf16.mxu0 %v11893_v6 }
 0xe7c   : > { %6175 = vmatpush1.bf16.msra.mxu1 %v11888_v57  ;;  %6451 = vmatpush1.bf16.msra.mxu0 %v11891_v0  ;;  %v11948_v0 = vld [vmem:[%s15158_s16 + $0x400] ss:$8 sps:$4 sm:$0xff]  }
 0xe7d   : > { %6176 = vmatprep.subr.bf16.mxu1 %v11896_v49  ;;  %6452 = vmatprep.subr.bf16.mxu0 %v11899_v48  ;;  %v6486_v49 = vld [vmem:[#allocation10 + $0x8] sm:$0x3] }
 0xe80   : > { %6177 = vmatpush1.bf16.msra.mxu1 %v11894_v12  ;;  %6453 = vmatpush1.bf16.msra.mxu0 %v11897_v14  ;;  %v11953_v12 = vld [vmem:[%s15158_s16 + $0x414] ss:$8 sps:$4 sm:$0xff]  }
 0xe81   : > { %6178 = vmatprep.subr.bf16.mxu1 %v11902_v20  ;;  %6454 = vmatprep.subr.bf16.mxu0 %v11905_v33  ;;  %v11959_v20 = vld [vmem:[%s15158_s16 + $0x504] ss:$8 sps:$4 sm:$0xff]   ;;  %v11951_v33 = vld [vmem:[%s15158_s16 + $0x410] ss:$8 sps:$4 sm:$0xff]  }
 0xe84   : > { %6179 = vmatpush1.bf16.msra.mxu1 %v11900_v36  ;;  %6455 = vmatpush1.bf16.msra.mxu0 %v11903_v38  ;;  %v11956_v36 = vld [vmem:[%s15158_s16 + $0x424] ss:$8 sps:$4 sm:$0xff]   ;;  %v11954_v38 = vld [vmem:[%s15158_s16 + $0x420] ss:$8 sps:$4 sm:$0xff]  }
 0xe85   : > { %6180 = vmatprep.subr.bf16.mxu1 %v11908_v54  ;;  %6456 = vmatprep.subr.bf16.mxu0 %v11911_v53  ;;  %v11957_v54 = vld [vmem:[%s15158_s16 + $0x500] ss:$8 sps:$4 sm:$0xff]   ;;  %v6770_v53 = vld [vmem:[#allocation10 + $0xa] sm:$0x3] }
 0xe88   : > { %6181 = vmatpush1.bf16.msra.mxu1 %v11906_v4  ;;  %6457 = vmatpush1.bf16.msra.mxu0 %v11909_v50  ;;  %v11962_v4 = vld [vmem:[%s15158_s16 + $0x434] ss:$8 sps:$4 sm:$0xff]  }
 0xe89   : > { %6182 = vmatprep.subr.bf16.mxu1 %v11914_v5  ;;  %6458 = vmatprep.subr.bf16.mxu0 %v11917_v25  ;;  %v11965_v50 = vld [vmem:[%s15158_s16 + $0x514] ss:$8 sps:$4 sm:$0xff]   ;;  %v11960_v5 = vld [vmem:[%s15158_s16 + $0x430] ss:$8 sps:$4 sm:$0xff]  }
 0xe8a   : > { %v11963_v25 = vld [vmem:[%s15158_s16 + $0x510] ss:$8 sps:$4 sm:$0xff]  }
 0xe8c   : > { %6183 = vmatpush1.bf16.msra.mxu1 %v11912_v44  ;;  %6459 = vmatpush1.bf16.msra.mxu0 %v11915_v45  ;;  %v11968_v44 = vld [vmem:[%s15158_s16 + $0x444] ss:$8 sps:$4 sm:$0xff]  }
 0xe8d   : > { %6184 = vmatprep.subr.bf16.mxu1 %v11920_v46  ;;  %6460 = vmatprep.subr.bf16.mxu0 %v11923_v58  ;;  %v11971_v45 = vld [vmem:[%s15158_s16 + $0x524] ss:$8 sps:$4 sm:$0xff]   ;;  %v11966_v46 = vld [vmem:[%s15158_s16 + $0x440] ss:$8 sps:$4 sm:$0xff]  }
 0xe8e   : > { %v11969_v58 = vld [vmem:[%s15158_s16 + $0x520] ss:$8 sps:$4 sm:$0xff]  }
 0xe90   : > { %6185 = vmatpush1.bf16.msra.mxu1 %v11918_v59  ;;  %6461 = vmatpush1.bf16.msra.mxu0 %v11921_v60  ;;  %v11974_v59 = vld [vmem:[%s15158_s16 + $0x454] ss:$8 sps:$4 sm:$0xff]  }
 0xe91   : > { %6186 = vmatprep.subr.bf16.mxu1 %v11926_v9  ;;  %6462 = vmatprep.subr.bf16.mxu0 %v11929_v21  ;;  %v11977_v60 = vld [vmem:[%s15158_s16 + $0x534] ss:$8 sps:$4 sm:$0xff]   ;;  %v11972_v9 = vld [vmem:[%s15158_s16 + $0x450] ss:$8 sps:$4 sm:$0xff]  }
 0xe92   : > { %v11975_v21 = vld [vmem:[%s15158_s16 + $0x530] ss:$8 sps:$4 sm:$0xff]  }
 0xe94   : > { %6187 = vmatpush1.bf16.msra.mxu1 %v11924_v11  ;;  %6463 = vmatpush1.bf16.msra.mxu0 %v11927_v13  ;;  %v11980_v11 = vld [vmem:[%s15158_s16 + $0x464] ss:$8 sps:$4 sm:$0xff]  }
 0xe95   : > { %6188 = vmatprep.subr.bf16.mxu1 %v11932_v22  ;;  %6464 = vmatprep.subr.bf16.mxu0 %v11935_v18  ;;  %v11983_v13 = vld [vmem:[%s15158_s16 + $0x544] ss:$8 sps:$4 sm:$0xff]   ;;  %v11978_v22 = vld [vmem:[%s15158_s16 + $0x460] ss:$8 sps:$4 sm:$0xff]  }
 0xe96   : > { %v11981_v18 = vld [vmem:[%s15158_s16 + $0x540] ss:$8 sps:$4 sm:$0xff]  }
 0xe98   : > { %6189 = vmatpush1.bf16.msra.mxu1 %v11930_v23  ;;  %6465 = vmatpush1.bf16.msra.mxu0 %v11933_v31  ;;  %v11986_v23 = vld [vmem:[%s15158_s16 + $0x474] ss:$8 sps:$4 sm:$0xff]  }
 0xe99   : > { %6490 = vmatprep.subr.bf16.mxu1 %v14196_v28  ;;  %6466 = vmatprep.subr.bf16.mxu0 %v11938_v32  ;;  %v11989_v31 = vld [vmem:[%s15158_s16 + $0x554] ss:$8 sps:$4 sm:$0xff]   ;;  %v11984_v32 = vld [vmem:[%s15158_s16 + $0x470] ss:$8 sps:$4 sm:$0xff]  }
 0xe9c   : > { %6467 = vmatpush1.bf16.msra.mxu0 %v11936_v34  ;;  %v11987_v34 = vld [vmem:[%s15158_s16 + $0x550] ss:$8 sps:$4 sm:$0xff]  }
 0xe9d   : > { %6468 = vmatprep.subr.bf16.mxu0 %v11941_v42  ;;  %v11992_v42 = vld [vmem:[%s15158_s16 + $0x484] ss:$8 sps:$4 sm:$0xff]  }
 0xea0   : > { %6469 = vmatpush1.bf16.msra.mxu0 %v11939_v43  ;;  %v11995_v43 = vld [vmem:[%s15158_s16 + $0x564] ss:$8 sps:$4 sm:$0xff]  }
 0xea1   : > { %6470 = vmatprep.subr.bf16.mxu0 %v11944_v52  ;;  %v11990_v52 = vld [vmem:[%s15158_s16 + $0x480] ss:$8 sps:$4 sm:$0xff]  }
 0xea4   : > { %6471 = vmatpush1.bf16.msra.mxu0 %v11942_v61  ;;  %v11993_v61 = vld [vmem:[%s15158_s16 + $0x560] ss:$8 sps:$4 sm:$0xff]  }
 0xea5   : > { %6472 = vmatprep.subr.bf16.mxu0 %v11947_v62  ;;  %v11998_v62 = vld [vmem:[%s15158_s16 + $0x494] ss:$8 sps:$4 sm:$0xff]  }
 0xea8   : > { %6473 = vmatpush1.bf16.msra.mxu0 %v11945_v63  ;;  %v12001_v63 = vld [vmem:[%s15158_s16 + $0x574] ss:$8 sps:$4 sm:$0xff]  }
 0xea9   : > { %6774 = vmatprep.subr.bf16.mxu0 %v14196_v28 }
 0xf2e   : > { %v5709_v7 = vpop.f32.mrb[120].mxu0  ;;  %v5910_v8 = vpop.f32.mrb[188].mxu1 }
 0xf2f   : > { %v5711_v15 = vpop.f32.mrb[121].mxu0  ;;  %v14598_v16 = vadd.f32 %v5910_v8, %v5709_v7  ;;  %v5912_v19 = vpop.f32.mrb[189].mxu1  ;;  %v11996_v7 = vld [vmem:[%s15158_s16 + $0x490] ss:$8 sps:$4 sm:$0xff]  }
 0xf30   : > { %v5713_v27 = vpop.f32.mrb[122].mxu0  ;;  %v14600_v29 = vadd.f32 %v5912_v19, %v5711_v15  ;;  %v5914_v30 = vpop.f32.mrb[190].mxu1  ;;  %v11999_v8 = vld [vmem:[%s15158_s16 + $0x570] ss:$8 sps:$4 sm:$0xff]   ;;  %v12004_v15 = vld [vmem:[%s15158_s16 + $0x4a4] ss:$8 sps:$4 sm:$0xff]  }
 0xf31   : > { %v5714_v26 = vpop.f32.mrb[123].mxu0  ;;  %v5915_v37 = vpop.f32.mrb[191].mxu1  ;;  %v12007_v19 = vld [vmem:[%s15158_s16 + $0x584] ss:$8 sps:$4 sm:$0xff]   ;;  %v12002_v27 = vld [vmem:[%s15158_s16 + $0x4a0] ss:$8 sps:$4 sm:$0xff]  }
 0xf32   : > { %v12005_v30 = vld [vmem:[%s15158_s16 + $0x580] ss:$8 sps:$4 sm:$0xff]   ;;  %v12010_v26 = vld [vmem:[%s15158_s16 + $0x4b4] ss:$8 sps:$4 sm:$0xff]  }
 0xf33   : > { %v12013_v37 = vld [vmem:[%s15158_s16 + $0x594] ss:$8 sps:$4 sm:$0xff]  }
 0xf36   : > { %v5956_v17 = vpop.f32.mrb[124].mxu0 }
 0xf37   : > { %v5958_v40 = vpop.f32.mrb[125].mxu0  ;;  %v5963_v3 = vpack.c.bf16 %v5956_v17, %v5956_v17  ;;  %v12008_v17 = vld [vmem:[%s15158_s16 + $0x4b0] ss:$8 sps:$4 sm:$0xff]  }
 0xf38   : > { %v5964_v41 = vpack.c.bf16 %v5958_v40, %v5958_v40  ;;  %v5960_v39 = vpop.f32.mrb[126].mxu0  ;;  %v12011_v40 = vld [vmem:[%s15158_s16 + $0x590] ss:$8 sps:$4 sm:$0xff]  }
 0xf39   : > { %v5961_v47 = vpop.f32.mrb[127].mxu0  ;;  %v12019_v39 = vld [vmem:[%s15158_s16 + $0x5a4] ss:$8 sps:$4 sm:$0xff]  }
 0xf3a   : > { %6190 = vmatprep.mubr.bf16.mxu1 %v5964_v41  ;;  %v12016_v41 = vld [vmem:[%s15158_s16 + $0x4c4] ss:$8 sps:$4 sm:$0xff]   ;;  %v12017_v47 = vld [vmem:[%s15158_s16 + $0x5a0] ss:$8 sps:$4 sm:$0xff]  }
 0xf3b   : > { %6191 = vmatmul.mubr.bf16.vlgmr.msra.gmra.mrb[192].mxu1 %v5963_v3  ;;  %v12014_v3 = vld [vmem:[%s15158_s16 + $0x4c0] ss:$8 sps:$4 sm:$0xff]  }
 0xf3c   : > { %6491 = vmatpush1.bf16.msra.mxu1 %v14194_v35  ;;  %6522 = vmatprep.mubr.bf16.mxu1 %v12587_v10 }
 0xf3d   : > { %6726 = vmatprep.subr.bf16.mxu1 %v11950_v56  ;;  %v12022_v56 = vld [vmem:[%s15158_s16 + $0x4d4] ss:$8 sps:$4 sm:$0xff]  }
 0xf3e   : > { %v6240_v1 = vpop.f32.mrb[128].mxu0 }
 0xf3f   : > { %v6247_v24 = vpack.c.bf16 %v6240_v1, %v6240_v1  ;;  %v6242_v6 = vpop.f32.mrb[129].mxu0  ;;  %v12025_v1 = vld [vmem:[%s15158_s16 + $0x5b4] ss:$8 sps:$4 sm:$0xff]  }
 0xf40   : > { %v6248_v57 = vpack.c.bf16 %v6242_v6, %v6242_v6  ;;  %v6244_v48 = vpop.f32.mrb[130].mxu0  ;;  %v12023_v6 = vld [vmem:[%s15158_s16 + $0x5b0] ss:$8 sps:$4 sm:$0xff]  }
 0xf41   : > { %v6245_v14 = vpop.f32.mrb[131].mxu0  ;;  %v12029_v48 = vld [vmem:[%s15158_s16 + $0x5c0] ss:$8 sps:$4 sm:$0xff]  }
 0xf42   : > { %6474 = vmatprep.mubr.bf16.mxu0 %v6248_v57  ;;  %v12028_v57 = vld [vmem:[%s15158_s16 + $0x4e4] ss:$8 sps:$4 sm:$0xff]   ;;  %v12037_v14 = vld [vmem:[%s15158_s16 + $0x5d4] ss:$8 sps:$4 sm:$0xff]  }
 0xf43   : > { %6475 = vmatmul.mubr.bf16.vlgmr.msra.gmra.mrb[132].mxu0 %v6247_v24  ;;  %9727 = vmatmul.mubr.msk.bf16.vlgmr.msra.gmra.mrb[196].mxu1 %vm5355_vm6, %v6486_v49  ;;  %v12020_v24 = vld [vmem:[%s15158_s16 + $0x4d0] ss:$8 sps:$4 sm:$0xff]   ;;  %v12026_v49 = vld [vmem:[%s15158_s16 + $0x4e0] ss:$8 sps:$4 sm:$0xff]  }
 0xf44   : > { %6727 = vmatpush1.bf16.msra.mxu1 %v11948_v0  ;;  %6775 = vmatpush1.bf16.msra.mxu0 %v14194_v35  ;;  %v12031_v0 = vld [vmem:[%s15158_s16 + $0x5c4] ss:$8 sps:$4 sm:$0xff]  }
 0xf45   : > { %6728 = vmatprep.subr.bf16.mxu1 %v11953_v12  ;;  %6806 = vmatprep.mubr.bf16.mxu0 %v12587_v10  ;;  %v12034_v12 = vld [vmem:[%s15158_s16 + $0x4f4] ss:$8 sps:$4 sm:$0xff]  }
 0xf46   : > { %7010 = vmatprep.subr.bf16.mxu0 %v11959_v20  ;;  %v12032_v20 = vld [vmem:[%s15158_s16 + $0x4f0] ss:$8 sps:$4 sm:$0xff]  }
 0xf48   : > { %6729 = vmatpush1.bf16.msra.mxu1 %v11951_v33  ;;  %v12035_v33 = vld [vmem:[%s15158_s16 + $0x5d0] ss:$8 sps:$4 sm:$0xff]  }
 0xf49   : > { %6730 = vmatprep.subr.bf16.mxu1 %v11956_v36  ;;  %v12040_v36 = vld [vmem:[%s15158_s16 + $0x5e4] ss:$8 sps:$4 sm:$0xff]  }
 0xf4b   : > { %9792 = vmatmul.mubr.msk.bf16.vlgmr.msra.gmra.mrb[136].mxu0 %vm5355_vm6, %v6770_v53  ;;  %v12041_v53 = vld [vmem:[%s15158_s16 + $0x5f0] ss:$8 sps:$4 sm:$0xff]  }
 0xf4c   : > { %6731 = vmatpush1.bf16.msra.mxu1 %v11954_v38  ;;  %7011 = vmatpush1.bf16.msra.mxu0 %v11957_v54  ;;  %v12038_v38 = vld [vmem:[%s15158_s16 + $0x5e0] ss:$8 sps:$4 sm:$0xff]   ;;  %v12043_v54 = vld [vmem:[%s15158_s16 + $0x5f4] ss:$8 sps:$4 sm:$0xff]  }
 0xf4d   : > { %6732 = vmatprep.subr.bf16.mxu1 %v11962_v4  ;;  %7012 = vmatprep.subr.bf16.mxu0 %v11965_v50 }
 0xf50   : > { %6733 = vmatpush1.bf16.msra.mxu1 %v11960_v5  ;;  %7013 = vmatpush1.bf16.msra.mxu0 %v11963_v25 }
 0xf51   : > { %6734 = vmatprep.subr.bf16.mxu1 %v11968_v44  ;;  %7014 = vmatprep.subr.bf16.mxu0 %v11971_v45 }
 0xf54   : > { %6735 = vmatpush1.bf16.msra.mxu1 %v11966_v46  ;;  %7015 = vmatpush1.bf16.msra.mxu0 %v11969_v58 }
 0xf55   : > { %6736 = vmatprep.subr.bf16.mxu1 %v11974_v59  ;;  %7016 = vmatprep.subr.bf16.mxu0 %v11977_v60 }
 0xf58   : > { %6737 = vmatpush1.bf16.msra.mxu1 %v11972_v9  ;;  %7017 = vmatpush1.bf16.msra.mxu0 %v11975_v21 }
 0xf59   : > { %6738 = vmatprep.subr.bf16.mxu1 %v11980_v11  ;;  %7018 = vmatprep.subr.bf16.mxu0 %v11983_v13 }
 0xf5c   : > { %6739 = vmatpush1.bf16.msra.mxu1 %v11978_v22  ;;  %7019 = vmatpush1.bf16.msra.mxu0 %v11981_v18 }
 0xf5d   : > { %6740 = vmatprep.subr.bf16.mxu1 %v11986_v23  ;;  %7020 = vmatprep.subr.bf16.mxu0 %v11989_v31 }
 0xf60   : > { %6741 = vmatpush1.bf16.msra.mxu1 %v11984_v32  ;;  %7021 = vmatpush1.bf16.msra.mxu0 %v11987_v34 }
 0xf61   : > { %6742 = vmatprep.subr.bf16.mxu1 %v11992_v42  ;;  %7022 = vmatprep.subr.bf16.mxu0 %v11995_v43  ;;  %v12044_v43 = vld [vmem:[%s15158_s16 + $0x600] ss:$8 sps:$4 sm:$0xff]  }
 0xf64   : > { %6743 = vmatpush1.bf16.msra.mxu1 %v11990_v52  ;;  %7023 = vmatpush1.bf16.msra.mxu0 %v11993_v61  ;;  %v7054_v52 = vld [vmem:[#allocation10 + $0xc] sm:$0x3] }
 0xf65   : > { %6744 = vmatprep.subr.bf16.mxu1 %v11998_v62  ;;  %7024 = vmatprep.subr.bf16.mxu0 %v12001_v63  ;;  %v12049_v62 = vld [vmem:[%s15158_s16 + $0x614] ss:$8 sps:$4 sm:$0xff]  }
 0xf68   : > { %6745 = vmatpush1.bf16.msra.mxu1 %v11996_v7  ;;  %7025 = vmatpush1.bf16.msra.mxu0 %v11999_v8  ;;  %v12094_v7 = vld [vmem:[%s15158_s16 + $0x704] ss:$8 sps:$4 sm:$0xff]   ;;  %v12047_v8 = vld [vmem:[%s15158_s16 + $0x610] ss:$8 sps:$4 sm:$0xff]  }
 0xf69   : > { %6746 = vmatprep.subr.bf16.mxu1 %v12004_v15  ;;  %7026 = vmatprep.subr.bf16.mxu0 %v12007_v19  ;;  %v12052_v15 = vld [vmem:[%s15158_s16 + $0x624] ss:$8 sps:$4 sm:$0xff]   ;;  %v12050_v19 = vld [vmem:[%s15158_s16 + $0x620] ss:$8 sps:$4 sm:$0xff]  }
 0xf6c   : > { %6747 = vmatpush1.bf16.msra.mxu1 %v12002_v27  ;;  %7027 = vmatpush1.bf16.msra.mxu0 %v12005_v30  ;;  %v7338_v27 = vld [vmem:[#allocation10 + $0xe] sm:$0x3]  ;;  %v12092_v30 = vld [vmem:[%s15158_s16 + $0x700] ss:$8 sps:$4 sm:$0xff]  }
 0xf6d   : > { %6748 = vmatprep.subr.bf16.mxu1 %v12010_v26  ;;  %7028 = vmatprep.subr.bf16.mxu0 %v12013_v37  ;;  %v12055_v26 = vld [vmem:[%s15158_s16 + $0x634] ss:$8 sps:$4 sm:$0xff]  }
 0xf6e   : > { %v12097_v37 = vld [vmem:[%s15158_s16 + $0x714] ss:$8 sps:$4 sm:$0xff]  }
 0xf70   : > { %6749 = vmatpush1.bf16.msra.mxu1 %v12008_v17  ;;  %7029 = vmatpush1.bf16.msra.mxu0 %v12011_v40  ;;  %v12053_v17 = vld [vmem:[%s15158_s16 + $0x630] ss:$8 sps:$4 sm:$0xff]  }
 0xf71   : > { %6750 = vmatprep.subr.bf16.mxu1 %v12016_v41  ;;  %7030 = vmatprep.subr.bf16.mxu0 %v12019_v39  ;;  %v12095_v40 = vld [vmem:[%s15158_s16 + $0x710] ss:$8 sps:$4 sm:$0xff]   ;;  %v12058_v41 = vld [vmem:[%s15158_s16 + $0x644] ss:$8 sps:$4 sm:$0xff]  }
 0xf72   : > { %v12100_v39 = vld [vmem:[%s15158_s16 + $0x724] ss:$8 sps:$4 sm:$0xff]  }
 0xf74   : > { %6751 = vmatpush1.bf16.msra.mxu1 %v12014_v3  ;;  %7031 = vmatpush1.bf16.msra.mxu0 %v12017_v47  ;;  %v12056_v3 = vld [vmem:[%s15158_s16 + $0x640] ss:$8 sps:$4 sm:$0xff]  }
 0xf75   : > { %6752 = vmatprep.subr.bf16.mxu1 %v12022_v56  ;;  %7032 = vmatprep.subr.bf16.mxu0 %v12025_v1  ;;  %v12098_v47 = vld [vmem:[%s15158_s16 + $0x720] ss:$8 sps:$4 sm:$0xff]   ;;  %v12061_v56 = vld [vmem:[%s15158_s16 + $0x654] ss:$8 sps:$4 sm:$0xff]  }
 0xf76   : > { %v12103_v1 = vld [vmem:[%s15158_s16 + $0x734] ss:$8 sps:$4 sm:$0xff]  }
 0xf78   : > { %6753 = vmatpush1.bf16.msra.mxu1 %v12020_v24  ;;  %7033 = vmatpush1.bf16.msra.mxu0 %v12023_v6  ;;  %v12059_v24 = vld [vmem:[%s15158_s16 + $0x650] ss:$8 sps:$4 sm:$0xff]  }
 0xf79   : > { %6754 = vmatprep.subr.bf16.mxu1 %v12028_v57  ;;  %7034 = vmatprep.subr.bf16.mxu0 %v12031_v0  ;;  %v12101_v6 = vld [vmem:[%s15158_s16 + $0x730] ss:$8 sps:$4 sm:$0xff]   ;;  %v12064_v57 = vld [vmem:[%s15158_s16 + $0x664] ss:$8 sps:$4 sm:$0xff]  }
 0xf7a   : > { %v12106_v0 = vld [vmem:[%s15158_s16 + $0x744] ss:$8 sps:$4 sm:$0xff]  }
 0xf7c   : > { %6755 = vmatpush1.bf16.msra.mxu1 %v12026_v49  ;;  %7035 = vmatpush1.bf16.msra.mxu0 %v12029_v48  ;;  %v12062_v49 = vld [vmem:[%s15158_s16 + $0x660] ss:$8 sps:$4 sm:$0xff]  }
 0xf7d   : > { %6756 = vmatprep.subr.bf16.mxu1 %v12034_v12  ;;  %7036 = vmatprep.subr.bf16.mxu0 %v12037_v14  ;;  %v12104_v48 = vld [vmem:[%s15158_s16 + $0x740] ss:$8 sps:$4 sm:$0xff]   ;;  %v12067_v12 = vld [vmem:[%s15158_s16 + $0x674] ss:$8 sps:$4 sm:$0xff]  }
 0xf7e   : > { %v12109_v14 = vld [vmem:[%s15158_s16 + $0x754] ss:$8 sps:$4 sm:$0xff]  }
 0xf80   : > { %6757 = vmatpush1.bf16.msra.mxu1 %v12032_v20  ;;  %7037 = vmatpush1.bf16.msra.mxu0 %v12035_v33  ;;  %v12065_v20 = vld [vmem:[%s15158_s16 + $0x670] ss:$8 sps:$4 sm:$0xff]  }
 0xf81   : > { %7058 = vmatprep.subr.bf16.mxu1 %v14196_v28  ;;  %7038 = vmatprep.subr.bf16.mxu0 %v12040_v36  ;;  %v12107_v33 = vld [vmem:[%s15158_s16 + $0x750] ss:$8 sps:$4 sm:$0xff]   ;;  %v12070_v36 = vld [vmem:[%s15158_s16 + $0x684] ss:$8 sps:$4 sm:$0xff]  }
 0xf84   : > { %7039 = vmatpush1.bf16.msra.mxu0 %v12038_v38  ;;  %v12112_v38 = vld [vmem:[%s15158_s16 + $0x764] ss:$8 sps:$4 sm:$0xff]  }
 0xf85   : > { %7040 = vmatprep.subr.bf16.mxu0 %v12043_v54  ;;  %v12068_v54 = vld [vmem:[%s15158_s16 + $0x680] ss:$8 sps:$4 sm:$0xff]  }
 0xf88   : > { %7041 = vmatpush1.bf16.msra.mxu0 %v12041_v53  ;;  %v12110_v53 = vld [vmem:[%s15158_s16 + $0x760] ss:$8 sps:$4 sm:$0xff]  }
 0xf89   : > { %7342 = vmatprep.subr.bf16.mxu0 %v14196_v28 }
0x100e   : > { %v6192_v4 = vpop.f32.mrb[192].mxu1 }
0x100f   : > { %v6199_v50 = vadd.f32 %v6192_v4, %v14598_v16  ;;  %v6194_v5 = vpop.f32.mrb[193].mxu1  ;;  %v12046_v16 = vld [vmem:[%s15158_s16 + $0x604] ss:$8 sps:$4 sm:$0xff]   ;;  %v12073_v4 = vld [vmem:[%s15158_s16 + $0x694] ss:$8 sps:$4 sm:$0xff]  }
0x1010   : > { %v6200_v25 = vadd.f32 %v6194_v5, %v14600_v29  ;;  %v6196_v44 = vpop.f32.mrb[194].mxu1  ;;  %v12071_v5 = vld [vmem:[%s15158_s16 + $0x690] ss:$8 sps:$4 sm:$0xff]  }
0x1011   : > { %v6197_v45 = vpop.f32.mrb[195].mxu1  ;;  %v12076_v44 = vld [vmem:[%s15158_s16 + $0x6a4] ss:$8 sps:$4 sm:$0xff]  }
0x1012   : > { %v12118_v45 = vld [vmem:[%s15158_s16 + $0x784] ss:$8 sps:$4 sm:$0xff]  }
0x1016   : > { %v6476_v46 = vpop.f32.mrb[132].mxu0  ;;  %v6524_v58 = vpop.f32.mrb[196].mxu1 }
0x1017   : > { %v14804_v59 = vadd.f32 %v6476_v46, %v6199_v50  ;;  %v6478_v60 = vpop.f32.mrb[133].mxu0  ;;  %v6526_v9 = vpop.f32.mrb[197].mxu1  ;;  %v6531_v18 = vpack.c.bf16 %v6524_v58, %v6524_v58  ;;  %v12115_v50 = vld [vmem:[%s15158_s16 + $0x774] ss:$8 sps:$4 sm:$0xff]   ;;  %v12074_v46 = vld [vmem:[%s15158_s16 + $0x6a0] ss:$8 sps:$4 sm:$0xff]  }
0x1018   : > { %v14806_v21 = vadd.f32 %v6478_v60, %v6200_v25  ;;  %v6532_v11 = vpack.c.bf16 %v6526_v9, %v6526_v9  ;;  %v6480_v13 = vpop.f32.mrb[134].mxu0  ;;  %v6528_v22 = vpop.f32.mrb[198].mxu1  ;;  %v12113_v25 = vld [vmem:[%s15158_s16 + $0x770] ss:$8 sps:$4 sm:$0xff]   ;;  %v12116_v58 = vld [vmem:[%s15158_s16 + $0x780] ss:$8 sps:$4 sm:$0xff]  }
0x1019   : > { %v6481_v23 = vpop.f32.mrb[135].mxu0  ;;  %v6529_v29 = vpop.f32.mrb[199].mxu1  ;;  %v12079_v60 = vld [vmem:[%s15158_s16 + $0x6b4] ss:$8 sps:$4 sm:$0xff]   ;;  %v12119_v13 = vld [vmem:[%s15158_s16 + $0x790] ss:$8 sps:$4 sm:$0xff]  }
0x101a   : > { %6758 = vmatprep.mubr.bf16.mxu1 %v6532_v11  ;;  %v12121_v9 = vld [vmem:[%s15158_s16 + $0x794] ss:$8 sps:$4 sm:$0xff]   ;;  %v12077_v11 = vld [vmem:[%s15158_s16 + $0x6b0] ss:$8 sps:$4 sm:$0xff]   ;;  %v12082_v22 = vld [vmem:[%s15158_s16 + $0x6c4] ss:$8 sps:$4 sm:$0xff]  }
0x101b   : > { %6759 = vmatmul.mubr.bf16.vlgmr.msra.gmra.mrb[200].mxu1 %v6531_v18  ;;  %v12124_v18 = vld [vmem:[%s15158_s16 + $0x7a4] ss:$8 sps:$4 sm:$0xff]   ;;  %v12080_v23 = vld [vmem:[%s15158_s16 + $0x6c0] ss:$8 sps:$4 sm:$0xff]   ;;  %v12085_v29 = vld [vmem:[%s15158_s16 + $0x6d4] ss:$8 sps:$4 sm:$0xff]  }
0x101c   : > { %7059 = vmatpush1.bf16.msra.mxu1 %v14194_v35  ;;  %7090 = vmatprep.mubr.bf16.mxu1 %v12587_v10 }
0x101d   : > { %7294 = vmatprep.subr.bf16.mxu1 %v12046_v16  ;;  %v12122_v16 = vld [vmem:[%s15158_s16 + $0x7a0] ss:$8 sps:$4 sm:$0xff]  }
0x101e   : > { %v6808_v31 = vpop.f32.mrb[136].mxu0 }
0x101f   : > { %v6815_v32 = vpack.c.bf16 %v6808_v31, %v6808_v31  ;;  %v6810_v34 = vpop.f32.mrb[137].mxu0  ;;  %v12083_v31 = vld [vmem:[%s15158_s16 + $0x6d0] ss:$8 sps:$4 sm:$0xff]  }
0x1020   : > { %v6816_v42 = vpack.c.bf16 %v6810_v34, %v6810_v34  ;;  %v6812_v61 = vpop.f32.mrb[138].mxu0  ;;  %v12086_v34 = vld [vmem:[%s15158_s16 + $0x6e0] ss:$8 sps:$4 sm:$0xff]  }
0x1021   : > { %v6813_v63 = vpop.f32.mrb[139].mxu0  ;;  %v12125_v61 = vld [vmem:[%s15158_s16 + $0x7b0] ss:$8 sps:$4 sm:$0xff]  }
0x1022   : > { %7042 = vmatprep.mubr.bf16.mxu0 %v6816_v42  ;;  %v12091_v42 = vld [vmem:[%s15158_s16 + $0x6f4] ss:$8 sps:$4 sm:$0xff]   ;;  %v12128_v63 = vld [vmem:[%s15158_s16 + $0x7c0] ss:$8 sps:$4 sm:$0xff]  }
0x1023   : > { %7043 = vmatmul.mubr.bf16.vlgmr.msra.gmra.mrb[140].mxu0 %v6815_v32  ;;  %9857 = vmatmul.mubr.msk.bf16.vlgmr.msra.gmra.mrb[204].mxu1 %vm5355_vm6, %v7054_v52  ;;  %v12088_v32 = vld [vmem:[%s15158_s16 + $0x6e4] ss:$8 sps:$4 sm:$0xff]   ;;  %v12127_v52 = vld [vmem:[%s15158_s16 + $0x7b4] ss:$8 sps:$4 sm:$0xff]  }
0x1024   : > { %7295 = vmatpush1.bf16.msra.mxu1 %v12044_v43  ;;  %7343 = vmatpush1.bf16.msra.mxu0 %v14194_v35  ;;  %v12089_v43 = vld [vmem:[%s15158_s16 + $0x6f0] ss:$8 sps:$4 sm:$0xff]  }
0x1025   : > { %7296 = vmatprep.subr.bf16.mxu1 %v12049_v62  ;;  %7374 = vmatprep.mubr.bf16.mxu0 %v12587_v10  ;;  %v12130_v62 = vld [vmem:[%s15158_s16 + $0x7c4] ss:$8 sps:$4 sm:$0xff]  }
0x1026   : > { %7578 = vmatprep.subr.bf16.mxu0 %v12094_v7  ;;  %v12131_v7 = vld [vmem:[%s15158_s16 + $0x7d0] ss:$8 sps:$4 sm:$0xff]  }
0x1028   : > { %7297 = vmatpush1.bf16.msra.mxu1 %v12047_v8  ;;  %v12136_v8 = vld [vmem:[%s15158_s16 + $0x7e4] ss:$8 sps:$4 sm:$0xff]  }
0x1029   : > { %7298 = vmatprep.subr.bf16.mxu1 %v12052_v15  ;;  %v12134_v15 = vld [vmem:[%s15158_s16 + $0x7e0] ss:$8 sps:$4 sm:$0xff]  }
0x102b   : > { %9922 = vmatmul.mubr.msk.bf16.vlgmr.msra.gmra.mrb[144].mxu0 %vm5355_vm6, %v7338_v27  ;;  %v12137_v27 = vld [vmem:[%s15158_s16 + $0x7f0] ss:$8 sps:$4 sm:$0xff]  }
0x102c   : > { %7299 = vmatpush1.bf16.msra.mxu1 %v12050_v19  ;;  %7579 = vmatpush1.bf16.msra.mxu0 %v12092_v30  ;;  %v12139_v19 = vld [vmem:[%s15158_s16 + $0x7f4] ss:$8 sps:$4 sm:$0xff]  }
0x102d   : > { %7300 = vmatprep.subr.bf16.mxu1 %v12055_v26  ;;  %7580 = vmatprep.subr.bf16.mxu0 %v12097_v37 }
0x1030   : > { %7301 = vmatpush1.bf16.msra.mxu1 %v12053_v17  ;;  %7581 = vmatpush1.bf16.msra.mxu0 %v12095_v40 }
0x1031   : > { %7302 = vmatprep.subr.bf16.mxu1 %v12058_v41  ;;  %7582 = vmatprep.subr.bf16.mxu0 %v12100_v39 }
0x1034   : > { %7303 = vmatpush1.bf16.msra.mxu1 %v12056_v3  ;;  %7583 = vmatpush1.bf16.msra.mxu0 %v12098_v47 }
0x1035   : > { %7304 = vmatprep.subr.bf16.mxu1 %v12061_v56  ;;  %7584 = vmatprep.subr.bf16.mxu0 %v12103_v1 }
0x1038   : > { %7305 = vmatpush1.bf16.msra.mxu1 %v12059_v24  ;;  %7585 = vmatpush1.bf16.msra.mxu0 %v12101_v6 }
0x1039   : > { %7306 = vmatprep.subr.bf16.mxu1 %v12064_v57  ;;  %7586 = vmatprep.subr.bf16.mxu0 %v12106_v0 }
0x103c   : > { %7307 = vmatpush1.bf16.msra.mxu1 %v12062_v49  ;;  %7587 = vmatpush1.bf16.msra.mxu0 %v12104_v48 }
0x103d   : > { %7308 = vmatprep.subr.bf16.mxu1 %v12067_v12  ;;  %7588 = vmatprep.subr.bf16.mxu0 %v12109_v14 }
0x1040   : > { %7309 = vmatpush1.bf16.msra.mxu1 %v12065_v20  ;;  %7589 = vmatpush1.bf16.msra.mxu0 %v12107_v33 }
0x1041   : > { %7310 = vmatprep.subr.bf16.mxu1 %v12070_v36  ;;  %7590 = vmatprep.subr.bf16.mxu0 %v12112_v38  ;;  %v7622_v36 = vld [vmem:[#allocation10 + $0x10] sm:$0x3]  ;;  %v12140_v38 = vld [vmem:[%s15158_s16 + $0x800] ss:$8 sps:$4 sm:$0xff]  }
0x1044   : > { %7311 = vmatpush1.bf16.msra.mxu1 %v12068_v54  ;;  %7591 = vmatpush1.bf16.msra.mxu0 %v12110_v53  ;;  %v12145_v53 = vld [vmem:[%s15158_s16 + $0x814] ss:$8 sps:$4 sm:$0xff]  }
0x1045   : > { %7312 = vmatprep.subr.bf16.mxu1 %v12073_v4  ;;  %7592 = vmatprep.subr.bf16.mxu0 %v12115_v50  ;;  %v12146_v50 = vld [vmem:[%s15158_s16 + $0x820] ss:$8 sps:$4 sm:$0xff]  }
0x1048   : > { %7313 = vmatpush1.bf16.msra.mxu1 %v12071_v5  ;;  %7593 = vmatpush1.bf16.msra.mxu0 %v12113_v25  ;;  %v12151_v5 = vld [vmem:[%s15158_s16 + $0x834] ss:$8 sps:$4 sm:$0xff]   ;;  %v12149_v25 = vld [vmem:[%s15158_s16 + $0x830] ss:$8 sps:$4 sm:$0xff]  }
0x1049   : > { %7314 = vmatprep.subr.bf16.mxu1 %v12076_v44  ;;  %7594 = vmatprep.subr.bf16.mxu0 %v12118_v45  ;;  %v12154_v44 = vld [vmem:[%s15158_s16 + $0x844] ss:$8 sps:$4 sm:$0xff]   ;;  %v12152_v45 = vld [vmem:[%s15158_s16 + $0x840] ss:$8 sps:$4 sm:$0xff]  }
0x104c   : > { %7315 = vmatpush1.bf16.msra.mxu1 %v12074_v46  ;;  %7595 = vmatpush1.bf16.msra.mxu0 %v12116_v58  ;;  %v12157_v46 = vld [vmem:[%s15158_s16 + $0x854] ss:$8 sps:$4 sm:$0xff]   ;;  %v12155_v58 = vld [vmem:[%s15158_s16 + $0x850] ss:$8 sps:$4 sm:$0xff]  }
0x104d   : > { %7316 = vmatprep.subr.bf16.mxu1 %v12079_v60  ;;  %7596 = vmatprep.subr.bf16.mxu0 %v12121_v9  ;;  %v12160_v60 = vld [vmem:[%s15158_s16 + $0x864] ss:$8 sps:$4 sm:$0xff]   ;;  %v12158_v9 = vld [vmem:[%s15158_s16 + $0x860] ss:$8 sps:$4 sm:$0xff]  }
0x1050   : > { %7317 = vmatpush1.bf16.msra.mxu1 %v12077_v11  ;;  %7597 = vmatpush1.bf16.msra.mxu0 %v12119_v13  ;;  %v12163_v11 = vld [vmem:[%s15158_s16 + $0x874] ss:$8 sps:$4 sm:$0xff]   ;;  %v12161_v13 = vld [vmem:[%s15158_s16 + $0x870] ss:$8 sps:$4 sm:$0xff]  }
0x1051   : > { %7318 = vmatprep.subr.bf16.mxu1 %v12082_v22  ;;  %7598 = vmatprep.subr.bf16.mxu0 %v12124_v18  ;;  %v12166_v22 = vld [vmem:[%s15158_s16 + $0x884] ss:$8 sps:$4 sm:$0xff]   ;;  %v12164_v18 = vld [vmem:[%s15158_s16 + $0x880] ss:$8 sps:$4 sm:$0xff]  }
0x1054   : > { %7319 = vmatpush1.bf16.msra.mxu1 %v12080_v23  ;;  %7599 = vmatpush1.bf16.msra.mxu0 %v12122_v16  ;;  %v12169_v23 = vld [vmem:[%s15158_s16 + $0x894] ss:$8 sps:$4 sm:$0xff]   ;;  %v12167_v16 = vld [vmem:[%s15158_s16 + $0x890] ss:$8 sps:$4 sm:$0xff]  }
0x1055   : > { %7320 = vmatprep.subr.bf16.mxu1 %v12085_v29  ;;  %7600 = vmatprep.subr.bf16.mxu0 %v12127_v52  ;;  %v12172_v29 = vld [vmem:[%s15158_s16 + $0x8a4] ss:$8 sps:$4 sm:$0xff]   ;;  %v12181_v52 = vld [vmem:[%s15158_s16 + $0x8d4] ss:$8 sps:$4 sm:$0xff]  }
0x1058   : > { %7321 = vmatpush1.bf16.msra.mxu1 %v12083_v31  ;;  %7601 = vmatpush1.bf16.msra.mxu0 %v12125_v61  ;;  %v12170_v31 = vld [vmem:[%s15158_s16 + $0x8a0] ss:$8 sps:$4 sm:$0xff]   ;;  %v12179_v61 = vld [vmem:[%s15158_s16 + $0x8d0] ss:$8 sps:$4 sm:$0xff]  }
0x1059   : > { %7322 = vmatprep.subr.bf16.mxu1 %v12088_v32  ;;  %7602 = vmatprep.subr.bf16.mxu0 %v12130_v62  ;;  %v12175_v32 = vld [vmem:[%s15158_s16 + $0x8b4] ss:$8 sps:$4 sm:$0xff]   ;;  %v12184_v62 = vld [vmem:[%s15158_s16 + $0x8e4] ss:$8 sps:$4 sm:$0xff]  }
0x105c   : > { %7323 = vmatpush1.bf16.msra.mxu1 %v12086_v34  ;;  %7603 = vmatpush1.bf16.msra.mxu0 %v12128_v63  ;;  %v12173_v34 = vld [vmem:[%s15158_s16 + $0x8b0] ss:$8 sps:$4 sm:$0xff]   ;;  %v12182_v63 = vld [vmem:[%s15158_s16 + $0x8e0] ss:$8 sps:$4 sm:$0xff]  }
0x105d   : > { %7324 = vmatprep.subr.bf16.mxu1 %v12091_v42  ;;  %v12178_v42 = vld [vmem:[%s15158_s16 + $0x8c4] ss:$8 sps:$4 sm:$0xff]  }
0x1060   : > { %7325 = vmatpush1.bf16.msra.mxu1 %v12089_v43  ;;  %v12176_v43 = vld [vmem:[%s15158_s16 + $0x8c0] ss:$8 sps:$4 sm:$0xff]  }
0x1061   : > { %7626 = vmatprep.subr.bf16.mxu1 %v14196_v28  ;;  %v12133_v28 = vld [vmem:[%s15158_s16 + $0x7d4] ss:$8 sps:$4 sm:$0xff]  }
0x1062   : > { %7604 = vmatprep.subr.bf16.mxu0 %v12133_v28  ;;  %v12187_v28 = vld [vmem:[%s15158_s16 + $0x8f4] ss:$8 sps:$4 sm:$0xff]  }
0x1063   : > { %7605 = vmatpush1.bf16.msra.mxu0 %v12131_v7  ;;  %v12185_v7 = vld [vmem:[%s15158_s16 + $0x8f0] ss:$8 sps:$4 sm:$0xff]  }
0x1064   : > { %7606 = vmatprep.subr.bf16.mxu0 %v12136_v8  ;;  %v12188_v8 = vld [vmem:[#allocation12] ss:$16 sps:$4 sm:$0xff]  }
0x1067   : > { %7607 = vmatpush1.bf16.msra.mxu0 %v12134_v15  ;;  %v12190_v15 = vld [vmem:[#allocation12 + $0x4] ss:$16 sps:$4 sm:$0xff]  }
0x1068   : > { %7608 = vmatprep.subr.bf16.mxu0 %v12139_v19  ;;  %v12193_v19 = vld [vmem:[#allocation12 + $0xc] ss:$16 sps:$4 sm:$0xff]  }
0x106b   : > { %7609 = vmatpush1.bf16.msra.mxu0 %v12137_v27  ;;  %v12196_v27 = vld [vmem:[#allocation12 + $0x24] ss:$16 sps:$4 sm:$0xff]  }
0x106c   : > { %8329 = vmatprep.subr.bf16.mxu0 %v12190_v15  ;;  %v12241_v15 = vld [vmem:[#allocation12 + $0x10c] ss:$16 sps:$4 sm:$0xff]  }
0x10ee   : > { %v6760_v30 = vpop.f32.mrb[200].mxu1 }
0x10ef   : > { %v6767_v26 = vadd.f32 %v6760_v30, %v14804_v59  ;;  %v6762_v37 = vpop.f32.mrb[201].mxu1  ;;  %v12142_v59 = vld [vmem:[%s15158_s16 + $0x804] ss:$8 sps:$4 sm:$0xff]  }
0x10f0   : > { %v6768_v17 = vadd.f32 %v6762_v37, %v14806_v21  ;;  %v6764_v40 = vpop.f32.mrb[202].mxu1  ;;  %v12194_v30 = vld [vmem:[#allocation12 + $0x20] ss:$16 sps:$4 sm:$0xff]  }
0x10f1   : > { %v6765_v41 = vpop.f32.mrb[203].mxu1  ;;  %v12200_v37 = vld [vmem:[#allocation12 + $0x40] ss:$16 sps:$4 sm:$0xff]  }
0x10f2   : > { %v12206_v40 = vld [vmem:[#allocation12 + $0x60] ss:$16 sps:$4 sm:$0xff]   ;;  %v12214_v41 = vld [vmem:[#allocation12 + $0x84] ss:$16 sps:$4 sm:$0xff]  }
0x10f6   : > { %v7044_v39 = vpop.f32.mrb[140].mxu0  ;;  %v7092_v3 = vpop.f32.mrb[204].mxu1 }
0x10f7   : > { %v15009_v47 = vadd.f32 %v7044_v39, %v6767_v26  ;;  %v7046_v56 = vpop.f32.mrb[141].mxu0  ;;  %v7094_v1 = vpop.f32.mrb[205].mxu1  ;;  %v7099_v49 = vpack.c.bf16 %v7092_v3, %v7092_v3  ;;  %v12202_v26 = vld [vmem:[#allocation12 + $0x44] ss:$16 sps:$4 sm:$0xff]   ;;  %v12212_v39 = vld [vmem:[#allocation12 + $0x80] ss:$16 sps:$4 sm:$0xff]  }
0x10f8   : > { %v15011_v24 = vadd.f32 %v7046_v56, %v6768_v17  ;;  %v7100_v6 = vpack.c.bf16 %v7094_v1, %v7094_v1  ;;  %v7048_v57 = vpop.f32.mrb[142].mxu0  ;;  %v7096_v0 = vpop.f32.mrb[206].mxu1  ;;  %v12208_v17 = vld [vmem:[#allocation12 + $0x64] ss:$16 sps:$4 sm:$0xff]   ;;  %v12218_v56 = vld [vmem:[#allocation12 + $0xa0] ss:$16 sps:$4 sm:$0xff]  }
0x10f9   : > { %v7049_v48 = vpop.f32.mrb[143].mxu0  ;;  %v7097_v12 = vpop.f32.mrb[207].mxu1  ;;  %v12220_v3 = vld [vmem:[#allocation12 + $0xa4] ss:$16 sps:$4 sm:$0xff]   ;;  %v12230_v0 = vld [vmem:[#allocation12 + $0xe0] ss:$16 sps:$4 sm:$0xff]  }
0x10fa   : > { %7326 = vmatprep.mubr.bf16.mxu1 %v7100_v6  ;;  %v12226_v1 = vld [vmem:[#allocation12 + $0xc4] ss:$16 sps:$4 sm:$0xff]   ;;  %v12224_v6 = vld [vmem:[#allocation12 + $0xc0] ss:$16 sps:$4 sm:$0xff]  }
0x10fb   : > { %7327 = vmatmul.mubr.bf16.vlgmr.msra.gmra.mrb[208].mxu1 %v7099_v49  ;;  %v12232_v57 = vld [vmem:[#allocation12 + $0xe4] ss:$16 sps:$4 sm:$0xff]   ;;  %v12236_v48 = vld [vmem:[#allocation12 + $0x100] ss:$16 sps:$4 sm:$0xff]  }
0x10fc   : > { %7627 = vmatpush1.bf16.msra.mxu1 %v14194_v35  ;;  %7658 = vmatprep.mubr.bf16.mxu1 %v12587_v10  ;;  %v12143_v10 = vld [vmem:[%s15158_s16 + $0x810] ss:$8 sps:$4 sm:$0xff]   ;;  %v12148_v35 = vld [vmem:[%s15158_s16 + $0x824] ss:$8 sps:$4 sm:$0xff]  }
0x10fd   : > { %7862 = vmatprep.subr.bf16.mxu1 %v12142_v59  ;;  %v12238_v49 = vld [vmem:[#allocation12 + $0x104] ss:$16 sps:$4 sm:$0xff]   ;;  %v12242_v59 = vld [vmem:[#allocation12 + $0x120] ss:$16 sps:$4 sm:$0xff]  }
0x10fe   : > { %v7376_v21 = vpop.f32.mrb[144].mxu0  ;;  %v12244_v12 = vld [vmem:[#allocation12 + $0x124] ss:$16 sps:$4 sm:$0xff]  }
0x10ff   : > { %v7383_v14 = vpack.c.bf16 %v7376_v21, %v7376_v21  ;;  %v7378_v20 = vpop.f32.mrb[145].mxu0  ;;  %v12250_v21 = vld [vmem:[#allocation12 + $0x144] ss:$16 sps:$4 sm:$0xff]  }
0x1100   : > { %v7384_v33 = vpack.c.bf16 %v7378_v20, %v7378_v20  ;;  %v7380_v54 = vpop.f32.mrb[146].mxu0  ;;  %v12256_v20 = vld [vmem:[#allocation12 + $0x164] ss:$16 sps:$4 sm:$0xff]  }
0x1101   : > { %v7381_v4 = vpop.f32.mrb[147].mxu0  ;;  %v12268_v54 = vld [vmem:[#allocation12 + $0x1a4] ss:$16 sps:$4 sm:$0xff]  }
0x1102   : > { %7610 = vmatprep.mubr.bf16.mxu0 %v7384_v33  ;;  %v12254_v33 = vld [vmem:[#allocation12 + $0x160] ss:$16 sps:$4 sm:$0xff]  }
0x1103   : > { %7611 = vmatmul.mubr.bf16.vlgmr.msra.gmra.mrb[148].mxu0 %v7383_v14  ;;  %9987 = vmatmul.mubr.msk.bf16.vlgmr.msra.gmra.mrb[212].mxu1 %vm5355_vm6, %v7622_v36  ;;  %v12248_v14 = vld [vmem:[#allocation12 + $0x140] ss:$16 sps:$4 sm:$0xff]   ;;  %v12262_v36 = vld [vmem:[#allocation12 + $0x184] ss:$16 sps:$4 sm:$0xff]  }
0x1104   : > { %7863 = vmatpush1.bf16.msra.mxu1 %v12140_v38  ;;  %8330 = vmatpush1.bf16.msra.mxu0 %v12188_v8  ;;  %v12260_v38 = vld [vmem:[#allocation12 + $0x180] ss:$16 sps:$4 sm:$0xff]   ;;  %v12233_v8 = vld [vmem:[#allocation12 + $0xe8] ss:$16 sps:$4 sm:$0xff]  }
0x1105   : > { %7864 = vmatprep.subr.bf16.mxu1 %v12145_v53  ;;  %8331 = vmatprep.subr.bf16.mxu0 %v12196_v27  ;;  %v12266_v53 = vld [vmem:[#allocation12 + $0x1a0] ss:$16 sps:$4 sm:$0xff]   ;;  %v12247_v27 = vld [vmem:[#allocation12 + $0x12c] ss:$16 sps:$4 sm:$0xff]  }
0x1108   : > { %7865 = vmatpush1.bf16.msra.mxu1 %v12143_v10  ;;  %8332 = vmatpush1.bf16.msra.mxu0 %v12194_v30  ;;  %v12245_v30 = vld [vmem:[#allocation12 + $0x128] ss:$16 sps:$4 sm:$0xff]  }
0x1109   : > { %7866 = vmatprep.subr.bf16.mxu1 %v12148_v35  ;;  %8333 = vmatprep.subr.bf16.mxu0 %v12202_v26  ;;  %v12253_v26 = vld [vmem:[#allocation12 + $0x14c] ss:$16 sps:$4 sm:$0xff]  }
0x110c   : > { %7867 = vmatpush1.bf16.msra.mxu1 %v12146_v50  ;;  %8334 = vmatpush1.bf16.msra.mxu0 %v12200_v37  ;;  %v12251_v37 = vld [vmem:[#allocation12 + $0x148] ss:$16 sps:$4 sm:$0xff]  }
0x110d   : > { %7868 = vmatprep.subr.bf16.mxu1 %v12151_v5  ;;  %8335 = vmatprep.subr.bf16.mxu0 %v12208_v17  ;;  %v12259_v17 = vld [vmem:[#allocation12 + $0x16c] ss:$16 sps:$4 sm:$0xff]  }
0x1110   : > { %7869 = vmatpush1.bf16.msra.mxu1 %v12149_v25  ;;  %8336 = vmatpush1.bf16.msra.mxu0 %v12206_v40  ;;  %v12257_v40 = vld [vmem:[#allocation12 + $0x168] ss:$16 sps:$4 sm:$0xff]  }
0x1111   : > { %7870 = vmatprep.subr.bf16.mxu1 %v12154_v44  ;;  %8337 = vmatprep.subr.bf16.mxu0 %v12214_v41  ;;  %v12265_v41 = vld [vmem:[#allocation12 + $0x18c] ss:$16 sps:$4 sm:$0xff]  }
0x1114   : > { %7871 = vmatpush1.bf16.msra.mxu1 %v12152_v45  ;;  %8338 = vmatpush1.bf16.msra.mxu0 %v12212_v39  ;;  %v12263_v39 = vld [vmem:[#allocation12 + $0x188] ss:$16 sps:$4 sm:$0xff]  }
0x1115   : > { %7872 = vmatprep.subr.bf16.mxu1 %v12157_v46  ;;  %8339 = vmatprep.subr.bf16.mxu0 %v12220_v3  ;;  %v12271_v3 = vld [vmem:[#allocation12 + $0x1ac] ss:$16 sps:$4 sm:$0xff]  }
0x1118   : > { %7873 = vmatpush1.bf16.msra.mxu1 %v12155_v58  ;;  %8340 = vmatpush1.bf16.msra.mxu0 %v12218_v56  ;;  %v12269_v56 = vld [vmem:[#allocation12 + $0x1a8] ss:$16 sps:$4 sm:$0xff]  }
0x1119   : > { %7874 = vmatprep.subr.bf16.mxu1 %v12160_v60  ;;  %8341 = vmatprep.subr.bf16.mxu0 %v12226_v1  ;;  %v12274_v1 = vld [vmem:[#allocation12 + $0x1c4] ss:$16 sps:$4 sm:$0xff]  }
0x111c   : > { %7875 = vmatpush1.bf16.msra.mxu1 %v12158_v9  ;;  %8342 = vmatpush1.bf16.msra.mxu0 %v12224_v6  ;;  %v12277_v6 = vld [vmem:[#allocation12 + $0x1cc] ss:$16 sps:$4 sm:$0xff]  }
0x111d   : > { %7876 = vmatprep.subr.bf16.mxu1 %v12163_v11  ;;  %8343 = vmatprep.subr.bf16.mxu0 %v12232_v57  ;;  %v12272_v57 = vld [vmem:[#allocation12 + $0x1c0] ss:$16 sps:$4 sm:$0xff]  }
0x1120   : > { %7877 = vmatpush1.bf16.msra.mxu1 %v12161_v13  ;;  %8344 = vmatpush1.bf16.msra.mxu0 %v12230_v0  ;;  %v12275_v0 = vld [vmem:[#allocation12 + $0x1c8] ss:$16 sps:$4 sm:$0xff]  }
0x1121   : > { %7878 = vmatprep.subr.bf16.mxu1 %v12166_v22  ;;  %8345 = vmatprep.subr.bf16.mxu0 %v12238_v49  ;;  %v12191_v22 = vld [vmem:[#allocation12 + $0x8] ss:$16 sps:$4 sm:$0xff]   ;;  %v12280_v49 = vld [vmem:[#allocation12 + $0x1e4] ss:$16 sps:$4 sm:$0xff]  }
0x1124   : > { %7879 = vmatpush1.bf16.msra.mxu1 %v12164_v18  ;;  %8346 = vmatpush1.bf16.msra.mxu0 %v12236_v48  ;;  %v12283_v48 = vld [vmem:[#allocation12 + $0x1ec] ss:$16 sps:$4 sm:$0xff]  }
0x1125   : > { %7880 = vmatprep.subr.bf16.mxu1 %v12169_v23  ;;  %8347 = vmatprep.subr.bf16.mxu0 %v12244_v12  ;;  %v12278_v12 = vld [vmem:[#allocation12 + $0x1e0] ss:$16 sps:$4 sm:$0xff]  }
0x1128   : > { %7881 = vmatpush1.bf16.msra.mxu1 %v12167_v16  ;;  %8348 = vmatpush1.bf16.msra.mxu0 %v12242_v59  ;;  %v12281_v59 = vld [vmem:[#allocation12 + $0x1e8] ss:$16 sps:$4 sm:$0xff]  }
0x1129   : > { %7882 = vmatprep.subr.bf16.mxu1 %v12172_v29  ;;  %8349 = vmatprep.subr.bf16.mxu0 %v12250_v21  ;;  %v12284_v21 = vld [vmem:[#allocation13 + $0x40] sm:$0xff]  }
0x112c   : > { %7883 = vmatpush1.bf16.msra.mxu1 %v12170_v31  ;;  %8350 = vmatpush1.bf16.msra.mxu0 %v12248_v14  ;;  %v12205_v31 = vld [vmem:[#allocation12 + $0x4c] ss:$16 sps:$4 sm:$0xff]   ;;  %v7905_v14 = vld [vmem:[%s15217_s0] sm:$0x3] }
0x112d   : > { %7884 = vmatprep.subr.bf16.mxu1 %v12175_v32  ;;  %8351 = vmatprep.subr.bf16.mxu0 %v12256_v20  ;;  %v12203_v32 = vld [vmem:[#allocation12 + $0x48] ss:$16 sps:$4 sm:$0xff]   ;;  %v7910_v20 = vrot.slane %v7905_v14, %v14184_v2 }
0x1130   : > { %7885 = vmatpush1.bf16.msra.mxu1 %v12173_v34  ;;  %8352 = vmatpush1.bf16.msra.mxu0 %v12254_v33  ;;  %v12211_v34 = vld [vmem:[#allocation12 + $0x6c] ss:$16 sps:$4 sm:$0xff]  }
0x1131   : > { %7886 = vmatprep.subr.bf16.mxu1 %v12178_v42  ;;  %8353 = vmatprep.subr.bf16.mxu0 %v12262_v36  ;;  %v12209_v42 = vld [vmem:[#allocation12 + $0x68] ss:$16 sps:$4 sm:$0xff]   ;;  %v7914_v36 = vrot.slane %v7905_v14, %v14190_v55 }
0x1132   : > { %v12310_v14 = vld [vmem:[#allocation13 + $0xe8] sm:$0xff]  }
0x1134   : > { %7887 = vmatpush1.bf16.msra.mxu1 %v12176_v43  ;;  %8354 = vmatpush1.bf16.msra.mxu0 %v12260_v38  ;;  %v12217_v43 = vld [vmem:[#allocation12 + $0x8c] ss:$16 sps:$4 sm:$0xff]  }
0x1135   : > { %7888 = vmatprep.subr.bf16.mxu1 %v12181_v52  ;;  %8355 = vmatprep.subr.bf16.mxu0 %v12268_v54  ;;  %v12215_v52 = vld [vmem:[#allocation12 + $0x88] ss:$16 sps:$4 sm:$0xff]  }
0x1138   : > { %7889 = vmatpush1.bf16.msra.mxu1 %v12179_v61  ;;  %8356 = vmatpush1.bf16.msra.mxu0 %v12266_v53  ;;  %v12223_v61 = vld [vmem:[#allocation12 + $0xac] ss:$16 sps:$4 sm:$0xff]  }
0x1139   : > { %7890 = vmatprep.subr.bf16.mxu1 %v12184_v62  ;;  %v12221_v62 = vld [vmem:[#allocation12 + $0xa8] ss:$16 sps:$4 sm:$0xff]   ;;  %8357 = vmatprep.subr.bf16.mxu0 %v12274_v1 }
0x113a   : > { %v12302_v1 = vld [vmem:[#allocation13 + $0xc8] sm:$0xff]  }
0x113c   : > { %7891 = vmatpush1.bf16.msra.mxu1 %v12182_v63  ;;  %v12229_v63 = vld [vmem:[#allocation12 + $0xcc] ss:$16 sps:$4 sm:$0xff]   ;;  %8358 = vmatpush1.bf16.msra.mxu0 %v12272_v57  ;;  %v12304_v57 = vld [vmem:[#allocation13 + $0xd0] sm:$0xff]  }
0x113d   : > { %7892 = vmatprep.subr.bf16.mxu1 %v12187_v28  ;;  %v12227_v28 = vld [vmem:[#allocation12 + $0xc8] ss:$16 sps:$4 sm:$0xff]   ;;  %8359 = vmatprep.subr.bf16.mxu0 %v12280_v49 }
0x113e   : > { %v12306_v49 = vld [vmem:[#allocation13 + $0xd8] sm:$0xff]  }
0x1140   : > { %7893 = vmatpush1.bf16.msra.mxu1 %v12185_v7  ;;  %v12235_v7 = vld [vmem:[#allocation12 + $0xec] ss:$16 sps:$4 sm:$0xff]   ;;  %8360 = vmatpush1.bf16.msra.mxu0 %v12278_v12  ;;  %v12308_v12 = vld [vmem:[#allocation13 + $0xe0] sm:$0xff]  }
0x1141   : > { %8370 = vmatprep.subr.bf16.mxu1 %v12193_v19  ;;  %v12239_v19 = vld [vmem:[#allocation12 + $0x108] ss:$16 sps:$4 sm:$0xff]   ;;  %10754 = vmatprep.subr.bf16.mxu0 %v12284_v21  ;;  %v7999_v21 = vsub.s32 2, %v14181_v51 }
0x11ce   : > { %v7328_v4 = vpop.f32.mrb[208].mxu1 }
0x11cf   : > { %v7335_v10 = vadd.f32 %v7328_v4, %v15009_v47  ;;  %v7330_v35 = vpop.f32.mrb[209].mxu1  ;;  %v12199_v47 = vld [vmem:[#allocation12 + $0x2c] ss:$16 sps:$4 sm:$0xff]  }
0x11d0   : > { %v7336_v50 = vadd.f32 %v7330_v35, %v15011_v24  ;;  %v7332_v5 = vpop.f32.mrb[210].mxu1  ;;  %v12197_v24 = vld [vmem:[#allocation12 + $0x28] ss:$16 sps:$4 sm:$0xff]  }
0x11d1   : > { %v7333_v25 = vpop.f32.mrb[211].mxu1 }
0x11d6   : > { %v7612_v44 = vpop.f32.mrb[148].mxu0  ;;  %v7660_v45 = vpop.f32.mrb[212].mxu1 }
0x11d7   : > { %v15114_v46 = vadd.f32 %v7612_v44, %v7335_v10  ;;  %v7614_v58 = vpop.f32.mrb[149].mxu0  ;;  %v7662_v60 = vpop.f32.mrb[213].mxu1  ;;  %v7667_v23 = vpack.c.bf16 %v7660_v45, %v7660_v45  ;;  %v12285_v45 = vld [vmem:[#allocation13] sm:$0xff]  }
0x11d8   : > { %v15116_v9 = vadd.f32 %v7614_v58, %v7336_v50  ;;  %v7668_v11 = vpack.c.bf16 %v7662_v60, %v7662_v60  ;;  %v7664_v13 = vpop.f32.mrb[214].mxu1  ;;  %v7616_v18 = vpop.f32.mrb[150].mxu0  ;;  %v12286_v60 = vld [vmem:[#allocation13 + $0x48] sm:$0xff]  }
0x11d9   : > { %v7665_v16 = vpop.f32.mrb[215].mxu1  ;;  %v7617_v29 = vpop.f32.mrb[151].mxu0  ;;  %v12290_v13 = vld [vmem:[#allocation13 + $0x58] sm:$0xff]   ;;  %v12292_v18 = vld [vmem:[#allocation13 + $0x60] sm:$0xff]  }
0x11da   : > { %7894 = vmatprep.mubr.bf16.mxu1 %v7668_v11  ;;  %v12287_v11 = vld [vmem:[#allocation13 + $0x8] sm:$0xff]   ;;  %v12296_v29 = vld [vmem:[#allocation13 + $0x70] sm:$0xff]  }
0x11db   : > { %7895 = vmatmul.mubr.bf16.vlgmr.msra.gmra.mrb[216].mxu1 %v7667_v23  ;;  %v12293_v23 = vld [vmem:[#allocation13 + $0x20] sm:$0xff]   ;;  %v12294_v16 = vld [vmem:[#allocation13 + $0x68] sm:$0xff]  }
0x11dc   : > { %8371 = vmatpush1.bf16.msra.mxu1 %v12191_v22  ;;  %v12291_v22 = vld [vmem:[#allocation13 + $0x18] sm:$0xff]  }
0x11dd   : > { %8372 = vmatprep.subr.bf16.mxu1 %v12199_v47  ;;  %v12295_v47 = vld [vmem:[#allocation13 + $0x28] sm:$0xff]  }
0x11e0   : > { %8373 = vmatpush1.bf16.msra.mxu1 %v12197_v24  ;;  %v12297_v24 = vld [vmem:[#allocation13 + $0x30] sm:$0xff]  }
0x11e1   : > { %8374 = vmatprep.subr.bf16.mxu1 %v12205_v31  ;;  %v12298_v31 = vld [vmem:[#allocation13 + $0x78] sm:$0xff]  }
0x11e4   : > { %8375 = vmatpush1.bf16.msra.mxu1 %v12203_v32  ;;  %v12299_v32 = vld [vmem:[#allocation13 + $0x38] sm:$0xff]  }
0x11e5   : > { %8376 = vmatprep.subr.bf16.mxu1 %v12211_v34  ;;  %v12300_v34 = vld [vmem:[#allocation13 + $0xc0] sm:$0xff]  }
0x11e8   : > { %8377 = vmatpush1.bf16.msra.mxu1 %v12209_v42  ;;  %v7987_v42 = vld [vmem:[%s15218_s8] sm:$0xf] }
0x11e9   : > { %8378 = vmatprep.subr.bf16.mxu1 %v12217_v43  ;;  %v8003_v43 = vsub.s32 3, %v14181_v51 }
0x11ec   : > { %8379 = vmatpush1.bf16.msra.mxu1 %v12215_v52  ;;  %v7992_v52 = vrot.slane %v7987_v42, %v14184_v2 }
0x11ed   : > { %8380 = vmatprep.subr.bf16.mxu1 %v12223_v61  ;;  %v7996_v61 = vrot.slane %v7987_v42, %v14190_v55 }
0x11f0   : > { %8381 = vmatpush1.bf16.msra.mxu1 %v12221_v62  ;;  %v8004_v62 = vrot.slane %v7987_v42, %v8003_v43 }
0x11f1   : > { %8382 = vmatprep.subr.bf16.mxu1 %v12229_v63 }
0x11f4   : > { %8383 = vmatpush1.bf16.msra.mxu1 %v12227_v28 }
0x11f5   : > { %8384 = vmatprep.subr.bf16.mxu1 %v12235_v7 }
0x11f8   : > { %8385 = vmatpush1.bf16.msra.mxu1 %v12233_v8 }
0x11f9   : > { %8386 = vmatprep.subr.bf16.mxu1 %v12241_v15 }
0x11fc   : > { %8387 = vmatpush1.bf16.msra.mxu1 %v12239_v19 }
0x11fd   : > { %8388 = vmatprep.subr.bf16.mxu1 %v12247_v27 }
0x1200   : > { %8389 = vmatpush1.bf16.msra.mxu1 %v12245_v30 }
0x1201   : > { %8390 = vmatprep.subr.bf16.mxu1 %v12253_v26 }
0x1204   : > { %8391 = vmatpush1.bf16.msra.mxu1 %v12251_v37 }
0x1205   : > { %8392 = vmatprep.subr.bf16.mxu1 %v12259_v17 }
0x1208   : > { %8393 = vmatpush1.bf16.msra.mxu1 %v12257_v40 }
0x1209   : > { %8394 = vmatprep.subr.bf16.mxu1 %v12265_v41 }
0x120c   : > { %8395 = vmatpush1.bf16.msra.mxu1 %v12263_v39 }
0x120d   : > { %8396 = vmatprep.subr.bf16.mxu1 %v12271_v3 }
0x1210   : > { %8397 = vmatpush1.bf16.msra.mxu1 %v12269_v56  ;;  %v12301_v56 = vld [vmem:[#allocation13 + $0x80] sm:$0xff]  }
0x1211   : > { %8398 = vmatprep.subr.bf16.mxu1 %v12277_v6  ;;  %v12303_v6 = vld [vmem:[#allocation13 + $0x88] sm:$0xff]  }
0x1214   : > { %8399 = vmatpush1.bf16.msra.mxu1 %v12275_v0  ;;  %v12305_v0 = vld [vmem:[#allocation13 + $0x90] sm:$0xff]  }
0x1215   : > { %8400 = vmatprep.subr.bf16.mxu1 %v12283_v48  ;;  %v12307_v48 = vld [vmem:[#allocation13 + $0x98] sm:$0xff]  }
0x1218   : > { %8401 = vmatpush1.bf16.msra.mxu1 %v12281_v59  ;;  %v12309_v59 = vld [vmem:[#allocation13 + $0xa0] sm:$0xff]  }
0x12ae   : > { %v7896_v33 = vpop.f32.mrb[216].mxu1 }
0x12af   : > { %v7903_v38 = vadd.f32 %v7896_v33, %v15114_v46  ;;  %v7898_v54 = vpop.f32.mrb[217].mxu1  ;;  %v12288_v46 = vld [vmem:[#allocation13 + $0x50] sm:$0xff]   ;;  %v8000_v33 = vrot.slane %v7987_v42, %v7999_v21 }
0x12b0   : > { %v7904_v53 = vadd.f32 %v7898_v54, %v15116_v9  ;;  %v7900_v4 = vpop.f32.mrb[218].mxu1  ;;  %v12289_v9 = vld [vmem:[#allocation13 + $0x10] sm:$0xff]  }
0x12b1   : > { %v7917_v10 = vadd.f32 %v7910_v20, %v7903_v38  ;;  %v7901_v35 = vpop.f32.mrb[219].mxu1  ;;  %v12311_v20 = vld [vmem:[#allocation13 + $0xa8] sm:$0xff]   ;;  %v12313_v38 = vld [vmem:[#allocation13 + $0xb0] sm:$0xff]   ;;  %v12315_v4 = vld [vmem:[#allocation13 + $0xb8] sm:$0xff]  }
0x12b2   : > { %v7918_v50 = vadd.f32 %v7914_v36, %v7904_v53  ;;  %v12312_v36 = vld [vmem:[#allocation13 + $0xf0] sm:$0xff]   ;;  %v12314_v53 = vld [vmem:[#allocation13 + $0xf8] sm:$0xff]  }
0x12b3   : > { %v7919_v5 = vmax.f32 %v7917_v10, 0.0 }
0x12b4   : > { %v7920_v25 = vmax.f32 %v7918_v50, 0.0 }
0x12b5   : > { %v7921_v58 = vpack.c.bf16 %v7919_v5, %v7919_v5 }
0x12b6   : > { %v7922_v44 = vpack.c.bf16 %v7920_v25, %v7920_v25 }
0x12b8   : > { %8361 = vmatprep.mubr.bf16.mxu0 %v7922_v44  ;;  %8402 = vmatprep.mubr.bf16.mxu1 %v7922_v44 }
0x12b9   : > { %8362 = vmatmul.mubr.bf16.vlgmr.msra.gmra.mrb[152].mxu0 %v7921_v58  ;;  %8403 = vmatmul.mubr.bf16.vlgmr.msra.gmra.mrb[220].mxu1 %v7921_v58 }
0x12ba   : > { %10755 = vmatpush3.bf16.msra.mxu0 %v12285_v45  ;;  %v10116_v45 = vld [vmem:[%s15219_s22] ss:$0 sm:$0xff] }
0x12bb   : > { %10756 = vmatprep.subr.bf16.mxu0 %v12286_v60 }
0x12be   : > { %10757 = vmatpush3.bf16.msra.mxu0 %v12287_v11 }
0x12bf   : > { %10758 = vmatprep.subr.bf16.mxu0 %v12288_v46 }
0x12c2   : > { %10759 = vmatpush3.bf16.msra.mxu0 %v12289_v9 }
0x12c3   : > { %10760 = vmatprep.subr.bf16.mxu0 %v12290_v13 }
0x12c6   : > { %10761 = vmatpush3.bf16.msra.mxu0 %v12291_v22 }
0x12c7   : > { %10762 = vmatprep.subr.bf16.mxu0 %v12292_v18 }
0x12ca   : > { %10763 = vmatpush3.bf16.msra.mxu0 %v12293_v23 }
0x12cb   : > { %10764 = vmatprep.subr.bf16.mxu0 %v12294_v16 }
0x12ce   : > { %10765 = vmatpush3.bf16.msra.mxu0 %v12295_v47 }
0x12cf   : > { %10766 = vmatprep.subr.bf16.mxu0 %v12296_v29 }
0x12d2   : > { %10767 = vmatpush3.bf16.msra.mxu0 %v12297_v24 }
0x12d3   : > { %10768 = vmatprep.subr.bf16.mxu0 %v12298_v31 }
0x12d6   : > { %10769 = vmatpush3.bf16.msra.mxu0 %v12299_v32 }
0x12d7   : > { %10776 = vmatprep.subr.bf16.mxu0 %v12300_v34 }
0x138c   : > { %v8363_v63 = vpop.f32.mrb[152].mxu0  ;;  %v8404_v28 = vpop.f32.mrb[220].mxu1 }
0x138d   : > { %v8364_v7 = vadd.f32 %v8363_v63, %v7992_v52  ;;  %v8365_v8 = vpop.f32.mrb[153].mxu0  ;;  %v8406_v15 = vpop.f32.mrb[221].mxu1  ;;  %v8405_v54 = vadd.f32 %v8404_v28, %v8000_v33 }
0x138e   : > { %v8366_v19 = vadd.f32 %v8365_v8, %v7996_v61  ;;  %v8407_v27 = vadd.f32 %v8406_v15, %v8004_v62  ;;  %v8367_v30 = vpop.f32.mrb[154].mxu0  ;;  %v8408_v26 = vpop.f32.mrb[222].mxu1 }
0x138f   : > { %v8411_v37 = vmax.f32 %v8364_v7, 0.0  ;;  %v8368_v17 = vpop.f32.mrb[155].mxu0  ;;  %v8409_v40 = vpop.f32.mrb[223].mxu1  ;;  %v8413_v10 = vmax.f32 %v8405_v54, 0.0 }
0x1390   : > { %v8412_v41 = vmax.f32 %v8366_v19, 0.0  ;;  %v8414_v39 = vmax.f32 %v8407_v27, 0.0 }
0x1391   : > { %v8415_v2 = vpack.c.bf16 %v8411_v37, %v8411_v37  ;;  %v8417_v35 = vpack.c.bf16 %v8413_v10, %v8413_v10 }
0x1392   : > { %v8416_v3 = vpack.c.bf16 %v8412_v41, %v8412_v41  ;;  %v8418_v55 = vpack.c.bf16 %v8414_v39, %v8414_v39 }
0x1394   : > { %8714 = vmatprep.mubr.bf16.mxu0 %v8416_v3 }
0x1395   : > { %8715 = vmatmul.mubr.bf16.vlgmr.msra.gmra.mrb[156].mxu0 %v8415_v2 }
0x1396   : > { %10777 = vmatpush3.bf16.msra.mxu0 %v12301_v56  ;;  %8754 = vmatprep.mubr.bf16.mxu0 %v8418_v55 }
0x1397   : > { %10778 = vmatprep.subr.bf16.mxu0 %v12302_v1 }
0x139a   : > { %10779 = vmatpush3.bf16.msra.mxu0 %v12303_v6 }
0x139b   : > { %10780 = vmatprep.subr.bf16.mxu0 %v12304_v57 }
0x139e   : > { %10781 = vmatpush3.bf16.msra.mxu0 %v12305_v0 }
0x139f   : > { %10782 = vmatprep.subr.bf16.mxu0 %v12306_v49 }
0x13a2   : > { %10783 = vmatpush3.bf16.msra.mxu0 %v12307_v48 }
0x13a3   : > { %10784 = vmatprep.subr.bf16.mxu0 %v12308_v12 }
0x13a6   : > { %10785 = vmatpush3.bf16.msra.mxu0 %v12309_v59 }
0x13a7   : > { %10786 = vmatprep.subr.bf16.mxu0 %v12310_v14 }
0x13aa   : > { %10787 = vmatpush3.bf16.msra.mxu0 %v12311_v20 }
0x13ab   : > { %10788 = vmatprep.subr.bf16.mxu0 %v12312_v36 }
0x13ae   : > { %10789 = vmatpush3.bf16.msra.mxu0 %v12313_v38 }
0x13af   : > { %10790 = vmatprep.subr.bf16.mxu0 %v12314_v53 }
0x13b2   : > { %10791 = vmatpush3.bf16.msra.mxu0 %v12315_v4 }
0x13b5   : > { %8755 = vmatmul.mubr.bf16.vlgmr.msra.gmra.mrb[160].mxu0 %v8417_v35 }
0x1468   : > { %v10770_v51 = vpop.f32.mrb[156].mxu0 }
0x1469   : > { %v10771_v50 = vpop.f32.mrb[157].mxu0 }
0x146a   : > { %v10772_v5 = vadd.f32 %v10771_v50, %v10770_v51  ;;  %v10773_v25 = vpop.f32.mrb[158].mxu0 }
0x146b   : > { %v10774_v44 = vpop.f32.mrb[159].mxu0 }
0x146c   : > { %v8717_v11 = vadd.f32 %v10772_v5, %v10116_v45 }
0x1488   : > { %v10792_v58 = vpop.f32.mrb[160].mxu0 }
0x1489   : > { %v10793_v60 = vpop.f32.mrb[161].mxu0 }
0x148a   : > { %v10794_v46 = vadd.f32 %v10793_v60, %v10792_v58  ;;  %v10795_v9 = vpop.f32.mrb[162].mxu0 }
0x148b   : > { %v10796_v13 = vpop.f32.mrb[163].mxu0 }
0x148c   : > { %v8757_v22 = vadd.f32 %v10794_v46, %v8717_v11 }
0x148e   : > { %v8763_v18 = vsel %vm8762_vm7, %v8757_v22, 0.0 }
0x148f   : > { %v8764_v23 = vrot.slane %v8763_v18, 4 }
0x1491   : > { %v8765_v16 = vadd.f32 %v8764_v23, %v8763_v18 }
0x1493   : > { %v8766_v47 = vrot.slane %v8765_v16, 2 }
0x1495   : > { %v8767_v29 = vadd.f32 %v8766_v47, %v8765_v16 }
0x1497   : > { %v8768_v24 = vrot.slane %v8767_v29, 1 }
0x1499   : > { %v8769_v31 = vadd.f32 %v8768_v24, %v8767_v29 }
0x149b   : > { %v8770_v32 = vmul.f32 0.25, %v8769_v31 }
0x149d   : > { %8771 = vst [vmem:[%s798_s21] sm:$0xff] %v8770_v32 }
0x149e PF: > { %s15221_s5 = sld [smem:[#allocation20_spill]] }
0x14a4   : > { %s37_s3 = sadd.s32 1, %s15221_s5  }
0x14a5   : > { %p34_p11 = scmp.ge.s32.totalorder %s37_s3, 4  }
0x14a7   :  { %36 = sbr.rel (!%p34_p11) target bundleno = 20 (0x14), region = 219 }
0x14ae   :  { %8791 = vsyncpa [#allocation3], 1 }
0x14af   :  { %8793 = vsyncpa [#allocation3 + $0x1], 1 }
0x14b0   :  { %8794 = vsyncpa [#allocation5], 1 }
0x14b1   :  { %8795 = vsyncpa [#allocation8], 1 }
0x14b2   :  { %8796 = vsyncpa [#allocation11], 1 }
0x14b3   :  { %8797 = vsyncpa [#allocation14], 1 }

</bundles_post_ra>
